<compile_context>
chip_gen: v5e
topology: v5e:2x2
jax: 0.10.0
libtpu: 0.0.40
codegen_flags: <defaults>
</compile_context>

<pallas_src>
import functools

import jax
import jax.numpy as jnp
from jax.experimental import pallas as pl
from jax.experimental.pallas import tpu as pltpu


def _round_up(v, m):
    return ((v + m - 1) // m) * m


def _segment_reduce_kernel(mem_row_ref, mem_col_ref, x_ref, max_ref, sum_ref,
                           *, num_graphs_padded, dot_precision):
    """Per (feature-block, node-tile) grid step.

    mem_row_ref : (1, TN)  int32   lane-dense membership (-1 for padded nodes)
    mem_col_ref : (TN, 1)  int32   sublane-oriented copy (for the max mask)
    x_ref       : (TN, Dt) f32/bf16 node features (zero padded)
    max_ref     : (Bp, Dt) f32     resident segment-max accumulator (output)
    sum_ref     : (Bp, Dt) f32     resident segment-sum accumulator (output)
    """
    nt = pl.program_id(1)                     # node-tile (reduction) axis

    @pl.when(nt == 0)
    def _init():
        max_ref[...] = jnp.full_like(max_ref, -jnp.inf)
        sum_ref[...] = jnp.zeros_like(sum_ref)

    x = x_ref[...]                            # (TN, Dt)
    mem_row = mem_row_ref[...]                # (1, TN)
    mem_col = mem_col_ref[...]                # (TN, 1)
    tn = x.shape[0]
    bp = num_graphs_padded

    # ---- segment sum on the MXU: one-hot already in (Bp, TN) orientation, so the
    #      contraction is a plain matmul (no XLU transpose of the lhs).
    gids = jax.lax.broadcasted_iota(jnp.int32, (bp, tn), 0)
    one_hot = (mem_row == gids).astype(x.dtype)                   # (Bp, TN)
    sum_ref[...] += jnp.dot(one_hot, x,
                            preferred_element_type=jnp.float32,
                            precision=dot_precision)              # (Bp, Dt)

    # ---- segment max: one masked sublane-reduce per graph; each row is written
    #      straight into the resident output block (no concat, no Bp live rows).
    neg_inf = jnp.asarray(-jnp.inf, dtype=x.dtype)

    def _per_graph(g, carry):
        mask = mem_col == g                                       # (TN, 1)
        row = jnp.max(jnp.where(mask, x, neg_inf),
                      axis=0, keepdims=True).astype(jnp.float32)  # (1, Dt)
        max_ref[pl.ds(g, 1), :] = jnp.maximum(max_ref[pl.ds(g, 1), :], row)
        return carry

    jax.lax.fori_loop(0, bp, _per_graph, 0, unroll=(bp <= 16))

    @pl.when(nt == pl.num_programs(1) - 1)
    def _finalize():
        m = max_ref[...]
        # Empty graphs (and padded graph rows) keep the -inf init; the zero-init
        # scatter leaves those rows at 0, so replace before the merge.
        max_ref[...] = jnp.where(m == -jnp.inf, 0.0, m)


def graph_readout(x, membership, merge_w, merge_b, num_graphs, *,
                  node_tile=512, feature_tile=512, x_dtype=jnp.float32):
    """GraphReadout forward. merge_w is the PyTorch Linear weight of shape (D, 2D)."""
    node_num, feature_dim = x.shape

    # Padded / tiled extents.
    d_pad = _round_up(feature_dim, 128)
    feature_tile = max(128, _round_up(min(feature_tile, d_pad), 128))
    d_pad = _round_up(d_pad, feature_tile)
    b_pad = _round_up(max(int(num_graphs), 1), 8)
    node_tile = max(128, _round_up(min(node_tile, _round_up(node_num, 128)), 128))
    n_pad = _round_up(node_num, node_tile)

    # Pad nodes (membership = -1 matches no graph) and features (zeros).
    x_p = jnp.zeros((n_pad, d_pad), x_dtype).at[:node_num, :feature_dim].set(
        x.astype(x_dtype))
    mem = membership.astype(jnp.int32)
    mem_row = jnp.full((1, n_pad), -1, jnp.int32).at[0, :node_num].set(mem)
    mem_col = jnp.full((n_pad, 1), -1, jnp.int32).at[:node_num, 0].set(mem)

    f_tiles = d_pad // feature_tile
    n_tiles = n_pad // node_tile
    itemsize = jnp.dtype(x_dtype).itemsize

    # VMEM footprint estimate (double-buffered inputs + 2 resident output blocks);
    # the (TN,1) int32 block costs node_tile*512 B in tiled layout (flagged waste,
    # kept only for the sublane-oriented max mask; its HBM payload is 4B/node).
    vmem_est = (2 * node_tile * feature_tile * itemsize
                + 2 * node_tile * 32
                + 2 * node_tile * 512
                + 2 * 2 * b_pad * feature_tile * 4)
    vmem_limit = int(min(max(2 * vmem_est + (4 << 20), 32 << 20), 64 << 20))

    dot_precision = (jax.lax.Precision.HIGHEST if x_dtype == jnp.float32
                     else jax.lax.Precision.DEFAULT)
    kernel = functools.partial(_segment_reduce_kernel,
                               num_graphs_padded=b_pad,
                               dot_precision=dot_precision)

    x_max_p, x_sum_p = pl.pallas_call(
        kernel,
        out_shape=(jax.ShapeDtypeStruct((b_pad, d_pad), jnp.float32),
                   jax.ShapeDtypeStruct((b_pad, d_pad), jnp.float32)),
        grid_spec=pltpu.PrefetchScalarGridSpec(
            num_scalar_prefetch=0,
            grid=(f_tiles, n_tiles),
            in_specs=[
                pl.BlockSpec((1, node_tile), lambda f, n: (0, n)),             # mem row
                pl.BlockSpec((node_tile, 1), lambda f, n: (n, 0)),             # mem col
                pl.BlockSpec((node_tile, feature_tile), lambda f, n: (n, f)),  # x tile
            ],
            out_specs=[
                pl.BlockSpec((b_pad, feature_tile), lambda f, n: (0, f)),      # max
                pl.BlockSpec((b_pad, feature_tile), lambda f, n: (0, f)),      # sum
            ],
        ),
        compiler_params=pltpu.CompilerParams(
            dimension_semantics=("parallel", "arbitrary"),
            vmem_limit_bytes=vmem_limit),
    )(mem_row, mem_col, x_p)

    x_max = x_max_p[:num_graphs, :feature_dim]
    x_sum = x_sum_p[:num_graphs, :feature_dim]

    # merge_layer: tiny (B, 2D) @ (2D, D) Linear -- hoisted to plain XLA per the
    # perf review (frees VMEM for the streaming phase at ~zero wall-clock cost).
    readout = jnp.concatenate([x_max, x_sum], axis=-1).astype(jnp.float32)
    return (jnp.dot(readout, merge_w.astype(jnp.float32).T,
                    precision=jax.lax.Precision.HIGHEST)
            + merge_b.astype(jnp.float32)[None, :])


def _reference(x, membership, merge_w, merge_b, num_graphs):
    """Pure-JAX reference mirroring the PyTorch forward (for validation)."""
    one_hot = (membership[:, None] == jnp.arange(num_graphs)[None, :])      # (N, B)
    x_sum = jnp.dot(one_hot.astype(x.dtype).T, x,
                    precision=jax.lax.Precision.HIGHEST)                    # (B, D)
    x_max = jnp.max(
        jnp.where(one_hot.T[:, :, None], x[None, :, :], -jnp.inf), axis=1)  # (B, D)
    x_max = jnp.where(jnp.isneginf(x_max), 0.0, x_max)   # empty graph -> 0 (zero-init scatter)
    cat = jnp.concatenate([x_max, x_sum], axis=-1)
    return jnp.dot(cat, merge_w.T, precision=jax.lax.Precision.HIGHEST) + merge_b[None, :]


if __name__ == "__main__":
    key = jax.random.PRNGKey(0)
    k_x, k_w, k_b = jax.random.split(key, 3)

    node_num = 256
    feature_dim = 32
    num_graphs = 4

    x = jax.random.normal(k_x, (node_num, feature_dim), dtype=jnp.float32)
    membership = jnp.arange(node_num, dtype=jnp.int32) % num_graphs   # every graph nonempty

    # merge_layer = nn.Linear(2*feature_dim, feature_dim), PyTorch-style uniform init.
    bound = 1.0 / jnp.sqrt(2.0 * feature_dim)
    merge_w = jax.random.uniform(k_w, (feature_dim, 2 * feature_dim),
                                 minval=-bound, maxval=bound, dtype=jnp.float32)
    merge_b = jax.random.uniform(k_b, (feature_dim,),
                                 minval=-bound, maxval=bound, dtype=jnp.float32)

    # Case 1: default tiling (single 256-node tile), f32 streaming.
    out = graph_readout(x, membership, merge_w, merge_b, num_graphs)
    out = jax.block_until_ready(out)
    ref = _reference(x, membership, merge_w, merge_b, num_graphs)
    assert out.shape == (num_graphs, feature_dim)
    assert jnp.allclose(out, ref, atol=1e-4, rtol=1e-4), "mismatch vs reference (case 1)"

    # Case 2: empty graphs (ids 4, 5 have no nodes) + multi-tile accumulation path.
    num_graphs2 = 6
    out2 = graph_readout(x, membership, merge_w, merge_b, num_graphs2, node_tile=128)
    out2 = jax.block_until_ready(out2)
    ref2 = _reference(x, membership, merge_w, merge_b, num_graphs2)
    assert out2.shape == (num_graphs2, feature_dim)
    assert jnp.allclose(out2, ref2, atol=1e-4, rtol=1e-4), "mismatch vs reference (case 2)"

    # Case 3: bf16 HBM streaming (perf option); compare against the reference on
    # bf16-rounded inputs (products are exact, accumulation stays f32).
    x_bf = x.astype(jnp.bfloat16).astype(jnp.float32)
    out3 = graph_readout(x, membership, merge_w, merge_b, num_graphs,
                         node_tile=128, x_dtype=jnp.bfloat16)
    out3 = jax.block_until_ready(out3)
    ref3 = _reference(x_bf, membership, merge_w, merge_b, num_graphs)
    assert jnp.allclose(out3, ref3, atol=1e-3, rtol=1e-3), "mismatch vs reference (case 3)"

    print("KERNEL_OK")
</pallas_src>

<mosaic_0001>
module attributes {stable_mosaic.version = 11 : i64} {
  func.func @_segment_reduce_kernel(%arg0: i32, %arg1: i32, %arg2: memref<1x256xi32, #tpu.memory_space<vmem>>, %arg3: memref<256x1xi32, #tpu.memory_space<vmem>>, %arg4: memref<256x128xf32, #tpu.memory_space<vmem>>, %arg5: memref<8x128xf32, #tpu.memory_space<vmem>>, %arg6: memref<8x128xf32, #tpu.memory_space<vmem>>) attributes {dimension_semantics = [#tpu.dimension_semantics<parallel>, #tpu.dimension_semantics<arbitrary>], iteration_bounds = array<i64: 1, 1>, scalar_prefetch = 0 : i64, scratch_operands = 0 : i64, tpu.core_type = #tpu.core_type<tc>, window_params = [{transform_indices = @transform_0, window_bounds = array<i64: 1, 256>}, {transform_indices = @transform_1, window_bounds = array<i64: 256, 1>}, {transform_indices = @transform_2, window_bounds = array<i64: 256, 128>}, {transform_indices = @transform_3, window_bounds = array<i64: 8, 128>}, {transform_indices = @transform_4, window_bounds = array<i64: 8, 128>}]} {
    %c0_i32 = arith.constant 0 : i32
    %0 = arith.cmpi eq, %arg1, %c0_i32 : i32
    %1 = arith.extui %0 : i1 to i32
    %c0_i32_0 = arith.constant 0 : i32
    %2 = arith.cmpi ne, %1, %c0_i32_0 : i32
    scf.if %2 {
      %cst_38 = arith.constant 0xFF800000 : f32
      %122 = vector.broadcast %cst_38 : f32 to vector<8x128xf32>
      %c0_39 = arith.constant 0 : index
      %c0_40 = arith.constant 0 : index
      %123 = vector.load %arg5[%c0_39, %c0_40] : memref<8x128xf32, #tpu.memory_space<vmem>>, vector<8x128xf32>
      tpu.vector_store %arg5[%c0_39, %c0_40], %122 {strides = array<i32>} : memref<8x128xf32, #tpu.memory_space<vmem>>, vector<8x128xf32>,
      %cst_41 = arith.constant 0.000000e+00 : f32
      %124 = vector.broadcast %cst_41 : f32 to vector<8x128xf32>
      %c0_42 = arith.constant 0 : index
      %c0_43 = arith.constant 0 : index
      %125 = vector.load %arg6[%c0_42, %c0_43] : memref<8x128xf32, #tpu.memory_space<vmem>>, vector<8x128xf32>
      tpu.vector_store %arg6[%c0_42, %c0_43], %124 {strides = array<i32>} : memref<8x128xf32, #tpu.memory_space<vmem>>, vector<8x128xf32>,
    } else {
    }
    %c0 = arith.constant 0 : index
    %c0_1 = arith.constant 0 : index
    %3 = vector.load %arg4[%c0, %c0_1] : memref<256x128xf32, #tpu.memory_space<vmem>>, vector<256x128xf32>
    %c0_2 = arith.constant 0 : index
    %c0_3 = arith.constant 0 : index
    %4 = vector.load %arg2[%c0_2, %c0_3] : memref<1x256xi32, #tpu.memory_space<vmem>>, vector<1x256xi32>
    %c0_4 = arith.constant 0 : index
    %c0_5 = arith.constant 0 : index
    %5 = vector.load %arg3[%c0_4, %c0_5] : memref<256x1xi32, #tpu.memory_space<vmem>>, vector<256x1xi32>
    %6 = tpu.iota {dimensions = array<i32: 0>} : vector<8x256xi32>
    %7 = vector.broadcast %4 : vector<1x256xi32> to vector<8x256xi32>
    %8 = arith.cmpi eq, %7, %6 : vector<8x256xi32>
    %9 = arith.extui %8 : vector<8x256xi1> to vector<8x256xi32>
    %10 = arith.sitofp %9 : vector<8x256xi32> to vector<8x256xf32>
    %c0_6 = arith.constant 0 : index
    %c0_7 = arith.constant 0 : index
    %11 = vector.load %arg6[%c0_6, %c0_7] : memref<8x128xf32, #tpu.memory_space<vmem>>, vector<8x128xf32>
    %cst = arith.constant dense<0.000000e+00> : vector<8x128xf32>
    %12 = tpu.matmul %10, %3, %cst {dimension_numbers = #tpu.dot_dimension_numbers<[1], [0], [0], [1], [0, 0, 1, 1], [], []>, precision = #tpu.contract_precision<fp32>} : vector<8x256xf32>, vector<256x128xf32>, vector<8x128xf32> -> vector<8x128xf32>
    %13 = arith.addf %11, %12 : vector<8x128xf32>
    %c0_8 = arith.constant 0 : index
    %c0_9 = arith.constant 0 : index
    %14 = vector.load %arg6[%c0_8, %c0_9] : memref<8x128xf32, #tpu.memory_space<vmem>>, vector<8x128xf32>
    tpu.vector_store %arg6[%c0_8, %c0_9], %13 {strides = array<i32>} : memref<8x128xf32, #tpu.memory_space<vmem>>, vector<8x128xf32>,
    %cst_10 = arith.constant 0xFF800000 : f32
    %c0_i32_11 = arith.constant 0 : i32
    %15 = vector.broadcast %c0_i32_11 : i32 to vector<256x1xi32>
    %16 = arith.cmpi eq, %5, %15 : vector<256x1xi32>
    %17 = vector.shape_cast %16 : vector<256x1xi1> to vector<256x1xi1>
    %18 = vector.broadcast %17 : vector<256x1xi1> to vector<256x128xi1>
    %19 = vector.broadcast %cst_10 : f32 to vector<256x128xf32>
    %20 = arith.select %18, %3, %19 : vector<256x128xi1>, vector<256x128xf32>
    %cst_12 = arith.constant dense<0xFF800000> : vector<128xf32>
    %21 = vector.multi_reduction <maximumf>, %20, %cst_12 [0] : vector<256x128xf32> to vector<128xf32>
    %22 = vector.shape_cast %21 : vector<128xf32> to vector<1x128xf32>
    %23 = arith.index_cast %c0_i32_11 : i32 to index
    %c0_13 = arith.constant 0 : index
    %24 = vector.load %arg5[%23, %c0_13] : memref<8x128xf32, #tpu.memory_space<vmem>>, vector<1x128xf32>
    %25 = arith.maximumf %24, %22 : vector<1x128xf32>
    %26 = arith.index_cast %c0_i32_11 : i32 to index
    %c0_14 = arith.constant 0 : index
    %27 = vector.load %arg5[%26, %c0_14] : memref<8x128xf32, #tpu.memory_space<vmem>>, vector<1x128xf32>
    tpu.vector_store %arg5[%26, %c0_14], %25 {strides = array<i32>} : memref<8x128xf32, #tpu.memory_space<vmem>>, vector<1x128xf32>,
    %c1_i32 = arith.constant 1 : i32
    %28 = vector.broadcast %c1_i32 : i32 to vector<256x1xi32>
    %29 = arith.cmpi eq, %5, %28 : vector<256x1xi32>
    %30 = vector.shape_cast %29 : vector<256x1xi1> to vector<256x1xi1>
    %31 = vector.broadcast %30 : vector<256x1xi1> to vector<256x128xi1>
    %32 = vector.broadcast %cst_10 : f32 to vector<256x128xf32>
    %33 = arith.select %31, %3, %32 : vector<256x128xi1>, vector<256x128xf32>
    %cst_15 = arith.constant dense<0xFF800000> : vector<128xf32>
    %34 = vector.multi_reduction <maximumf>, %33, %cst_15 [0] : vector<256x128xf32> to vector<128xf32>
    %35 = vector.shape_cast %34 : vector<128xf32> to vector<1x128xf32>
    %36 = arith.index_cast %c1_i32 : i32 to index
    %c0_16 = arith.constant 0 : index
    %37 = vector.load %arg5[%36, %c0_16] : memref<8x128xf32, #tpu.memory_space<vmem>>, vector<1x128xf32>
    %38 = arith.maximumf %37, %35 : vector<1x128xf32>
    %39 = arith.index_cast %c1_i32 : i32 to index
    %c0_17 = arith.constant 0 : index
    %40 = vector.load %arg5[%39, %c0_17] : memref<8x128xf32, #tpu.memory_space<vmem>>, vector<1x128xf32>
    tpu.vector_store %arg5[%39, %c0_17], %38 {strides = array<i32>} : memref<8x128xf32, #tpu.memory_space<vmem>>, vector<1x128xf32>,
    %c2_i32 = arith.constant 2 : i32
    %41 = vector.broadcast %c2_i32 : i32 to vector<256x1xi32>
    %42 = arith.cmpi eq, %5, %41 : vector<256x1xi32>
    %43 = vector.shape_cast %42 : vector<256x1xi1> to vector<256x1xi1>
    %44 = vector.broadcast %43 : vector<256x1xi1> to vector<256x128xi1>
    %45 = vector.broadcast %cst_10 : f32 to vector<256x128xf32>
    %46 = arith.select %44, %3, %45 : vector<256x128xi1>, vector<256x128xf32>
    %cst_18 = arith.constant dense<0xFF800000> : vector<128xf32>
    %47 = vector.multi_reduction <maximumf>, %46, %cst_18 [0] : vector<256x128xf32> to vector<128xf32>
    %48 = vector.shape_cast %47 : vector<128xf32> to vector<1x128xf32>
    %49 = arith.index_cast %c2_i32 : i32 to index
    %c0_19 = arith.constant 0 : index
    %50 = vector.load %arg5[%49, %c0_19] : memref<8x128xf32, #tpu.memory_space<vmem>>, vector<1x128xf32>
    %51 = arith.maximumf %50, %48 : vector<1x128xf32>
    %52 = arith.index_cast %c2_i32 : i32 to index
    %c0_20 = arith.constant 0 : index
    %53 = vector.load %arg5[%52, %c0_20] : memref<8x128xf32, #tpu.memory_space<vmem>>, vector<1x128xf32>
    tpu.vector_store %arg5[%52, %c0_20], %51 {strides = array<i32>} : memref<8x128xf32, #tpu.memory_space<vmem>>, vector<1x128xf32>,
    %c3_i32 = arith.constant 3 : i32
    %54 = vector.broadcast %c3_i32 : i32 to vector<256x1xi32>
    %55 = arith.cmpi eq, %5, %54 : vector<256x1xi32>
    %56 = vector.shape_cast %55 : vector<256x1xi1> to vector<256x1xi1>
    %57 = vector.broadcast %56 : vector<256x1xi1> to vector<256x128xi1>
    %58 = vector.broadcast %cst_10 : f32 to vector<256x128xf32>
    %59 = arith.select %57, %3, %58 : vector<256x128xi1>, vector<256x128xf32>
    %cst_21 = arith.constant dense<0xFF800000> : vector<128xf32>
    %60 = vector.multi_reduction <maximumf>, %59, %cst_21 [0] : vector<256x128xf32> to vector<128xf32>
    %61 = vector.shape_cast %60 : vector<128xf32> to vector<1x128xf32>
    %62 = arith.index_cast %c3_i32 : i32 to index
    %c0_22 = arith.constant 0 : index
    %63 = vector.load %arg5[%62, %c0_22] : memref<8x128xf32, #tpu.memory_space<vmem>>, vector<1x128xf32>
    %64 = arith.maximumf %63, %61 : vector<1x128xf32>
    %65 = arith.index_cast %c3_i32 : i32 to index
    %c0_23 = arith.constant 0 : index
    %66 = vector.load %arg5[%65, %c0_23] : memref<8x128xf32, #tpu.memory_space<vmem>>, vector<1x128xf32>
    tpu.vector_store %arg5[%65, %c0_23], %64 {strides = array<i32>} : memref<8x128xf32, #tpu.memory_space<vmem>>, vector<1x128xf32>,
    %c4_i32 = arith.constant 4 : i32
    %67 = vector.broadcast %c4_i32 : i32 to vector<256x1xi32>
    %68 = arith.cmpi eq, %5, %67 : vector<256x1xi32>
    %69 = vector.shape_cast %68 : vector<256x1xi1> to vector<256x1xi1>
    %70 = vector.broadcast %69 : vector<256x1xi1> to vector<256x128xi1>
    %71 = vector.broadcast %cst_10 : f32 to vector<256x128xf32>
    %72 = arith.select %70, %3, %71 : vector<256x128xi1>, vector<256x128xf32>
    %cst_24 = arith.constant dense<0xFF800000> : vector<128xf32>
    %73 = vector.multi_reduction <maximumf>, %72, %cst_24 [0] : vector<256x128xf32> to vector<128xf32>
    %74 = vector.shape_cast %73 : vector<128xf32> to vector<1x128xf32>
    %75 = arith.index_cast %c4_i32 : i32 to index
    %c0_25 = arith.constant 0 : index
    %76 = vector.load %arg5[%75, %c0_25] : memref<8x128xf32, #tpu.memory_space<vmem>>, vector<1x128xf32>
    %77 = arith.maximumf %76, %74 : vector<1x128xf32>
    %78 = arith.index_cast %c4_i32 : i32 to index
    %c0_26 = arith.constant 0 : index
    %79 = vector.load %arg5[%78, %c0_26] : memref<8x128xf32, #tpu.memory_space<vmem>>, vector<1x128xf32>
    tpu.vector_store %arg5[%78, %c0_26], %77 {strides = array<i32>} : memref<8x128xf32, #tpu.memory_space<vmem>>, vector<1x128xf32>,
    %c5_i32 = arith.constant 5 : i32
    %80 = vector.broadcast %c5_i32 : i32 to vector<256x1xi32>
    %81 = arith.cmpi eq, %5, %80 : vector<256x1xi32>
    %82 = vector.shape_cast %81 : vector<256x1xi1> to vector<256x1xi1>
    %83 = vector.broadcast %82 : vector<256x1xi1> to vector<256x128xi1>
    %84 = vector.broadcast %cst_10 : f32 to vector<256x128xf32>
    %85 = arith.select %83, %3, %84 : vector<256x128xi1>, vector<256x128xf32>
    %cst_27 = arith.constant dense<0xFF800000> : vector<128xf32>
    %86 = vector.multi_reduction <maximumf>, %85, %cst_27 [0] : vector<256x128xf32> to vector<128xf32>
    %87 = vector.shape_cast %86 : vector<128xf32> to vector<1x128xf32>
    %88 = arith.index_cast %c5_i32 : i32 to index
    %c0_28 = arith.constant 0 : index
    %89 = vector.load %arg5[%88, %c0_28] : memref<8x128xf32, #tpu.memory_space<vmem>>, vector<1x128xf32>
    %90 = arith.maximumf %89, %87 : vector<1x128xf32>
    %91 = arith.index_cast %c5_i32 : i32 to index
    %c0_29 = arith.constant 0 : index
    %92 = vector.load %arg5[%91, %c0_29] : memref<8x128xf32, #tpu.memory_space<vmem>>, vector<1x128xf32>
    tpu.vector_store %arg5[%91, %c0_29], %90 {strides = array<i32>} : memref<8x128xf32, #tpu.memory_space<vmem>>, vector<1x128xf32>,
    %c6_i32 = arith.constant 6 : i32
    %93 = vector.broadcast %c6_i32 : i32 to vector<256x1xi32>
    %94 = arith.cmpi eq, %5, %93 : vector<256x1xi32>
    %95 = vector.shape_cast %94 : vector<256x1xi1> to vector<256x1xi1>
    %96 = vector.broadcast %95 : vector<256x1xi1> to vector<256x128xi1>
    %97 = vector.broadcast %cst_10 : f32 to vector<256x128xf32>
    %98 = arith.select %96, %3, %97 : vector<256x128xi1>, vector<256x128xf32>
    %cst_30 = arith.constant dense<0xFF800000> : vector<128xf32>
    %99 = vector.multi_reduction <maximumf>, %98, %cst_30 [0] : vector<256x128xf32> to vector<128xf32>
    %100 = vector.shape_cast %99 : vector<128xf32> to vector<1x128xf32>
    %101 = arith.index_cast %c6_i32 : i32 to index
    %c0_31 = arith.constant 0 : index
    %102 = vector.load %arg5[%101, %c0_31] : memref<8x128xf32, #tpu.memory_space<vmem>>, vector<1x128xf32>
    %103 = arith.maximumf %102, %100 : vector<1x128xf32>
    %104 = arith.index_cast %c6_i32 : i32 to index
    %c0_32 = arith.constant 0 : index
    %105 = vector.load %arg5[%104, %c0_32] : memref<8x128xf32, #tpu.memory_space<vmem>>, vector<1x128xf32>
    tpu.vector_store %arg5[%104, %c0_32], %103 {strides = array<i32>} : memref<8x128xf32, #tpu.memory_space<vmem>>, vector<1x128xf32>,
    %c7_i32 = arith.constant 7 : i32
    %106 = vector.broadcast %c7_i32 : i32 to vector<256x1xi32>
    %107 = arith.cmpi eq, %5, %106 : vector<256x1xi32>
    %108 = vector.shape_cast %107 : vector<256x1xi1> to vector<256x1xi1>
    %109 = vector.broadcast %108 : vector<256x1xi1> to vector<256x128xi1>
    %110 = vector.broadcast %cst_10 : f32 to vector<256x128xf32>
    %111 = arith.select %109, %3, %110 : vector<256x128xi1>, vector<256x128xf32>
    %cst_33 = arith.constant dense<0xFF800000> : vector<128xf32>
    %112 = vector.multi_reduction <maximumf>, %111, %cst_33 [0] : vector<256x128xf32> to vector<128xf32>
    %113 = vector.shape_cast %112 : vector<128xf32> to vector<1x128xf32>
    %114 = arith.index_cast %c7_i32 : i32 to index
    %c0_34 = arith.constant 0 : index
    %115 = vector.load %arg5[%114, %c0_34] : memref<8x128xf32, #tpu.memory_space<vmem>>, vector<1x128xf32>
    %116 = arith.maximumf %115, %113 : vector<1x128xf32>
    %117 = arith.index_cast %c7_i32 : i32 to index
    %c0_35 = arith.constant 0 : index
    %118 = vector.load %arg5[%117, %c0_35] : memref<8x128xf32, #tpu.memory_space<vmem>>, vector<1x128xf32>
    tpu.vector_store %arg5[%117, %c0_35], %116 {strides = array<i32>} : memref<8x128xf32, #tpu.memory_space<vmem>>, vector<1x128xf32>,
    %c8_i32 = arith.constant 8 : i32
    %c0_i32_36 = arith.constant 0 : i32
    %119 = arith.cmpi eq, %arg1, %c0_i32_36 : i32
    %120 = arith.extui %119 : i1 to i32
    %c0_i32_37 = arith.constant 0 : i32
    %121 = arith.cmpi ne, %120, %c0_i32_37 : i32
    scf.if %121 {
      %c0_38 = arith.constant 0 : index
      %c0_39 = arith.constant 0 : index
      %122 = vector.load %arg5[%c0_38, %c0_39] : memref<8x128xf32, #tpu.memory_space<vmem>>, vector<8x128xf32>
      %cst_40 = arith.constant 0xFF800000 : f32
      %123 = vector.broadcast %cst_40 : f32 to vector<8x128xf32>
      %124 = arith.cmpf oeq, %122, %123 : vector<8x128xf32>
      %cst_41 = arith.constant 0.000000e+00 : f32
      %125 = vector.broadcast %cst_41 : f32 to vector<8x128xf32>
      %126 = arith.select %124, %125, %122 : vector<8x128xi1>, vector<8x128xf32>
      %c0_42 = arith.constant 0 : index
      %c0_43 = arith.constant 0 : index
      %127 = vector.load %arg5[%c0_42, %c0_43] : memref<8x128xf32, #tpu.memory_space<vmem>>, vector<8x128xf32>
      tpu.vector_store %arg5[%c0_42, %c0_43], %126 {strides = array<i32>} : memref<8x128xf32, #tpu.memory_space<vmem>>, vector<8x128xf32>,
    } else {
    }
    return
  }
  func.func @transform_0(%arg0: i32, %arg1: i32) -> (i32, i32) {
    %c0_i32 = arith.constant 0 : i32
    %c0_i32_0 = arith.constant 0 : i32
    return %c0_i32, %arg1 : i32, i32
  }
  func.func @transform_1(%arg0: i32, %arg1: i32) -> (i32, i32) {
    %c0_i32 = arith.constant 0 : i32
    %c0_i32_0 = arith.constant 0 : i32
    return %arg1, %c0_i32 : i32, i32
  }
  func.func @transform_2(%arg0: i32, %arg1: i32) -> (i32, i32) {
    %c0_i32 = arith.constant 0 : i32
    return %arg1, %arg0 : i32, i32
  }
  func.func @transform_3(%arg0: i32, %arg1: i32) -> (i32, i32) {
    %c0_i32 = arith.constant 0 : i32
    %c0_i32_0 = arith.constant 0 : i32
    return %c0_i32, %arg0 : i32, i32
  }
  func.func @transform_4(%arg0: i32, %arg1: i32) -> (i32, i32) {
    %c0_i32 = arith.constant 0 : i32
    %c0_i32_0 = arith.constant 0 : i32
    return %c0_i32, %arg0 : i32, i32
  }
}

</mosaic_0001>

<bundles_post_ra>
// kernel: tpu_custom_call.1
= control target key start
LH: loop header
LB: loop body
LE: loop exit
PB: predicated region body
PF: predicated region fallthrough
CT: control target
= control target key end

     0   :  { %10 = vsyncpa [#allocation3], 0  ;;  %v6617_v3 = vmov 0   ;;  %s6611_s0 = inlined_call_operand.vmem [shape: s32[1,256], index: 0, kind: input, shape index: {}]   ;;  %s6612_s1 = inlined_call_operand.vmem [shape: s32[256,1], index: 1, kind: input, shape index: {}]   ;;  %s6613_s2 = inlined_call_operand.vmem [shape: f32[256,128], index: 2, kind: input, shape index: {}]   ;;  %s6614_s3 = inlined_call_operand.hbm [shape: f32[8,128], index: 3, kind: output, shape index: {0}]   ;;  %s6615_s4 = inlined_call_operand.hbm [shape: f32[8,128], index: 4, kind: output, shape index: {1}]  }
   0x1   :  { %v3209_v0 = vld [vmem:[%s6612_s1 + $0x20] sm:$0xff]  ;;  %v3214_v1 = vld [vmem:[%s6612_s1 + $0x10] sm:$0xff]  ;;  %2951 = vset.pattern.permute.xlu2 %v6617_v3  ;;  %2950 = vset.pattern.permute.xlu1 %v6617_v3  ;;  %v3233_v7 = vld [vmem:[%s6612_s1 + $0x28] sm:$0xff] }
   0x2   :  { %v3219_v2 = vld [vmem:[%s6612_s1] sm:$0xff]  ;;  %vm788_vm0 = vcmp.eq.s32.totalorder %v3209_v0, 0  ;;  %vm786_vm1 = vcmp.eq.s32.totalorder %v3214_v1, 0  ;;  %2949 = vset.pattern.permute.xlu0 %v6617_v3  ;;  %v3238_v8 = vld [vmem:[%s6612_s1 + $0x18] sm:$0xff]  ;;  %v3243_v9 = vld [vmem:[%s6612_s1 + $0x8] sm:$0xff]  ;;  %vm789_vm3 = vcmp.eq.s32.totalorder %v3233_v7, 0 }
   0x3   :  { %vm784_vm2 = vcmp.eq.s32.totalorder %v3219_v2, 0  ;;  %v820_v4 = vsel %vm788_vm0, 1, %v6617_v3  ;;  %v818_v5 = vsel %vm786_vm1, 1, %v6617_v3  ;;  %6762 = vst [vmem:[#allocation8_spill] sm:$0xff] %v3243_v9  ;;  %vm787_vm4 = vcmp.eq.s32.totalorder %v3238_v8, 0 }
   0x4   :  { %v816_v6 = vsel %vm784_vm2, 1, %v6617_v3  ;;  %861 = vperm.xlu2 %2951, %v820_v4   ;;  %855 = vperm.xlu1 %2950, %v818_v5   ;;  %vm785_vm5 = vcmp.eq.s32.totalorder %v3243_v9, 0 }
   0x5   :  { %849 = vperm.xlu0 %2949, %v816_v6  }
   0x6   :  { %11 = vsyncpa [#allocation5], 0  ;;  %v821_v10 = vsel %vm789_vm3, 1, %v6617_v3  ;;  %v819_v11 = vsel %vm787_vm4, 1, %v6617_v3  ;;  %v817_v12 = vsel %vm785_vm5, 1, %v6617_v3  ;;  %v3254_v13 = vld [vmem:[%s6612_s1 + $0x40] sm:$0xff] }
   0x7   :  { %v3259_v14 = vld [vmem:[%s6612_s1 + $0x38] sm:$0xff]  ;;  %v3264_v15 = vld [vmem:[%s6612_s1 + $0x30] sm:$0xff]  ;;  %vm792_vm6 = vcmp.eq.s32.totalorder %v3254_v13, 0  ;;  %v3285_v21 = vld [vmem:[%s6612_s1 + $0x48] sm:$0xff]  ;;  %s2921_s16 = sshll.u32 %s6615_s4, 4  ;;  %s3180_s17 = smov [#allocation2]   ;;  %s2922_s16 = int_to_ptr.hbm [resolvable:$true] %s2921_s16 }
   0x8   :  { %vm791_vm7 = vcmp.eq.s32.totalorder %v3259_v14, 0  ;;  %vm790_vm8 = vcmp.eq.s32.totalorder %v3264_v15, 0  ;;  %v824_v16 = vsel %vm792_vm6, 1, %v6617_v3  ;;  %v3275_v19 = vld [vmem:[%s6612_s1 + $0x58] sm:$0xff]  ;;  %v3280_v20 = vld [vmem:[%s6612_s1 + $0x50] sm:$0xff]  ;;  %vm793_vm11 = vcmp.eq.s32.totalorder %v3285_v21, 0 }
   0x9   :  { %v823_v17 = vsel %vm791_vm7, 1, %v6617_v3  ;;  %v822_v18 = vsel %vm790_vm8, 1, %v6617_v3  ;;  %vm795_vm9 = vcmp.eq.s32.totalorder %v3275_v19, 0  ;;  %vm794_vm10 = vcmp.eq.s32.totalorder %v3280_v20, 0  ;;  %v3296_v25 = vld [vmem:[%s6612_s1 + $0x70] sm:$0xff]  ;;  %v3301_v26 = vld [vmem:[%s6612_s1 + $0x68] sm:$0xff] }
   0xa   :  { %v827_v22 = vsel %vm795_vm9, 1, %v6617_v3  ;;  %v826_v23 = vsel %vm794_vm10, 1, %v6617_v3  ;;  %v825_v24 = vsel %vm793_vm11, 1, %v6617_v3  ;;  %v3306_v27 = vld [vmem:[%s6612_s1 + $0x60] sm:$0xff]  ;;  %vm798_vm12 = vcmp.eq.s32.totalorder %v3296_v25, 0  ;;  %v3317_v31 = vld [vmem:[%s6612_s1 + $0x88] sm:$0xff] }
   0xb   :  { %vm797_vm13 = vcmp.eq.s32.totalorder %v3301_v26, 0  ;;  %vm796_vm14 = vcmp.eq.s32.totalorder %v3306_v27, 0  ;;  %v830_v28 = vsel %vm798_vm12, 1, %v6617_v3  ;;  %v3322_v32 = vld [vmem:[%s6612_s1 + $0x80] sm:$0xff]  ;;  %v3327_v33 = vld [vmem:[%s6612_s1 + $0x78] sm:$0xff]  ;;  %vm801_vm15 = vcmp.eq.s32.totalorder %v3317_v31, 0 }
   0xc   :  { %864 = vperm.xlu2 %2951, %v821_v10   ;;  %858 = vperm.xlu1 %2950, %v819_v11   ;;  %v829_v29 = vsel %vm797_vm13, 1, %v6617_v3  ;;  %v828_v30 = vsel %vm796_vm14, 1, %v6617_v3  ;;  %vm800_vm0 = vcmp.eq.s32.totalorder %v3322_v32, 0  ;;  %vm799_vm1 = vcmp.eq.s32.totalorder %v3327_v33, 0  ;;  %v3338_v37 = vld [vmem:[%s6612_s1 + $0xa0] sm:$0xff]  ;;  %v3343_v38 = vld [vmem:[%s6612_s1 + $0x98] sm:$0xff] }
   0xd   :  { %852 = vperm.xlu0 %2949, %v817_v12   ;;  %v833_v34 = vsel %vm801_vm15, 1, %v6617_v3  ;;  %v832_v35 = vsel %vm800_vm0, 1, %v6617_v3  ;;  %v831_v36 = vsel %vm799_vm1, 1, %v6617_v3  ;;  %v3348_v39 = vld [vmem:[%s6612_s1 + $0x90] sm:$0xff]  ;;  %vm804_vm2 = vcmp.eq.s32.totalorder %v3338_v37, 0  ;;  %v3359_v43 = vld [vmem:[%s6612_s1 + $0xb8] sm:$0xff] }
   0xe   :  { %vm803_vm3 = vcmp.eq.s32.totalorder %v3343_v38, 0  ;;  %vm802_vm4 = vcmp.eq.s32.totalorder %v3348_v39, 0  ;;  %v836_v40 = vsel %vm804_vm2, 1, %v6617_v3  ;;  %v3364_v44 = vld [vmem:[%s6612_s1 + $0xb0] sm:$0xff]  ;;  %v3369_v45 = vld [vmem:[%s6612_s1 + $0xa8] sm:$0xff]  ;;  %vm807_vm5 = vcmp.eq.s32.totalorder %v3359_v43, 0 }
   0xf   :  { %v835_v41 = vsel %vm803_vm3, 1, %v6617_v3  ;;  %v834_v42 = vsel %vm802_vm4, 1, %v6617_v3  ;;  %vm806_vm6 = vcmp.eq.s32.totalorder %v3364_v44, 0  ;;  %vm805_vm7 = vcmp.eq.s32.totalorder %v3369_v45, 0  ;;  %v3380_v49 = vld [vmem:[%s6612_s1 + $0xd0] sm:$0xff]  ;;  %v3385_v50 = vld [vmem:[%s6612_s1 + $0xc8] sm:$0xff] }
  0x10   :  { %v839_v46 = vsel %vm807_vm5, 1, %v6617_v3  ;;  %v838_v47 = vsel %vm806_vm6, 1, %v6617_v3  ;;  %v837_v48 = vsel %vm805_vm7, 1, %v6617_v3  ;;  %6763 = vst [vmem:[#allocation9_spill] sm:$0xff] %v3380_v49  ;;  %v3390_v51 = vld [vmem:[%s6612_s1 + $0xc0] sm:$0xff]  ;;  %vm810_vm8 = vcmp.eq.s32.totalorder %v3380_v49, 0 }
  0x11   :  { %vm809_vm9 = vcmp.eq.s32.totalorder %v3385_v50, 0  ;;  %vm808_vm10 = vcmp.eq.s32.totalorder %v3390_v51, 0  ;;  %v842_v52 = vsel %vm810_vm8, 1, %v6617_v3  ;;  %v3401_v55 = vld [vmem:[%s6612_s1 + $0xe8] sm:$0xff]  ;;  %v3406_v56 = vld [vmem:[%s6612_s1 + $0xe0] sm:$0xff]  ;;  %v3411_v57 = vld [vmem:[%s6612_s1 + $0xd8] sm:$0xff] }
  0x12   :  { %v841_v53 = vsel %vm809_vm9, 1, %v6617_v3  ;;  %v840_v54 = vsel %vm808_vm10, 1, %v6617_v3  ;;  %6764 = vst [vmem:[#allocation10_spill] sm:$0xff] %v3401_v55  ;;  %vm813_vm11 = vcmp.eq.s32.totalorder %v3401_v55, 0  ;;  %vm812_vm12 = vcmp.eq.s32.totalorder %v3406_v56, 0  ;;  %v3422_v61 = vld [vmem:[%s6612_s1 + $0xf8] sm:$0xff] }
  0x13   :  { %6765 = vst [vmem:[#allocation11_spill] sm:$0xff] %v3406_v56  ;;  %vm811_vm13 = vcmp.eq.s32.totalorder %v3411_v57, 0  ;;  %v845_v58 = vsel %vm813_vm11, 1, %v6617_v3  ;;  %v844_v59 = vsel %vm812_vm12, 1, %v6617_v3  ;;  %v3427_v62 = vld [vmem:[%s6612_s1 + $0xf0] sm:$0xff]  ;;  %vm815_vm14 = vcmp.eq.s32.totalorder %v3422_v61, 0 }
  0x14   :  { %873 = vperm.xlu2 %2951, %v824_v16   ;;  %870 = vperm.xlu1 %2950, %v823_v17   ;;  %6766 = vst [vmem:[#allocation12_spill] sm:$0xff] %v3411_v57  ;;  %v843_v60 = vsel %vm811_vm13, 1, %v6617_v3  ;;  %vm1048_vm15 = vcmp.eq.s32.totalorder %v3219_v2, 1  ;;  %vm814_vm0 = vcmp.eq.s32.totalorder %v3427_v62, 0  ;;  %v847_v63 = vsel %vm815_vm14, 1, %v6617_v3  ;;  %s2908_s18 = sshll.u32 %s3180_s17, 4  ;;  %s2909_s18 = int_to_ptr.vmem [resolvable:$true] %s2908_s18 }
  0x15   :  { %867 = vperm.xlu0 %2949, %v822_v18   ;;  %6767 = vst [vmem:[#allocation13_spill] sm:$0xff] %v3422_v61  ;;  %v1080_v4 = vsel %vm1048_vm15, 1, %v6617_v3  ;;  %v846_v5 = vsel %vm814_vm0, 1, %v6617_v3  ;;  %vm1050_vm1 = vcmp.eq.s32.totalorder %v3214_v1, 1  ;;  %vm1051_vm2 = vcmp.eq.s32.totalorder %v3238_v8, 1  ;;  %s2910_s21 = sshll.u32 %s6614_s3, 4  ;;  %s2911_s21 = int_to_ptr.hbm [resolvable:$true] %s2910_s21 }
  0x16   :  { %6768 = vst [vmem:[#allocation14_spill] sm:$0xff] %v3427_v62  ;;  %vm1049_vm3 = vcmp.eq.s32.totalorder %v3243_v9, 1  ;;  %v1082_v6 = vsel %vm1050_vm1, 1, %v6617_v3  ;;  %v1083_v10 = vsel %vm1051_vm2, 1, %v6617_v3  ;;  %vm1053_vm4 = vcmp.eq.s32.totalorder %v3233_v7, 1 }
  0x17   :  { %v1081_v11 = vsel %vm1049_vm3, 1, %v6617_v3  ;;  %vm1054_vm5 = vcmp.eq.s32.totalorder %v3264_v15, 1  ;;  %vm1052_vm6 = vcmp.eq.s32.totalorder %v3209_v0, 1  ;;  %v1085_v16 = vsel %vm1053_vm4, 1, %v6617_v3 }
  0x18   :  { %v1086_v17 = vsel %vm1054_vm5, 1, %v6617_v3  ;;  %v1084_v18 = vsel %vm1052_vm6, 1, %v6617_v3  ;;  %vm1056_vm7 = vcmp.eq.s32.totalorder %v3254_v13, 1  ;;  %vm1057_vm8 = vcmp.eq.s32.totalorder %v3285_v21, 1 }
  0x19   :  { %vm1055_vm9 = vcmp.eq.s32.totalorder %v3259_v14, 1  ;;  %vm1059_vm10 = vcmp.eq.s32.totalorder %v3275_v19, 1  ;;  %vm1060_vm11 = vcmp.eq.s32.totalorder %v3306_v27, 1  ;;  %vm1058_vm12 = vcmp.eq.s32.totalorder %v3280_v20, 1 }
  0x1a   :  { %vm1062_vm13 = vcmp.eq.s32.totalorder %v3296_v25, 1  ;;  %vm1063_vm14 = vcmp.eq.s32.totalorder %v3327_v33, 1  ;;  %vm1061_vm15 = vcmp.eq.s32.totalorder %v3301_v26, 1  ;;  %vm1065_vm0 = vcmp.eq.s32.totalorder %v3317_v31, 1 }
  0x1b   :  { %vm1066_vm1 = vcmp.eq.s32.totalorder %v3348_v39, 1  ;;  %vm1064_vm2 = vcmp.eq.s32.totalorder %v3322_v32, 1  ;;  %vm1068_vm3 = vcmp.eq.s32.totalorder %v3338_v37, 1  ;;  %vm1069_vm4 = vcmp.eq.s32.totalorder %v3369_v45, 1 }
  0x1c   :  { %882 = vperm.xlu2 %2951, %v827_v22   ;;  %879 = vperm.xlu1 %2950, %v826_v23   ;;  %v1088_v23 = vsel %vm1056_vm7, 1, %v6617_v3  ;;  %vm1067_vm5 = vcmp.eq.s32.totalorder %v3343_v38, 1  ;;  %vm1071_vm6 = vcmp.eq.s32.totalorder %v3359_v43, 1  ;;  %vm1072_vm7 = vcmp.eq.s32.totalorder %v3390_v51, 1 }
  0x1d   :  { %876 = vperm.xlu0 %2949, %v825_v24   ;;  %v1089_v24 = vsel %vm1057_vm8, 1, %v6617_v3  ;;  %vm1070_vm8 = vcmp.eq.s32.totalorder %v3364_v44, 1 }
  0x24   :  { %891 = vperm.xlu2 %2951, %v830_v28   ;;  %888 = vperm.xlu1 %2950, %v829_v29   ;;  %v1087_v28 = vsel %vm1055_vm9, 1, %v6617_v3  ;;  %vm1074_vm9 = vcmp.eq.s32.totalorder %v3380_v49, 1 }
  0x25   :  { %885 = vperm.xlu0 %2949, %v828_v30   ;;  %v1091_v30 = vsel %vm1059_vm10, 1, %v6617_v3  ;;  %vm1075_vm10 = vcmp.eq.s32.totalorder %v3411_v57, 1 }
  0x2c   :  { %900 = vperm.xlu2 %2951, %v833_v34   ;;  %897 = vperm.xlu1 %2950, %v832_v35   ;;  %v1092_v34 = vsel %vm1060_vm11, 1, %v6617_v3  ;;  %v1090_v35 = vsel %vm1058_vm12, 1, %v6617_v3  ;;  %vm1073_vm11 = vcmp.eq.s32.totalorder %v3385_v50, 1  ;;  %vm1077_vm12 = vcmp.eq.s32.totalorder %v3401_v55, 1 }
  0x2d   :  { %894 = vperm.xlu0 %2949, %v831_v36  }
  0x34   :  { %909 = vperm.xlu2 %2951, %v836_v40   ;;  %906 = vperm.xlu1 %2950, %v835_v41  }
  0x35   :  { %903 = vperm.xlu0 %2949, %v834_v42   ;;  %v1094_v42 = vsel %vm1062_vm13, 1, %v6617_v3  ;;  %vm1078_vm13 = vcmp.eq.s32.totalorder %v3427_v62, 1 }
  0x3c   :  { %918 = vperm.xlu2 %2951, %v839_v46   ;;  %915 = vperm.xlu1 %2950, %v838_v47   ;;  %v1095_v46 = vsel %vm1063_vm14, 1, %v6617_v3  ;;  %v1093_v47 = vsel %vm1061_vm15, 1, %v6617_v3  ;;  %vm1076_vm14 = vcmp.eq.s32.totalorder %v3406_v56, 1  ;;  %vm1312_vm15 = vcmp.eq.s32.totalorder %v3219_v2, 2  ;;  %v3557_v2 = vld [vmem:[%s6613_s2] sm:$0xff] }
  0x3d   :  { %912 = vperm.xlu0 %2949, %v837_v48   ;;  %6770 = vst [vmem:[#allocation16_spill] sm:$0xff] %v3557_v2 }
  0x44   :  { %927 = vperm.xlu2 %2951, %v842_v52   ;;  %924 = vperm.xlu1 %2950, %v841_v53  }
  0x45   :  { %921 = vperm.xlu0 %2949, %v840_v54   ;;  %v1097_v54 = vsel %vm1065_vm0, 1, %v6617_v3  ;;  %vm1313_vm0 = vcmp.eq.s32.totalorder %v3243_v9, 2 }
  0x4c   :  { %936 = vperm.xlu2 %2951, %v845_v58   ;;  %933 = vperm.xlu1 %2950, %v844_v59   ;;  %v1098_v58 = vsel %vm1066_vm1, 1, %v6617_v3  ;;  %v1096_v59 = vsel %vm1064_vm2, 1, %v6617_v3  ;;  %vm1079_vm1 = vcmp.eq.s32.totalorder %v3422_v61, 1  ;;  %v3630_v61 = vld [vmem:[%s6613_s2 + $0x50] sm:$0xff] }
  0x4d   :  { %930 = vperm.xlu0 %2949, %v843_v60  }
  0x54   :  { %942 = vperm.xlu1 %2950, %v847_v63   ;;  %1113 = vperm.xlu2 %2951, %v1080_v4  }
  0x55   :  { %939 = vperm.xlu0 %2949, %v846_v5   ;;  %v1100_v5 = vsel %vm1068_vm3, 1, %v6617_v3 }
  0x5c   :  { %1119 = vperm.xlu1 %2950, %v1082_v6   ;;  %1122 = vperm.xlu2 %2951, %v1083_v10   ;;  %v1101_v6 = vsel %vm1069_vm4, 1, %v6617_v3  ;;  %v1099_v10 = vsel %vm1067_vm5, 1, %v6617_v3  ;;  %vm1315_vm5 = vcmp.eq.s32.totalorder %v3238_v8, 2 }
  0x5d   :  { %1116 = vperm.xlu0 %2949, %v1081_v11  }
  0x5e   :  { %v3441_v12 = vpop.permute.xlu2 %861 }
  0x5f   :  { %vm948_vm2 = vcmp.eq.s32.totalorder %v3441_v12, 1 }
  0x64   :  { %1128 = vperm.xlu1 %2950, %v1085_v16   ;;  %1131 = vperm.xlu2 %2951, %v1086_v17  }
  0x65   :  { %1125 = vperm.xlu0 %2949, %v1084_v18   ;;  %v1103_v18 = vsel %vm1071_vm6, 1, %v6617_v3  ;;  %vm1316_vm6 = vcmp.eq.s32.totalorder %v3209_v0, 2 }
  0x66   :  { %v3449_v22 = vpop.permute.xlu2 %864 }
  0x6c   :  { %1137 = vperm.xlu1 %2950, %v1088_v23   ;;  %1140 = vperm.xlu2 %2951, %v1089_v24   ;;  %v1104_v23 = vsel %vm1072_vm7, 1, %v6617_v3  ;;  %v1102_v24 = vsel %vm1070_vm8, 1, %v6617_v3  ;;  %vm949_vm7 = vcmp.eq.s32.totalorder %v3449_v22, 1  ;;  %vm1314_vm8 = vcmp.eq.s32.totalorder %v3214_v1, 2  ;;  %v3661_v22 = vld [vmem:[%s6613_s2 + $0x68] sm:$0xff] }
  0x6d   :  { %1134 = vperm.xlu0 %2949, %v1087_v28  }
  0x6e   :  { %v3457_v29 = vpop.permute.xlu2 %873 }
  0x6f   :  { %vm952_vm4 = vcmp.eq.s32.totalorder %v3457_v29, 1 }
  0x74   :  { %1146 = vperm.xlu1 %2950, %v1091_v30   ;;  %1149 = vperm.xlu2 %2951, %v1092_v34  }
  0x75   :  { %1143 = vperm.xlu0 %2949, %v1090_v35   ;;  %v1106_v35 = vsel %vm1074_vm9, 1, %v6617_v3 }
  0x76   :  { %v3465_v36 = vpop.permute.xlu2 %882  ;;  %v3467_v40 = vpop.permute.xlu1 %855 }
  0x77   :  { %v3471_v41 = vpop.permute.xlu0 %849  ;;  %vm955_vm9 = vcmp.eq.s32.totalorder %v3465_v36, 1 }
  0x78   :  { %vm944_vm3 = vcmp.eq.s32.totalorder %v3471_v41, 1 }
  0x7c   :  { %1155 = vperm.xlu1 %2950, %v1094_v42   ;;  %1158 = vperm.xlu2 %2951, %v1095_v46   ;;  %v1107_v42 = vsel %vm1075_vm10, 1, %v6617_v3  ;;  %v1105_v46 = vsel %vm1073_vm11, 1, %v6617_v3 }
  0x7d   :  { %1152 = vperm.xlu0 %2949, %v1093_v47  }
  0x7e   :  { %v3477_v48 = vpop.permute.xlu2 %891  ;;  %v3479_v52 = vpop.permute.xlu1 %858 }
  0x7f   :  { %v3483_v53 = vpop.permute.xlu0 %852 }
  0x80   :  { %vm945_vm10 = vcmp.eq.s32.totalorder %v3483_v53, 1 }
  0x84   :  { %1164 = vperm.xlu1 %2950, %v1097_v54   ;;  %1167 = vperm.xlu2 %2951, %v1098_v58  }
  0x85   :  { %1161 = vperm.xlu0 %2949, %v1096_v59   ;;  %v1109_v59 = vsel %vm1077_vm12, 1, %v6617_v3  ;;  %vm946_vm12 = vcmp.eq.s32.totalorder %v3467_v40, 1 }
  0x86   :  { %v3489_v60 = vpop.permute.xlu2 %900  ;;  %v3491_v63 = vpop.permute.xlu1 %870 }
  0x87   :  { %v3495_v4 = vpop.permute.xlu0 %867 }
  0x88   :  { %vm950_vm11 = vcmp.eq.s32.totalorder %v3495_v4, 1 }
  0x8c   :  { %1173 = vperm.xlu1 %2950, %v1100_v5   ;;  %1176 = vperm.xlu2 %2951, %v1101_v6   ;;  %v1110_v5 = vsel %vm1078_vm13, 1, %v6617_v3  ;;  %v1108_v6 = vsel %vm1076_vm14, 1, %v6617_v3  ;;  %vm951_vm13 = vcmp.eq.s32.totalorder %v3491_v63, 1  ;;  %vm947_vm14 = vcmp.eq.s32.totalorder %v3479_v52, 1  ;;  %v3636_v63 = vld [vmem:[%s6613_s2 + $0x48] sm:$0xff]  ;;  %v3685_v52 = vld [vmem:[%s6613_s2 + $0x70] sm:$0xff] }
  0x8d   :  { %1170 = vperm.xlu0 %2949, %v1099_v10   ;;  %6778 = vst [vmem:[#allocation23_spill] sm:$0xff] %v3636_v63 }
  0x8e   :  { %v3501_v11 = vpop.permute.xlu2 %909  ;;  %v3503_v16 = vpop.permute.xlu1 %879 }
  0x8f   :  { %v3507_v17 = vpop.permute.xlu0 %876 }
  0x94   :  { %1182 = vperm.xlu1 %2950, %v1103_v18   ;;  %1185 = vperm.xlu2 %2951, %v1104_v23  }
  0x95   :  { %1179 = vperm.xlu0 %2949, %v1102_v24   ;;  %v1344_v24 = vsel %vm1312_vm15, 1, %v6617_v3  ;;  %vm954_vm15 = vcmp.eq.s32.totalorder %v3503_v16, 1 }
  0x96   :  { %v3513_v28 = vpop.permute.xlu2 %918  ;;  %v3515_v30 = vpop.permute.xlu1 %888  ;;  %v986_v53 = vsel %vm954_vm15, %v3630_v61, -inf  ;;  %vm1322_vm15 = vcmp.eq.s32.totalorder %v3280_v20, 2  ;;  %v3816_v20 = vld [vmem:[%s6613_s2 + $0xd0] sm:$0xff] }
  0x97   :  { %v3519_v34 = vpop.permute.xlu0 %885 }
  0x9c   :  { %1191 = vperm.xlu1 %2950, %v1106_v35   ;;  %1194 = vperm.xlu2 %2951, %v1107_v42   ;;  %v1345_v35 = vsel %vm1313_vm0, 1, %v6617_v3  ;;  %v3551_v42 = vld [vmem:[%s6613_s2 + $0x20] sm:$0xff]  ;;  %vm953_vm0 = vcmp.eq.s32.totalorder %v3507_v17, 1 }
  0x9d   :  { %1188 = vperm.xlu0 %2949, %v1105_v46   ;;  %6769 = vst [vmem:[#allocation15_spill] sm:$0xff] %v3551_v42  ;;  %v1111_v46 = vsel %vm1079_vm1, 1, %v6617_v3  ;;  %v980_v12 = vsel %vm948_vm2, %v3551_v42, -inf  ;;  %v3605_v42 = vld [vmem:[%s6613_s2 + $0x30] sm:$0xff]  ;;  %vm957_vm1 = vcmp.eq.s32.totalorder %v3515_v30, 1  ;;  %vm958_vm2 = vcmp.eq.s32.totalorder %v3477_v48, 1 }
  0x9e   :  { %v3525_v47 = vpop.permute.xlu2 %927  ;;  %v3527_v54 = vpop.permute.xlu1 %897  ;;  %v982_v56 = vsel %vm950_vm11, %v3605_v42, -inf  ;;  %v985_v4 = vsel %vm953_vm0, %v3636_v63, -inf  ;;  %v989_v17 = vsel %vm957_vm1, %v3661_v22, -inf  ;;  %v3745_v48 = vld [vmem:[%s6613_s2 + $0x98] sm:$0xff] }
  0x9f   :  { %v3531_v58 = vpop.permute.xlu0 %894  ;;  %6780 = vst [vmem:[#allocation25_spill] sm:$0xff] %v3745_v48 }
  0xa4   :  { %1200 = vperm.xlu1 %2950, %v1109_v59   ;;  %1203 = vperm.xlu2 %2951, %v1110_v5   ;;  %v3176_v59 = vmov -inf   ;;  %v3564_v5 = vld [vmem:[%s6613_s2 + $0x40] sm:$0xff] }
  0xa5   :  { %1197 = vperm.xlu0 %2949, %v1108_v6   ;;  %22 = vst [vmem:[#allocation2] sm:$0xff] %v3176_v59  ;;  %v976_v6 = vsel %vm944_vm3, %v3557_v2, -inf  ;;  %v3578_v59 = vld [vmem:[%s6613_s2 + $0x28] sm:$0xff]  ;;  %v984_v29 = vsel %vm952_vm4, %v3564_v5, -inf  ;;  %v6777_v2 = vmov 0   ;;  %vm1318_vm3 = vcmp.eq.s32.totalorder %v3264_v15, 2 }
  0xa6   :  { %v3537_v10 = vpop.permute.xlu2 %936  ;;  %v3539_v18 = vpop.permute.xlu1 %906  ;;  %6771 = vst [vmem:[#allocation17_spill] sm:$0xff] %v3564_v5  ;;  %v1008_v3 = vmax.f32 %v976_v6, %v980_v12  ;;  %v3599_v5 = vld [vmem:[%s6613_s2 + $0x8] sm:$0xff]  ;;  %v3612_v12 = vld [vmem:[%s6613_s2 + $0x18] sm:$0xff]  ;;  %v1348_v55 = vsel %vm1316_vm6, 1, %v6777_v2  ;;  %v1346_v0 = vsel %vm1314_vm8, 1, %v6777_v2  ;;  %v981_v8 = vsel %vm949_vm7, %v3578_v59, -inf }
  0xa7   :  { %v3543_v23 = vpop.permute.xlu0 %903  ;;  %6773 = vst [vmem:[#allocation19_spill] sm:$0xff] %v3578_v59  ;;  %v3617_v6 = vld [vmem:[%s6613_s2 + $0x38] sm:$0xff]  ;;  %v977_v49 = vsel %vm945_vm10, %v3599_v5, -inf  ;;  %v979_v40 = vsel %vm947_vm14, %v3612_v12, -inf  ;;  %vm1319_vm4 = vcmp.eq.s32.totalorder %v3259_v14, 2  ;;  %vm1317_vm6 = vcmp.eq.s32.totalorder %v3233_v7, 2 }
  0xa8   :  { %6776 = vst [vmem:[#allocation22_spill] sm:$0xff] %v3617_v6  ;;  %v983_v57 = vsel %vm951_vm13, %v3617_v6, -inf  ;;  %v3664_v36 = vmax.f32 %v1008_v3, %v984_v29  ;;  %vm961_vm7 = vcmp.eq.s32.totalorder %v3489_v60, 1  ;;  %vm964_vm8 = vcmp.eq.s32.totalorder %v3501_v11, 1  ;;  %v3720_v60 = vld [vmem:[%s6613_s2 + $0x78] sm:$0xff]  ;;  %v3753_v7 = vld [vmem:[%s6613_s2 + $0x90] sm:$0xff] }
  0xa9   :  { %v1011_v16 = vmax.f32 %v979_v40, %v983_v57  ;;  %v3708_v57 = vld [vmem:[%s6613_s2 + $0xa0] sm:$0xff]  ;;  %vm959_vm10 = vcmp.eq.s32.totalorder %v3531_v58, 1  ;;  %v1350_v11 = vsel %vm1318_vm3, 1, %v6777_v2  ;;  %v1349_v58 = vsel %vm1317_vm6, 1, %v6777_v2 }
  0xaa   :  { %vm963_vm11 = vcmp.eq.s32.totalorder %v3539_v18, 1  ;;  %vm967_vm13 = vcmp.eq.s32.totalorder %v3513_v28, 1  ;;  %vm1321_vm14 = vcmp.eq.s32.totalorder %v3285_v21, 2  ;;  %vm970_vm6 = vcmp.eq.s32.totalorder %v3525_v47, 1 }
  0xab   :  { %v995_v18 = vsel %vm963_vm11, %v3745_v48, -inf  ;;  %v3811_v48 = vld [vmem:[%s6613_s2 + $0xd8] sm:$0xff] }
  0xac   :  { %1377 = vperm.xlu1 %2950, %v1344_v24   ;;  %1380 = vperm.xlu2 %2951, %v1345_v35   ;;  %v3585_v24 = vld [vmem:[%s6613_s2 + $0x58] sm:$0xff] }
  0xad   :  { %1206 = vperm.xlu0 %2949, %v1111_v46   ;;  %6774 = vst [vmem:[#allocation20_spill] sm:$0xff] %v3585_v24  ;;  %v3594_v46 = vld [vmem:[%s6613_s2 + $0x10] sm:$0xff]  ;;  %v987_v62 = vsel %vm955_vm9, %v3585_v24, -inf  ;;  %v1009_v24 = vmax.f32 %v977_v49, %v981_v8  ;;  %v3693_v49 = vld [vmem:[%s6613_s2 + $0x60] sm:$0xff]  ;;  %vm960_vm9 = vcmp.eq.s32.totalorder %v3527_v54, 1 }
  0xae   :  { %v3569_v9 = vpop.permute.xlu1 %915  ;;  %v3571_v41 = vpop.permute.xlu2 %1113  ;;  %6775 = vst [vmem:[#allocation21_spill] sm:$0xff] %v3594_v46  ;;  %v978_v1 = vsel %vm946_vm12, %v3594_v46, -inf  ;;  %v3714_v8 = vld [vmem:[%s6613_s2 + $0x80] sm:$0xff]  ;;  %v1015_v14 = vmax.f32 %v1011_v16, %v987_v62  ;;  %vm962_vm12 = vcmp.eq.s32.totalorder %v3543_v23, 1  ;;  %v3764_v16 = vld [vmem:[%s6613_s2 + $0xb0] sm:$0xff]  ;;  %v1353_v23 = vsel %vm1321_vm14, 1, %v6777_v2 }
  0xaf   :  { %6772 = vst [vmem:[#allocation18_spill] sm:$0xff] %v3571_v41  ;;  %v3587_v35 = vpop.permute.xlu0 %912  ;;  %v1347_v41 = vsel %vm1315_vm5, 1, %v6777_v2  ;;  %v1010_v3 = vmax.f32 %v978_v1, %v982_v56  ;;  %vm956_vm5 = vcmp.eq.s32.totalorder %v3519_v34, 1  ;;  %v990_v1 = vsel %vm958_vm2, %v3685_v52, -inf }
  0xb0   :  { %6779 = vst [vmem:[#allocation24_spill] sm:$0xff] %v3693_v49  ;;  %v988_v40 = vsel %vm956_vm5, %v3693_v49, -inf  ;;  %v992_v34 = vsel %vm960_vm9, %v3714_v8, -inf  ;;  %vm966_vm0 = vcmp.eq.s32.totalorder %v3569_v9, 1  ;;  %vm965_vm1 = vcmp.eq.s32.totalorder %v3587_v35, 1  ;;  %v3822_v9 = vld [vmem:[%s6613_s2 + $0xe0] sm:$0xff] }
  0xb1   :  { %v1014_v30 = vmax.f32 %v1010_v3, %v986_v53  ;;  %v3740_v53 = vsel %vm964_vm8, %v3708_v57, -inf  ;;  %v1016_v62 = vmax.f32 %v3664_v36, %v988_v40  ;;  %v994_v40 = vsel %vm962_vm12, %v3753_v7, -inf }
  0xb2   :  { %vm1320_vm2 = vcmp.eq.s32.totalorder %v3254_v13, 2  ;;  %vm973_vm8 = vcmp.eq.s32.totalorder %v3537_v10, 1  ;;  %vm1324_vm9 = vcmp.eq.s32.totalorder %v3306_v27, 2  ;;  %vm1323_vm12 = vcmp.eq.s32.totalorder %v3275_v19, 2 }
  0xb3   :  { %v1018_v3 = vmax.f32 %v1014_v30, %v990_v1  ;;  %v1352_v35 = vsel %vm1320_vm2, 1, %v6777_v2  ;;  %v1356_v27 = vsel %vm1324_vm9, 1, %v6777_v2  ;;  %vm1327_vm14 = vcmp.eq.s32.totalorder %v3327_v33, 2 }
  0xb4   :  { %1386 = vperm.xlu1 %2950, %v1347_v41   ;;  %1389 = vperm.xlu2 %2951, %v1348_v55   ;;  %v3702_v41 = vld [vmem:[%s6613_s2 + $0x88] sm:$0xff]  ;;  %vm1331_vm2 = vcmp.eq.s32.totalorder %v3343_v38, 2  ;;  %vm1335_vm9 = vcmp.eq.s32.totalorder %v3359_v43, 2  ;;  %v6784_v43 = vld [vmem:[#allocation9_spill] sm:$0xff] }
  0xb5   :  { %1383 = vperm.xlu0 %2949, %v1346_v0   ;;  %v1013_v0 = vmax.f32 %v1009_v24, %v985_v4  ;;  %v1351_v24 = vsel %vm1319_vm4, 1, %v6777_v2  ;;  %v993_v15 = vsel %vm961_vm7, %v3702_v41, -inf  ;;  %v991_v4 = vsel %vm959_vm10, %v3720_v60, -inf }
  0xb6   :  { %v3676_v29 = vpop.permute.xlu1 %924  ;;  %v3678_v55 = vpop.permute.xlu2 %1122  ;;  %v1019_v1 = vmax.f32 %v1015_v14, %v991_v4  ;;  %v1354_v14 = vsel %vm1322_vm15, 1, %v6777_v2  ;;  %v998_v4 = vsel %vm966_vm0, %v3764_v16, -inf  ;;  %v1022_v21 = vmax.f32 %v1018_v3, %v994_v40 }
  0xb7   :  { %v3696_v56 = vpop.permute.xlu0 %921  ;;  %v1017_v54 = vmax.f32 %v1013_v0, %v989_v17  ;;  %v3770_v17 = vld [vmem:[%s6613_s2 + $0xa8] sm:$0xff]  ;;  %vm969_vm3 = vcmp.eq.s32.totalorder %v3676_v29, 1  ;;  %v1002_v29 = vsel %vm970_vm6, %v3816_v20, -inf  ;;  %vm1325_vm10 = vcmp.eq.s32.totalorder %v3301_v26, 2 }
  0xb8   :  { %vm968_vm4 = vcmp.eq.s32.totalorder %v3696_v56, 1  ;;  %v1026_v13 = vmax.f32 %v1022_v21, %v998_v4  ;;  %v1357_v26 = vsel %vm1325_vm10, 1, %v6777_v2  ;;  %vm1328_vm15 = vcmp.eq.s32.totalorder %v3322_v32, 2 }
  0xb9   :  { %v1021_v36 = vmax.f32 %v1017_v54, %v993_v15  ;;  %v3787_v54 = vld [vmem:[%s6613_s2 + $0xc8] sm:$0xff]  ;;  %v3793_v15 = vld [vmem:[%s6613_s2 + $0xc0] sm:$0xff]  ;;  %vm1326_vm0 = vcmp.eq.s32.totalorder %v3296_v25, 2  ;;  %vm1332_vm6 = vcmp.eq.s32.totalorder %v3338_v37, 2 }
  0xba   :  { %6781 = vst [vmem:[#allocation26_spill] sm:$0xff] %v3787_v54  ;;  %v1000_v3 = vsel %vm968_vm4, %v3793_v15, -inf  ;;  %vm1333_vm4 = vcmp.eq.s32.totalorder %v3369_v45, 2 }
  0xbc   :  { %1395 = vperm.xlu1 %2950, %v1350_v11   ;;  %1398 = vperm.xlu2 %2951, %v1351_v24   ;;  %v3778_v11 = vld [vmem:[%s6613_s2 + $0xb8] sm:$0xff]  ;;  %v1020_v24 = vmax.f32 %v1016_v62, %v992_v34  ;;  %v1023_v34 = vmax.f32 %v1019_v1, %v995_v18  ;;  %v997_v62 = vsel %vm965_vm1, %v3770_v17, -inf  ;;  %v1001_v1 = vsel %vm969_vm3, %v3787_v54, -inf }
  0xbd   :  { %1392 = vperm.xlu0 %2949, %v1349_v58   ;;  %v999_v18 = vsel %vm967_vm13, %v3778_v11, -inf  ;;  %v1025_v28 = vmax.f32 %v1021_v36, %v997_v62  ;;  %vm1330_vm1 = vcmp.eq.s32.totalorder %v3348_v39, 2  ;;  %vm1329_vm3 = vcmp.eq.s32.totalorder %v3317_v31, 2 }
  0xbe   :  { %v934_v30 = vpop.permute.xlu1 %933  ;;  %v3773_v0 = vpop.permute.xlu2 %1131  ;;  %v1024_v40 = vmax.f32 %v1020_v24, %v3740_v53  ;;  %v1027_v53 = vmax.f32 %v1023_v34, %v999_v18  ;;  %v3851_v24 = vld [vmem:[%s6613_s2 + $0xf8] sm:$0xff]  ;;  %v1030_v18 = vmax.f32 %v1026_v13, %v1002_v29 }
  0xbf   :  { %v931_v58 = vpop.permute.xlu0 %930  ;;  %vm972_vm7 = vcmp.eq.s32.totalorder %v934_v30, 1  ;;  %v3840_v30 = vld [vmem:[%s6613_s2 + $0xe8] sm:$0xff]  ;;  %v1029_v54 = vmax.f32 %v1025_v28, %v1001_v1  ;;  %v1355_v28 = vsel %vm1323_vm12, 1, %v6777_v2  ;;  %vm1338_vm12 = vcmp.eq.s32.totalorder %v6784_v43, 2 }
  0xc0   :  { %vm971_vm5 = vcmp.eq.s32.totalorder %v931_v58, 1  ;;  %v1004_v56 = vsel %vm972_vm7, %v3822_v9, -inf  ;;  %v1028_v4 = vmax.f32 %v1024_v40, %v1000_v3  ;;  %v1005_v47 = vsel %vm973_vm8, %v3840_v30, -inf }
  0xc1   :  { %v1003_v58 = vsel %vm971_vm5, %v3811_v48, -inf  ;;  %v1033_v40 = vmax.f32 %v1029_v54, %v1005_v47  ;;  %vm1334_vm5 = vcmp.eq.s32.totalorder %v3364_v44, 2  ;;  %vm1336_vm7 = vcmp.eq.s32.totalorder %v3390_v51, 2  ;;  %v6782_v51 = vld [vmem:[#allocation12_spill] sm:$0xff] }
  0xc2   :  { %v1032_v21 = vmax.f32 %v1028_v4, %v1004_v56  ;;  %v1359_v4 = vsel %vm1327_vm14, 1, %v6777_v2  ;;  %vm1337_vm8 = vcmp.eq.s32.totalorder %v3385_v50, 2  ;;  %v1368_v37 = vsel %vm1336_vm7, 1, %v6777_v2  ;;  %v6783_v50 = vld [vmem:[#allocation11_spill] sm:$0xff] }
  0xc3   :  { %v1369_v45 = vsel %vm1337_vm8, 1, %v6777_v2  ;;  %vm1339_vm10 = vcmp.eq.s32.totalorder %v6782_v51, 2 }
  0xc4   :  { %1404 = vperm.xlu1 %2950, %v1353_v23   ;;  %1407 = vperm.xlu2 %2951, %v1354_v14   ;;  %v3858_v23 = vld [vmem:[%s6613_s2 + $0xf0] sm:$0xff]  ;;  %v1031_v14 = vmax.f32 %v1027_v53, %v1003_v58  ;;  %v1036_v58 = vmax.f32 %v1032_v21, %v1033_v40 }
  0xc5   :  { %1401 = vperm.xlu0 %2949, %v1352_v35  }
  0xc6   :  { %v943_v36 = vpop.permute.xlu1 %942  ;;  %v3853_v62 = vpop.permute.xlu2 %1140 }
  0xc7   :  { %vm975_vm11 = vcmp.eq.s32.totalorder %v943_v36, 1  ;;  %v940_v34 = vpop.permute.xlu0 %939  ;;  %v1360_v36 = vsel %vm1328_vm15, 1, %v6777_v2 }
  0xc8   :  { %v1007_v35 = vsel %vm975_vm11, %v3851_v24, -inf  ;;  %vm974_vm13 = vcmp.eq.s32.totalorder %v940_v34, 1  ;;  %vm1340_vm11 = vcmp.eq.s32.totalorder %v6783_v50, 2  ;;  %v3959_v50 = vld [vmem:[%s6612_s1] sm:$0xff] }
  0xc9   :  { %v1035_v1 = vmax.f32 %v1031_v14, %v1007_v35  ;;  %v1006_v3 = vsel %vm974_vm13, %v3858_v23, -inf  ;;  %v1358_v14 = vsel %vm1326_vm0, 1, %v6777_v2  ;;  %6790 = vst [vmem:[#allocation11_spill] sm:$0xff] %v3959_v50 }
  0xca   :  { %v1034_v10 = vmax.f32 %v1030_v18, %v1006_v3  ;;  %v1045_v18 = vld [vmem:[#allocation2] sm:$0x1]  ;;  %v1363_v3 = vsel %vm1331_vm2, 1, %v6777_v2  ;;  %vm1576_vm2 = vcmp.eq.s32.totalorder %v3959_v50, 3 }
  0xcc   :  { %v1037_v53 = vmax.f32 %v1034_v10, %v1035_v1  ;;  %1413 = vperm.xlu1 %2950, %v1356_v27   ;;  %1416 = vperm.xlu2 %2951, %v1357_v26   ;;  %v1362_v1 = vsel %vm1330_vm1, 1, %v6777_v2  ;;  %v1361_v26 = vsel %vm1329_vm3, 1, %v6777_v2  ;;  %v1365_v10 = vsel %vm1333_vm4, 1, %v6777_v2 }
  0xcd   :  { %1410 = vperm.xlu0 %2949, %v1355_v28   ;;  %v1366_v28 = vsel %vm1334_vm5, 1, %v6777_v2  ;;  %vm1211_vm4 = vcmp.eq.s32.totalorder %v3678_v55, 1  ;;  %vm1214_vm5 = vcmp.eq.s32.totalorder %v3773_v0, 1  ;;  %v3983_v55 = vld [vmem:[%s6612_s1 + $0x28] sm:$0xff] }
  0xce   :  { %v1038_v19 = vmax.f32 %v1036_v58, %v1037_v53  ;;  %v3871_v56 = vpop.permute.xlu1 %1119  ;;  %v3873_v13 = vpop.permute.xlu2 %1149  ;;  %v1364_v58 = vsel %vm1332_vm6, 1, %v6777_v2  ;;  %vm1581_vm7 = vcmp.eq.s32.totalorder %v3983_v55, 3  ;;  %v1246_v0 = vsel %vm1214_vm5, %v3605_v42, -inf }
  0xcf   :  { %v3877_v29 = vpop.permute.xlu0 %1116 }
  0xd0   :  { %v1039_v54 = vrot.slane %v1038_v19, 4 }
  0xd2   :  { %v1040_v47 = vmax.f32 %v1038_v19, %v1039_v54  ;;  %v1367_v54 = vsel %vm1335_vm9, 1, %v6777_v2 }
  0xd4   :  { %v1041_v34 = vrot.slane %v1040_v47, 2  ;;  %1422 = vperm.xlu1 %2950, %v1359_v4   ;;  %1425 = vperm.xlu2 %2951, %v1360_v36  }
  0xd5   :  { %1419 = vperm.xlu0 %2949, %v1358_v14   ;;  %v1371_v14 = vsel %vm1339_vm10, 1, %v6777_v2 }
  0xd6   :  { %v1042_v21 = vmax.f32 %v1040_v47, %v1041_v34  ;;  %v3883_v33 = vpop.permute.xlu1 %1128  ;;  %v3885_v32 = vpop.permute.xlu2 %1158  ;;  %v1372_v34 = vsel %vm1340_vm11, 1, %v6777_v2  ;;  %vm1217_vm11 = vcmp.eq.s32.totalorder %v3853_v62, 1 }
  0xd7   :  { %v3889_v25 = vpop.permute.xlu0 %1125  ;;  %vm1213_vm8 = vcmp.eq.s32.totalorder %v3883_v33, 1 }
  0xd8   :  { %v1043_v35 = vrot.slane %v1042_v21, 1  ;;  %vm1212_vm9 = vcmp.eq.s32.totalorder %v3889_v25, 1  ;;  %v1613_v25 = vsel %vm1581_vm7, 1, %v6777_v2 }
  0xda   :  { %v1044_v27 = vmax.f32 %v1042_v21, %v1043_v35  ;;  %v1370_v21 = vsel %vm1338_vm12, 1, %v6777_v2  ;;  %vm1210_vm12 = vcmp.eq.s32.totalorder %v3871_v56, 1  ;;  %v1249_v56 = vsel %vm1217_vm11, %v3636_v63, -inf }
  0xdc   :  { %v1046_v40 = vmax.f32 %v1045_v18, %v1044_v27  ;;  %1431 = vperm.xlu1 %2950, %v1362_v1   ;;  %1434 = vperm.xlu2 %2951, %v1363_v3   ;;  %v6785_v1 = vld [vmem:[#allocation14_spill] sm:$0xff]  ;;  %v6786_v3 = vld [vmem:[#allocation13_spill] sm:$0xff] }
  0xdd   :  { %1428 = vperm.xlu0 %2949, %v1361_v26   ;;  %vm1342_vm13 = vcmp.eq.s32.totalorder %v6785_v1, 2  ;;  %vm1343_vm14 = vcmp.eq.s32.totalorder %v6786_v3, 2  ;;  %v6787_v26 = vld [vmem:[#allocation10_spill] sm:$0xff]  ;;  %v6792_v1 = vld [vmem:[#allocation16_spill] sm:$0xff]  ;;  %6794 = vst [vmem:[#allocation14_spill] sm:$0xff] %v3983_v55 }
  0xde   :  { %1047 = vst [vmem:[#allocation2] sm:$0x1] %v1046_v40  ;;  %v3895_v39 = vpop.permute.xlu1 %1137  ;;  %v3897_v38 = vpop.permute.xlu2 %1167  ;;  %vm1341_vm15 = vcmp.eq.s32.totalorder %v6787_v26, 2  ;;  %v1374_v40 = vsel %vm1342_vm13, 1, %v6777_v2  ;;  %v1243_v26 = vsel %vm1211_vm4, %v3612_v12, -inf  ;;  %vm1220_vm13 = vcmp.eq.s32.totalorder %v3873_v13, 1 }
  0xdf   :  { %v3901_v31 = vpop.permute.xlu0 %1134  ;;  %v1242_v13 = vsel %vm1210_vm12, %v3594_v46, -inf }
  0xe4   :  { %1440 = vperm.xlu1 %2950, %v1365_v10   ;;  %1443 = vperm.xlu2 %2951, %v1366_v28   ;;  %v1375_v10 = vsel %vm1343_vm14, 1, %v6777_v2  ;;  %v1373_v28 = vsel %vm1341_vm15, 1, %v6777_v2  ;;  %vm1215_vm14 = vcmp.eq.s32.totalorder %v3901_v31, 1  ;;  %vm1209_vm15 = vcmp.eq.s32.totalorder %v3877_v29, 1 }
  0xe5   :  { %1437 = vperm.xlu0 %2949, %v1364_v58   ;;  %v1247_v29 = vsel %vm1215_vm14, %v3617_v6, -inf  ;;  %v1241_v31 = vsel %vm1209_vm15, %v3599_v5, -inf }
  0xe6   :  { %v3907_v53 = vpop.permute.xlu1 %1146  ;;  %v3909_v19 = vpop.permute.xlu2 %1176  ;;  %v1275_v46 = vmax.f32 %v1243_v26, %v1247_v29 }
  0xe7   :  { %v3913_v44 = vpop.permute.xlu0 %1143 }
  0xec   :  { %1449 = vperm.xlu1 %2950, %v1368_v37   ;;  %1452 = vperm.xlu2 %2951, %v1369_v45   ;;  %v6788_v45 = vld [vmem:[#allocation8_spill] sm:$0xff] }
  0xed   :  { %1446 = vperm.xlu0 %2949, %v1367_v54   ;;  %vm1577_vm0 = vcmp.eq.s32.totalorder %v6788_v45, 3  ;;  %v3951_v54 = vld [vmem:[%s6612_s1 + $0x10] sm:$0xff] }
  0xee   :  { %v3919_v4 = vpop.permute.xlu1 %1155  ;;  %v3921_v36 = vpop.permute.xlu2 %1185  ;;  %6789 = vst [vmem:[#allocation12_spill] sm:$0xff] %v3951_v54  ;;  %vm1578_vm1 = vcmp.eq.s32.totalorder %v3951_v54, 3  ;;  %v1609_v43 = vsel %vm1577_vm0, 1, %v6777_v2  ;;  %vm1216_vm0 = vcmp.eq.s32.totalorder %v3895_v39, 1  ;;  %v1252_v39 = vsel %vm1220_vm13, %v3693_v49, -inf }
  0xef   :  { %v3925_v47 = vpop.permute.xlu0 %1152  ;;  %vm1222_vm4 = vcmp.eq.s32.totalorder %v3919_v4, 1  ;;  %vm1229_vm13 = vcmp.eq.s32.totalorder %v3909_v19, 1  ;;  %vm1232_vm15 = vcmp.eq.s32.totalorder %v3921_v36, 1 }
  0xf0   :  { %vm1221_vm7 = vcmp.eq.s32.totalorder %v3925_v47, 1 }
  0xf4   :  { %1458 = vperm.xlu1 %2950, %v1371_v14   ;;  %1461 = vperm.xlu2 %2951, %v1372_v34   ;;  %v1610_v14 = vsel %vm1578_vm1, 1, %v6777_v2  ;;  %v1608_v34 = vsel %vm1576_vm2, 1, %v6777_v2  ;;  %vm1219_vm1 = vcmp.eq.s32.totalorder %v3907_v53, 1  ;;  %vm1218_vm2 = vcmp.eq.s32.totalorder %v3913_v44, 1 }
  0xf5   :  { %1455 = vperm.xlu0 %2949, %v1370_v21   ;;  %v6791_v21 = vld [vmem:[#allocation18_spill] sm:$0xff]  ;;  %v1250_v44 = vsel %vm1218_vm2, %v3630_v61, -inf }
  0xf6   :  { %v3931_v35 = vpop.permute.xlu1 %1164  ;;  %v3933_v18 = vpop.permute.xlu2 %1194  ;;  %vm1208_vm3 = vcmp.eq.s32.totalorder %v6791_v21, 1 }
  0xf7   :  { %v3937_v27 = vpop.permute.xlu0 %1161  ;;  %v1240_v3 = vsel %vm1208_vm3, %v6792_v1, -inf  ;;  %vm1223_vm3 = vcmp.eq.s32.totalorder %v3885_v32, 1  ;;  %vm1225_vm11 = vcmp.eq.s32.totalorder %v3931_v35, 1 }
  0xfc   :  { %1467 = vperm.xlu1 %2950, %v1374_v40   ;;  %1470 = vperm.xlu2 %2951, %v1375_v10  }
  0xfd   :  { %1464 = vperm.xlu0 %2949, %v1373_v28   ;;  %v3977_v28 = vld [vmem:[%s6612_s1 + $0x20] sm:$0xff] }
  0xfe   :  { %v3943_v58 = vpop.permute.xlu1 %1173  ;;  %v3945_v37 = vpop.permute.xlu2 %1203  ;;  %6793 = vst [vmem:[#allocation9_spill] sm:$0xff] %v3977_v28  ;;  %vm1580_vm6 = vcmp.eq.s32.totalorder %v3977_v28, 3  ;;  %v6797_v28 = vld [vmem:[#allocation17_spill] sm:$0xff] }
  0xff   :  { %v3954_v51 = vpop.permute.xlu0 %1170  ;;  %v1612_v33 = vsel %vm1580_vm6, 1, %v6777_v2  ;;  %vm1228_vm12 = vcmp.eq.s32.totalorder %v3943_v58, 1 }
 0x100   :  { %vm1227_vm14 = vcmp.eq.s32.totalorder %v3954_v51, 1  ;;  %v1260_v58 = vsel %vm1228_vm12, %v3708_v57, -inf }
 0x104   :  { %1644 = vperm.xlu1 %2950, %v1609_v43   ;;  %1647 = vperm.xlu2 %2951, %v1610_v14   ;;  %v3994_v43 = vld [vmem:[%s6612_s1 + $0x18] sm:$0xff]  ;;  %v1245_v14 = vsel %vm1213_vm8, %v3578_v59, -inf  ;;  %v6798_v59 = vld [vmem:[#allocation20_spill] sm:$0xff] }
 0x105   :  { %1641 = vperm.xlu0 %2949, %v1608_v34   ;;  %6795 = vst [vmem:[#allocation13_spill] sm:$0xff] %v3994_v43  ;;  %vm1579_vm10 = vcmp.eq.s32.totalorder %v3994_v43, 3  ;;  %v6796_v34 = vld [vmem:[#allocation15_spill] sm:$0xff]  ;;  %v1273_v53 = vmax.f32 %v1241_v31, %v1245_v14  ;;  %v1251_v63 = vsel %vm1219_vm1, %v6798_v59, -inf  ;;  %v4033_v59 = vld [vmem:[%s6612_s1 + $0x40] sm:$0xff]  ;;  %v1255_v14 = vsel %vm1223_vm3, %v3720_v60, -inf }
 0x106   :  { %v3970_v40 = vpop.permute.xlu1 %1182  ;;  %v3972_v10 = vpop.permute.xlu2 %1380  ;;  %v1244_v21 = vsel %vm1212_vm9, %v6796_v34, -inf  ;;  %v1611_v62 = vsel %vm1579_vm10, 1, %v6777_v2  ;;  %v1248_v34 = vsel %vm1216_vm0, %v6797_v28, -inf  ;;  %v4027_v28 = vld [vmem:[%s6612_s1 + $0x38] sm:$0xff]  ;;  %vm1584_vm6 = vcmp.eq.s32.totalorder %v4033_v59, 3 }
 0x107   :  { %v3989_v45 = vpop.permute.xlu0 %1179  ;;  %v1272_v55 = vmax.f32 %v1240_v3, %v1244_v21  ;;  %vm1583_vm5 = vcmp.eq.s32.totalorder %v4027_v28, 3  ;;  %v1274_v3 = vmax.f32 %v1242_v13, %v1246_v0  ;;  %vm1226_vm9 = vcmp.eq.s32.totalorder %v3897_v38, 1 }
 0x108   :  { %v1279_v21 = vmax.f32 %v1275_v46, %v1251_v63  ;;  %vm1224_vm10 = vcmp.eq.s32.totalorder %v3937_v27, 1  ;;  %v1615_v0 = vsel %vm1583_vm5, 1, %v6777_v2  ;;  %v1253_v13 = vsel %vm1221_vm7, %v3661_v22, -inf }
 0x109   :  { %v1276_v26 = vmax.f32 %v1272_v55, %v1248_v34  ;;  %v1254_v55 = vsel %vm1222_vm4, %v3685_v52, -inf  ;;  %v1278_v47 = vmax.f32 %v1274_v3, %v1250_v44  ;;  %v1277_v29 = vmax.f32 %v1273_v53, %v1249_v56  ;;  %v4077_v53 = vld [vmem:[%s6612_s1 + $0x58] sm:$0xff] }
 0x10a   :  { %v1258_v46 = vsel %vm1226_vm9, %v3753_v7, -inf  ;;  %v1256_v4 = vsel %vm1224_vm10, %v3714_v8, -inf  ;;  %v1283_v27 = vmax.f32 %v1279_v21, %v1255_v14  ;;  %v1257_v56 = vsel %vm1225_vm11, %v3702_v41, -inf  ;;  %v6799_v3 = vld [vmem:[#allocation25_spill] sm:$0xff]  ;;  %v4086_v21 = vld [vmem:[%s6612_s1 + $0x48] sm:$0xff] }
 0x10b   :  { %v1282_v63 = vmax.f32 %v1278_v47, %v1254_v55  ;;  %v1280_v38 = vmax.f32 %v1276_v26, %v1252_v39  ;;  %v1281_v35 = vmax.f32 %v1277_v29, %v1253_v13  ;;  %v4066_v39 = vld [vmem:[%s6612_s1 + $0x50] sm:$0xff]  ;;  %vm1231_vm1 = vcmp.eq.s32.totalorder %v3970_v40, 1 }
 0x10c   :  { %1653 = vperm.xlu1 %2950, %v1612_v33   ;;  %1656 = vperm.xlu2 %2951, %v1613_v25   ;;  %v4040_v25 = vld [vmem:[%s6612_s1 + $0x30] sm:$0xff]  ;;  %vm1586_vm0 = vcmp.eq.s32.totalorder %v4066_v39, 3  ;;  %vm1230_vm2 = vcmp.eq.s32.totalorder %v3989_v45, 1  ;;  %vm1587_vm3 = vcmp.eq.s32.totalorder %v4077_v53, 3  ;;  %v1259_v26 = vsel %vm1227_vm14, %v6799_v3, -inf }
 0x10d   :  { %1650 = vperm.xlu0 %2949, %v1611_v62   ;;  %vm1582_vm8 = vcmp.eq.s32.totalorder %v4040_v25, 3  ;;  %v1616_v62 = vsel %vm1584_vm6, 1, %v6777_v2  ;;  %v1284_v44 = vmax.f32 %v1280_v38, %v1256_v4  ;;  %v1286_v57 = vmax.f32 %v1282_v63, %v1258_v46  ;;  %v6800_v46 = vld [vmem:[#allocation26_spill] sm:$0xff] }
 0x10e   :  { %v4020_v6 = vpop.permute.xlu1 %1191  ;;  %v4022_v49 = vpop.permute.xlu2 %1389  ;;  %v1614_v32 = vsel %vm1582_vm8, 1, %v6777_v2  ;;  %vm1585_vm4 = vcmp.eq.s32.totalorder %v4086_v21, 3  ;;  %v1285_v55 = vmax.f32 %v1281_v35, %v1257_v56  ;;  %v1618_v47 = vsel %vm1586_vm0, 1, %v6777_v2 }
 0x10f   :  { %v1189_v33 = vpop.permute.xlu0 %1188  ;;  %vm1234_vm5 = vcmp.eq.s32.totalorder %v4020_v6, 1  ;;  %v1263_v51 = vsel %vm1231_vm1, %v3778_v11, -inf  ;;  %v1619_v13 = vsel %vm1587_vm3, 1, %v6777_v2  ;;  %v1287_v29 = vmax.f32 %v1283_v27, %v1259_v26  ;;  %v4126_v26 = vld [vmem:[%s6612_s1 + $0x70] sm:$0xff] }
 0x110   :  { %vm1233_vm6 = vcmp.eq.s32.totalorder %v1189_v33, 1  ;;  %v1617_v6 = vsel %vm1585_vm4, 1, %v6777_v2  ;;  %v1261_v33 = vsel %vm1229_vm13, %v3770_v17, -inf  ;;  %v1264_v40 = vsel %vm1232_vm15, %v3793_v15, -inf }
 0x111   :  { %v1265_v45 = vsel %vm1233_vm6, %v6800_v46, -inf  ;;  %vm1235_vm9 = vcmp.eq.s32.totalorder %v3933_v18, 1  ;;  %v1291_v63 = vmax.f32 %v1287_v29, %v1263_v51  ;;  %v1289_v4 = vmax.f32 %v1285_v55, %v1261_v33  ;;  %v4135_v55 = vld [vmem:[%s6612_s1 + $0x60] sm:$0xff] }
 0x112   :  { %vm1238_vm10 = vcmp.eq.s32.totalorder %v3945_v37, 1  ;;  %vm1590_vm12 = vcmp.eq.s32.totalorder %v4126_v26, 3  ;;  %vm1588_vm13 = vcmp.eq.s32.totalorder %v4135_v55, 3 }
 0x113   :  { %v1293_v56 = vmax.f32 %v1289_v4, %v1265_v45  ;;  %v1622_v29 = vsel %vm1590_vm12, 1, %v6777_v2  ;;  %v4152_v4 = vld [vmem:[%s6612_s1 + $0x80] sm:$0xff] }
 0x114   :  { %1662 = vperm.xlu1 %2950, %v1615_v0   ;;  %1665 = vperm.xlu2 %2951, %v1616_v62   ;;  %v1288_v0 = vmax.f32 %v1284_v44, %v1260_v58  ;;  %v1262_v62 = vsel %vm1230_vm2, %v3764_v16, -inf  ;;  %v4120_v44 = vld [vmem:[%s6612_s1 + $0x68] sm:$0xff]  ;;  %6802 = vst [vmem:[#allocation8_spill] sm:$0xff] %v4152_v4  ;;  %vm1592_vm15 = vcmp.eq.s32.totalorder %v4152_v4, 3 }
 0x115   :  { %1659 = vperm.xlu0 %2949, %v1614_v32   ;;  %v1266_v32 = vsel %vm1234_vm5, %v3816_v20, -inf  ;;  %v1290_v38 = vmax.f32 %v1286_v57, %v1262_v62  ;;  %6801 = vst [vmem:[#allocation10_spill] sm:$0xff] %v4120_v44  ;;  %vm1589_vm11 = vcmp.eq.s32.totalorder %v4120_v44, 3  ;;  %v1267_v57 = vsel %vm1235_vm9, %v3811_v48, -inf }
 0x116   :  { %v1201_v31 = vpop.permute.xlu1 %1200  ;;  %v4072_v34 = vpop.permute.xlu2 %1398  ;;  %v1292_v35 = vmax.f32 %v1288_v0, %v1264_v40  ;;  %v1295_v51 = vmax.f32 %v1291_v63, %v1267_v57  ;;  %v1270_v62 = vsel %vm1238_vm10, %v3858_v23, -inf  ;;  %v1621_v18 = vsel %vm1589_vm11, 1, %v6777_v2 }
 0x117   :  { %v1198_v14 = vpop.permute.xlu0 %1197  ;;  %vm1237_vm7 = vcmp.eq.s32.totalorder %v1201_v31, 1  ;;  %v1294_v36 = vmax.f32 %v1290_v38, %v1266_v32  ;;  %v1620_v40 = vsel %vm1588_vm13, 1, %v6777_v2 }
 0x118   :  { %vm1236_vm8 = vcmp.eq.s32.totalorder %v1198_v14, 1  ;;  %v1269_v19 = vsel %vm1237_vm7, %v3840_v30, -inf }
 0x119   :  { %v1268_v27 = vsel %vm1236_vm8, %v3822_v9, -inf }
 0x11a   :  { %v1296_v0 = vmax.f32 %v1292_v35, %v1268_v27  ;;  %v4166_v35 = vld [vmem:[%s6612_s1 + $0x78] sm:$0xff] }
 0x11b   :  { %6804 = vst [vmem:[#allocation16_spill] sm:$0xff] %v4166_v35  ;;  %vm1591_vm1 = vcmp.eq.s32.totalorder %v4166_v35, 3 }
 0x11c   :  { %1671 = vperm.xlu1 %2950, %v1618_v47   ;;  %1674 = vperm.xlu2 %2951, %v1619_v13   ;;  %v1297_v47 = vmax.f32 %v1293_v56, %v1269_v19  ;;  %v4158_v19 = vld [vmem:[%s6612_s1 + $0x88] sm:$0xff]  ;;  %v1624_v56 = vsel %vm1592_vm15, 1, %v6777_v2  ;;  %vm1840_vm15 = vcmp.eq.s32.totalorder %v3959_v50, 4 }
 0x11d   :  { %1668 = vperm.xlu0 %2949, %v1617_v6   ;;  %v1298_v6 = vmax.f32 %v1294_v36, %v1270_v62  ;;  %6803 = vst [vmem:[#allocation18_spill] sm:$0xff] %v4158_v19  ;;  %vm1593_vm0 = vcmp.eq.s32.totalorder %v4158_v19, 3  ;;  %v4287_v19 = vld [vmem:[%s6612_s1 + $0xf8] sm:$0xff] }
 0x11e   :  { %v4113_v58 = vpop.permute.xlu1 %1377  ;;  %v4115_v31 = vpop.permute.xlu2 %1407  ;;  %v1300_v32 = vmax.f32 %v1296_v0, %v1297_v47  ;;  %v1625_v57 = vsel %vm1593_vm0, 1, %v6777_v2  ;;  %v1623_v47 = vsel %vm1591_vm1, 1, %v6777_v2  ;;  %6817 = vst [vmem:[#allocation34_spill] sm:$0xff] %v4287_v19  ;;  %vm1473_vm1 = vcmp.eq.s32.totalorder %v3972_v10, 1 }
 0x11f   :  { %v1207_v14 = vpop.permute.xlu0 %1206 }
 0x120   :  { %vm1239_vm14 = vcmp.eq.s32.totalorder %v1207_v14, 1 }
 0x121   :  { %v1271_v13 = vsel %vm1239_vm14, %v3851_v24, -inf  ;;  %vm1607_vm14 = vcmp.eq.s32.totalorder %v4287_v19, 3  ;;  %v1505_v19 = vsel %vm1473_vm1, %v3599_v5, -inf  ;;  %v4320_v5 = vld [vmem:[%s6612_s1 + $0x8] sm:$0xff] }
 0x122   :  { %v1299_v33 = vmax.f32 %v1295_v51, %v1271_v13  ;;  %6819 = vst [vmem:[#allocation36_spill] sm:$0xff] %v4320_v5 }
 0x124   :  { %v1301_v45 = vmax.f32 %v1298_v6, %v1299_v33  ;;  %1680 = vperm.xlu1 %2950, %v1621_v18   ;;  %1683 = vperm.xlu2 %2951, %v1622_v29   ;;  %v4179_v18 = vld [vmem:[%s6612_s1 + $0x98] sm:$0xff]  ;;  %v4185_v29 = vld [vmem:[%s6612_s1 + $0xa0] sm:$0xff]  ;;  %v4193_v33 = vld [vmem:[%s6612_s1 + $0x90] sm:$0xff] }
 0x125   :  { %1677 = vperm.xlu0 %2949, %v1620_v40   ;;  %6805 = vst [vmem:[#allocation15_spill] sm:$0xff] %v4179_v18  ;;  %vm1595_vm2 = vcmp.eq.s32.totalorder %v4179_v18, 3  ;;  %vm1596_vm3 = vcmp.eq.s32.totalorder %v4185_v29, 3  ;;  %vm1594_vm4 = vcmp.eq.s32.totalorder %v4193_v33, 3 }
 0x126   :  { %v1302_v63 = vmax.f32 %v1300_v32, %v1301_v45  ;;  %v4145_v38 = vpop.permute.xlu1 %1386  ;;  %v4147_v37 = vpop.permute.xlu2 %1416  ;;  %6806 = vst [vmem:[#allocation17_spill] sm:$0xff] %v4185_v29  ;;  %v1309_v32 = vld [vmem:[#allocation2 + $0x1] sm:$0x1]  ;;  %v1627_v45 = vsel %vm1595_vm2, 1, %v6777_v2  ;;  %vm1472_vm2 = vcmp.eq.s32.totalorder %v4113_v58, 1 }
 0x127   :  { %v4161_v27 = vpop.permute.xlu0 %1383  ;;  %6807 = vst [vmem:[#allocation20_spill] sm:$0xff] %v4193_v33  ;;  %v4260_v29 = vld [vmem:[%s6612_s1 + $0xe0] sm:$0xff]  ;;  %v1504_v58 = vsel %vm1472_vm2, %v6792_v1, -inf }
 0x128   :  { %v1303_v36 = vrot.slane %v1302_v63, 4  ;;  %6814 = vst [vmem:[#allocation31_spill] sm:$0xff] %v4260_v29  ;;  %vm1604_vm11 = vcmp.eq.s32.totalorder %v4260_v29, 3 }
 0x12a   :  { %v1304_v14 = vmax.f32 %v1302_v63, %v1303_v36  ;;  %v1628_v63 = vsel %vm1596_vm3, 1, %v6777_v2  ;;  %vm1475_vm3 = vcmp.eq.s32.totalorder %v4145_v38, 1 }
 0x12c   :  { %v1305_v0 = vrot.slane %v1304_v14, 2  ;;  %1689 = vperm.xlu1 %2950, %v1624_v56   ;;  %1692 = vperm.xlu2 %2951, %v1625_v57   ;;  %v1626_v56 = vsel %vm1594_vm4, 1, %v6777_v2  ;;  %vm1842_vm4 = vcmp.eq.s32.totalorder %v3951_v54, 4 }
 0x12d   :  { %1686 = vperm.xlu0 %2949, %v1623_v47  }
 0x12e   :  { %v1306_v51 = vmax.f32 %v1304_v14, %v1305_v0  ;;  %v4172_v62 = vpop.permute.xlu1 %1395  ;;  %v4174_v13 = vpop.permute.xlu2 %1425  ;;  %v4206_v0 = vld [vmem:[%s6612_s1 + $0xb0] sm:$0xff] }
 0x12f   :  { %v4188_v6 = vpop.permute.xlu0 %1392  ;;  %6808 = vst [vmem:[#allocation25_spill] sm:$0xff] %v4206_v0  ;;  %vm1598_vm5 = vcmp.eq.s32.totalorder %v4206_v0, 3  ;;  %v4233_v0 = vld [vmem:[%s6612_s1 + $0xc8] sm:$0xff] }
 0x130   :  { %v1307_v40 = vrot.slane %v1306_v51, 1  ;;  %6811 = vst [vmem:[#allocation28_spill] sm:$0xff] %v4233_v0  ;;  %vm1601_vm8 = vcmp.eq.s32.totalorder %v4233_v0, 3 }
 0x132   :  { %v1308_v36 = vmax.f32 %v1306_v51, %v1307_v40  ;;  %v4212_v51 = vld [vmem:[%s6612_s1 + $0xb8] sm:$0xff] }
 0x133   :  { %6809 = vst [vmem:[#allocation26_spill] sm:$0xff] %v4212_v51  ;;  %vm1599_vm6 = vcmp.eq.s32.totalorder %v4212_v51, 3  ;;  %v4239_v51 = vld [vmem:[%s6612_s1 + $0xd0] sm:$0xff] }
 0x134   :  { %v1310_v57 = vmax.f32 %v1309_v32, %v1308_v36  ;;  %1698 = vperm.xlu1 %2950, %v1627_v45   ;;  %1701 = vperm.xlu2 %2951, %v1628_v63   ;;  %v4220_v32 = vld [vmem:[%s6612_s1 + $0xa8] sm:$0xff]  ;;  %v1630_v45 = vsel %vm1598_vm5, 1, %v6777_v2  ;;  %v1631_v63 = vsel %vm1599_vm6, 1, %v6777_v2  ;;  %6812 = vst [vmem:[#allocation29_spill] sm:$0xff] %v4239_v51  ;;  %vm1602_vm9 = vcmp.eq.s32.totalorder %v4239_v51, 3 }
 0x135   :  { %1695 = vperm.xlu0 %2949, %v1626_v56   ;;  %6810 = vst [vmem:[#allocation27_spill] sm:$0xff] %v4220_v32  ;;  %vm1597_vm7 = vcmp.eq.s32.totalorder %v4220_v32, 3  ;;  %v1634_v0 = vsel %vm1602_vm9, 1, %v6777_v2  ;;  %vm1843_vm5 = vcmp.eq.s32.totalorder %v3994_v43, 4  ;;  %vm1476_vm6 = vcmp.eq.s32.totalorder %v4022_v49, 1 }
 0x136   :  { %1311 = vst [vmem:[#allocation2 + $0x1] sm:$0x1] %v1310_v57  ;;  %v4199_v14 = vpop.permute.xlu1 %1404  ;;  %v4201_v47 = vpop.permute.xlu2 %1434  ;;  %v1629_v36 = vsel %vm1597_vm7, 1, %v6777_v2  ;;  %vm1479_vm7 = vcmp.eq.s32.totalorder %v4072_v34, 1  ;;  %vm1841_vm9 = vcmp.eq.s32.totalorder %v4320_v5, 4  ;;  %v1507_v49 = vsel %vm1475_vm3, %v3612_v12, -inf }
 0x137   :  { %v4215_v40 = vpop.permute.xlu0 %1401  ;;  %v1875_v38 = vsel %vm1843_vm5, 1, %v6777_v2  ;;  %v6821_v12 = vld [vmem:[#allocation22_spill] sm:$0xff]  ;;  %v6824_v34 = vld [vmem:[#allocation23_spill] sm:$0xff]  ;;  %vm1846_vm3 = vcmp.eq.s32.totalorder %v4040_v25, 4  ;;  %vm1491_vm5 = vcmp.eq.s32.totalorder %v4201_v47, 1 }
 0x13c   :  { %1707 = vperm.xlu1 %2950, %v1630_v45   ;;  %1710 = vperm.xlu2 %2951, %v1631_v63   ;;  %v4247_v63 = vld [vmem:[%s6612_s1 + $0xc0] sm:$0xff] }
 0x13d   :  { %1704 = vperm.xlu0 %2949, %v1629_v36   ;;  %6813 = vst [vmem:[#allocation30_spill] sm:$0xff] %v4247_v63  ;;  %vm1600_vm10 = vcmp.eq.s32.totalorder %v4247_v63, 3  ;;  %v1633_v36 = vsel %vm1601_vm8, 1, %v6777_v2  ;;  %v4266_v63 = vld [vmem:[%s6612_s1 + $0xe8] sm:$0xff]  ;;  %vm1478_vm8 = vcmp.eq.s32.totalorder %v4172_v62, 1  ;;  %v4334_v62 = vld [vmem:[%s6613_s2 + $0x20] sm:$0xff] }
 0x13e   :  { %v4226_v56 = vpop.permute.xlu1 %1413  ;;  %v4228_v57 = vpop.permute.xlu2 %1443  ;;  %v1632_v18 = vsel %vm1600_vm10, 1, %v6777_v2  ;;  %6815 = vst [vmem:[#allocation32_spill] sm:$0xff] %v4266_v63  ;;  %vm1605_vm12 = vcmp.eq.s32.totalorder %v4266_v63, 3  ;;  %vm1482_vm10 = vcmp.eq.s32.totalorder %v4115_v31, 1  ;;  %v1508_v1 = vsel %vm1476_vm6, %v4334_v62, -inf }
 0x13f   :  { %v4242_v45 = vpop.permute.xlu0 %1410  ;;  %v1637_v29 = vsel %vm1605_vm12, 1, %v6777_v2  ;;  %vm1477_vm12 = vcmp.eq.s32.totalorder %v4188_v6, 1  ;;  %6820 = vst [vmem:[#allocation37_spill] sm:$0xff] %v4334_v62  ;;  %v1510_v31 = vsel %vm1478_vm8, %v3605_v42, -inf  ;;  %v1873_v6 = vsel %vm1841_vm9, 1, %v6777_v2 }
 0x140   :  { %v1536_v43 = vmax.f32 %v1504_v58, %v1508_v1  ;;  %vm1484_vm6 = vcmp.eq.s32.totalorder %v4226_v56, 1  ;;  %vm1494_vm9 = vcmp.eq.s32.totalorder %v4228_v57, 1 }
 0x141   :  { %v1526_v57 = vsel %vm1494_vm9, %v3764_v16, -inf  ;;  %vm1852_vm9 = vcmp.eq.s32.totalorder %v4135_v55, 4 }
 0x144   :  { %1716 = vperm.xlu1 %2950, %v1633_v36   ;;  %1719 = vperm.xlu2 %2951, %v1634_v0   ;;  %v1636_v36 = vsel %vm1604_vm11, 1, %v6777_v2  ;;  %vm1485_vm11 = vcmp.eq.s32.totalorder %v4147_v37, 1 }
 0x145   :  { %1713 = vperm.xlu0 %2949, %v1632_v18   ;;  %v4274_v18 = vld [vmem:[%s6612_s1 + $0xd8] sm:$0xff]  ;;  %v4349_v42 = vsel %vm1485_vm11, %v3661_v22, -inf }
 0x146   :  { %v4253_v32 = vpop.permute.xlu1 %1422  ;;  %v4255_v51 = vpop.permute.xlu2 %1452  ;;  %6816 = vst [vmem:[#allocation33_spill] sm:$0xff] %v4274_v18  ;;  %vm1603_vm13 = vcmp.eq.s32.totalorder %v4274_v18, 3 }
 0x147   :  { %v4269_v0 = vpop.permute.xlu0 %1419  ;;  %v1635_v4 = vsel %vm1603_vm13, 1, %v6777_v2  ;;  %vm1474_vm13 = vcmp.eq.s32.totalorder %v4161_v27, 1  ;;  %v1511_v27 = vsel %vm1479_vm7, %v6821_v12, -inf  ;;  %vm1487_vm1 = vcmp.eq.s32.totalorder %v4253_v32, 1 }
 0x148   :  { %v1539_v5 = vmax.f32 %v1507_v49, %v1511_v27  ;;  %v6826_v49 = vld [vmem:[#allocation14_spill] sm:$0xff]  ;;  %vm1486_vm8 = vcmp.eq.s32.totalorder %v4269_v0, 1  ;;  %v6829_v27 = vld [vmem:[#allocation24_spill] sm:$0xff]  ;;  %v1523_v32 = vsel %vm1491_vm5, %v6799_v3, -inf  ;;  %vm1497_vm5 = vcmp.eq.s32.totalorder %v4255_v51, 1 }
 0x149   :  { %vm1845_vm2 = vcmp.eq.s32.totalorder %v6826_v49, 4  ;;  %v1529_v51 = vsel %vm1497_vm5, %v6800_v46, -inf }
 0x14a   :  { %v1877_v1 = vsel %vm1845_vm2, 1, %v6777_v2  ;;  %vm1847_vm2 = vcmp.eq.s32.totalorder %v4027_v28, 4 }
 0x14c   :  { %1725 = vperm.xlu1 %2950, %v1636_v36   ;;  %1728 = vperm.xlu2 %2951, %v1637_v29   ;;  %v4296_v29 = vld [vmem:[%s6612_s1 + $0xf0] sm:$0xff]  ;;  %v1872_v36 = vsel %vm1840_vm15, 1, %v6777_v2  ;;  %vm1483_vm15 = vcmp.eq.s32.totalorder %v4242_v45, 1  ;;  %v4358_v45 = vld [vmem:[%s6613_s2 + $0x58] sm:$0xff] }
 0x14d   :  { %1722 = vperm.xlu0 %2949, %v1635_v4   ;;  %6818 = vst [vmem:[#allocation35_spill] sm:$0xff] %v4296_v29  ;;  %vm1606_vm0 = vcmp.eq.s32.totalorder %v4296_v29, 3  ;;  %v1639_v4 = vsel %vm1607_vm14, 1, %v6777_v2  ;;  %vm1481_vm14 = vcmp.eq.s32.totalorder %v4199_v14, 1  ;;  %v6823_v14 = vld [vmem:[#allocation21_spill] sm:$0xff]  ;;  %v1515_v22 = vsel %vm1483_vm15, %v4358_v45, -inf }
 0x14e   :  { %v4280_v33 = vpop.permute.xlu1 %1431  ;;  %v4282_v63 = vpop.permute.xlu2 %1461  ;;  %v1638_v44 = vsel %vm1606_vm0, 1, %v6777_v2  ;;  %v1506_v62 = vsel %vm1474_vm13, %v6823_v14, -inf  ;;  %v1513_v12 = vsel %vm1481_vm14, %v6824_v34, -inf  ;;  %vm1480_vm0 = vcmp.eq.s32.totalorder %v4215_v40, 1  ;;  %6825 = vst [vmem:[#allocation22_spill] sm:$0xff] %v4358_v45 }
 0x14f   :  { %v4291_v18 = vpop.permute.xlu0 %1428  ;;  %v1538_v35 = vmax.f32 %v1506_v62, %v1510_v31  ;;  %v1543_v56 = vmax.f32 %v1539_v5, %v1515_v22  ;;  %v1878_v31 = vsel %vm1846_vm3, 1, %v6777_v2  ;;  %vm1848_vm13 = vcmp.eq.s32.totalorder %v4033_v59, 4 }
 0x150   :  { %vm1489_vm11 = vcmp.eq.s32.totalorder %v4291_v18, 1  ;;  %vm1849_vm14 = vcmp.eq.s32.totalorder %v4086_v21, 4 }
 0x154   :  { %1734 = vperm.xlu1 %2950, %v1639_v4   ;;  %1905 = vperm.xlu2 %2951, %v1872_v36   ;;  %v1514_v4 = vsel %vm1482_vm10, %v3630_v61, -inf  ;;  %v6822_v36 = vld [vmem:[#allocation19_spill] sm:$0xff]  ;;  %vm1490_vm10 = vcmp.eq.s32.totalorder %v4280_v33, 1  ;;  %v1521_v33 = vsel %vm1489_vm11, %v3702_v41, -inf  ;;  %v4415_v41 = vld [vmem:[%s6613_s2 + $0xa0] sm:$0xff]  ;;  %vm1850_vm11 = vcmp.eq.s32.totalorder %v4066_v39, 4 }
 0x155   :  { %1731 = vperm.xlu0 %2949, %v1638_v44   ;;  %v1874_v44 = vsel %vm1842_vm4, 1, %v6777_v2  ;;  %v1509_v54 = vsel %vm1477_vm12, %v6822_v36, -inf  ;;  %vm1488_vm4 = vcmp.eq.s32.totalorder %v4174_v13, 1  ;;  %v1519_v13 = vsel %vm1487_vm1, %v3720_v60, -inf }
 0x156   :  { %v4306_v50 = vpop.permute.xlu1 %1440  ;;  %v4308_v29 = vpop.permute.xlu2 %1470  ;;  %v1537_v61 = vmax.f32 %v1505_v19, %v1509_v54  ;;  %v6827_v19 = vld [vmem:[#allocation9_spill] sm:$0xff]  ;;  %v1516_v36 = vsel %vm1484_vm6, %v6829_v27, -inf  ;;  %v1542_v14 = vmax.f32 %v1538_v35, %v1514_v4  ;;  %v1518_v60 = vsel %vm1486_vm8, %v3685_v52, -inf }
 0x157   :  { %v4315_v10 = vpop.permute.xlu0 %1437  ;;  %vm1844_vm7 = vcmp.eq.s32.totalorder %v6827_v19, 4  ;;  %vm1493_vm15 = vcmp.eq.s32.totalorder %v4306_v50, 1  ;;  %v1881_v50 = vsel %vm1849_vm14, 1, %v6777_v2  ;;  %vm1500_vm6 = vcmp.eq.s32.totalorder %v4282_v63, 1 }
 0x158   :  { %v1876_v40 = vsel %vm1844_vm7, 1, %v6777_v2  ;;  %v1546_v52 = vmax.f32 %v1542_v14, %v1518_v60  ;;  %v1525_v5 = vsel %vm1493_vm15, %v3770_v17, -inf  ;;  %vm1851_vm7 = vcmp.eq.s32.totalorder %v4077_v53, 4 }
 0x159   :  { %vm1503_vm8 = vcmp.eq.s32.totalorder %v4308_v29, 1  ;;  %v1532_v63 = vsel %vm1500_vm6, %v3822_v9, -inf  ;;  %v1882_v60 = vsel %vm1850_vm11, 1, %v6777_v2 }
 0x15a   :  { %v1535_v29 = vsel %vm1503_vm8, %v3851_v24, -inf }
 0x15c   :  { %1911 = vperm.xlu1 %2950, %v1874_v44   ;;  %1914 = vperm.xlu2 %2951, %v1875_v38   ;;  %v1541_v44 = vmax.f32 %v1537_v61, %v1513_v12  ;;  %v4374_v38 = vld [vmem:[%s6613_s2 + $0x40] sm:$0xff]  ;;  %v1547_v12 = vmax.f32 %v1543_v56, %v1519_v13 }
 0x15d   :  { %1908 = vperm.xlu0 %2949, %v1873_v6   ;;  %6828 = vst [vmem:[#allocation19_spill] sm:$0xff] %v4374_v38  ;;  %v1512_v62 = vsel %vm1480_vm0, %v4374_v38, -inf  ;;  %v1520_v6 = vsel %vm1488_vm4, %v3714_v8, -inf  ;;  %vm1492_vm0 = vcmp.eq.s32.totalorder %v4315_v10, 1 }
 0x15e   :  { %v4361_v37 = vpop.permute.xlu1 %1449  ;;  %v4363_v58 = vpop.permute.xlu2 %1647  ;;  %v1540_v34 = vmax.f32 %v1536_v43, %v1512_v62  ;;  %v1545_v8 = vmax.f32 %v1541_v44, %v4349_v42  ;;  %v1522_v43 = vsel %vm1490_vm10, %v3753_v7, -inf  ;;  %v1551_v47 = vmax.f32 %v1547_v12, %v1523_v32 }
 0x15f   :  { %v1447_v54 = vpop.permute.xlu0 %1446  ;;  %vm1496_vm3 = vcmp.eq.s32.totalorder %v4361_v37, 1  ;;  %v1880_v7 = vsel %vm1848_vm13, 1, %v6777_v2  ;;  %v1550_v10 = vmax.f32 %v1546_v52, %v1522_v43  ;;  %v1524_v4 = vsel %vm1492_vm0, %v4415_v41, -inf  ;;  %v6831_v52 = vld [vmem:[#allocation10_spill] sm:$0xff] }
 0x160   :  { %v1544_v35 = vmax.f32 %v1540_v34, %v1516_v36  ;;  %vm1495_vm12 = vcmp.eq.s32.totalorder %v1447_v54, 1  ;;  %v1549_v42 = vmax.f32 %v1545_v8, %v1521_v33  ;;  %v1528_v17 = vsel %vm1496_vm3, %v3793_v15, -inf }
 0x161   :  { %v1527_v18 = vsel %vm1495_vm12, %v3778_v11, -inf  ;;  %v1879_v11 = vsel %vm1847_vm2, 1, %v6777_v2  ;;  %v1554_v13 = vmax.f32 %v1550_v10, %v1526_v57  ;;  %vm1854_vm13 = vcmp.eq.s32.totalorder %v4126_v26, 4 }
 0x162   :  { %v1548_v61 = vmax.f32 %v1544_v35, %v1520_v6  ;;  %v1555_v37 = vmax.f32 %v1551_v47, %v1527_v18  ;;  %v1553_v54 = vmax.f32 %v1549_v42, %v1525_v5  ;;  %v1883_v6 = vsel %vm1851_vm7, 1, %v6777_v2  ;;  %v6830_v35 = vld [vmem:[#allocation16_spill] sm:$0xff]  ;;  %v6832_v5 = vld [vmem:[#allocation18_spill] sm:$0xff] }
 0x163   :  { %vm1855_vm14 = vcmp.eq.s32.totalorder %v6830_v35, 4  ;;  %vm1853_vm15 = vcmp.eq.s32.totalorder %v6831_v52, 4  ;;  %vm1857_vm0 = vcmp.eq.s32.totalorder %v6832_v5, 4 }
 0x164   :  { %1920 = vperm.xlu1 %2950, %v1877_v1   ;;  %1923 = vperm.xlu2 %2951, %v1878_v31   ;;  %v1552_v44 = vmax.f32 %v1548_v61, %v1524_v4  ;;  %v1557_v46 = vmax.f32 %v1553_v54, %v1529_v51  ;;  %v1887_v33 = vsel %vm1855_vm14, 1, %v6777_v2  ;;  %v6833_v4 = vld [vmem:[#allocation20_spill] sm:$0xff]  ;;  %v6835_v51 = vld [vmem:[#allocation17_spill] sm:$0xff] }
 0x165   :  { %1917 = vperm.xlu0 %2949, %v1876_v40   ;;  %v1884_v40 = vsel %vm1852_vm9, 1, %v6777_v2  ;;  %v6834_v61 = vld [vmem:[#allocation8_spill] sm:$0xff]  ;;  %vm1860_vm3 = vcmp.eq.s32.totalorder %v6835_v51, 4 }
 0x166   :  { %v1459_v16 = vpop.permute.xlu1 %1458  ;;  %v4402_v3 = vpop.permute.xlu2 %1656  ;;  %v1556_v56 = vmax.f32 %v1552_v44, %v1528_v17  ;;  %vm1856_vm2 = vcmp.eq.s32.totalorder %v6834_v61, 4  ;;  %v1889_v17 = vsel %vm1857_vm0, 1, %v6777_v2 }
 0x167   :  { %vm1499_vm1 = vcmp.eq.s32.totalorder %v1459_v16, 1  ;;  %v1456_v0 = vpop.permute.xlu0 %1455  ;;  %v1886_v16 = vsel %vm1854_vm13, 1, %v6777_v2  ;;  %v1888_v44 = vsel %vm1856_vm2, 1, %v6777_v2  ;;  %vm1738_vm2 = vcmp.eq.s32.totalorder %v4363_v58, 1  ;;  %v4540_v58 = vld [vmem:[%s6613_s2 + $0x28] sm:$0xff] }
 0x168   :  { %vm1498_vm4 = vcmp.eq.s32.totalorder %v1456_v0, 1  ;;  %v1531_v22 = vsel %vm1499_vm1, %v3811_v48, -inf  ;;  %v1560_v34 = vmax.f32 %v1556_v56, %v1532_v63  ;;  %v1885_v0 = vsel %vm1853_vm15, 1, %v6777_v2  ;;  %v6836_v63 = vld [vmem:[#allocation27_spill] sm:$0xff]  ;;  %6852 = vst [vmem:[#allocation23_spill] sm:$0xff] %v4540_v58 }
 0x169   :  { %v1530_v62 = vsel %vm1498_vm4, %v3816_v20, -inf  ;;  %v1559_v48 = vmax.f32 %v1555_v37, %v1531_v22  ;;  %vm1858_vm1 = vcmp.eq.s32.totalorder %v6833_v4, 4  ;;  %vm1861_vm4 = vcmp.eq.s32.totalorder %v6836_v63, 4 }
 0x16a   :  { %v1558_v20 = vmax.f32 %v1554_v13, %v1530_v62  ;;  %v1890_v37 = vsel %vm1858_vm1, 1, %v6777_v2 }
 0x16b   :  { %v1563_v9 = vmax.f32 %v1559_v48, %v1535_v29 }
 0x16c   :  { %1929 = vperm.xlu1 %2950, %v1880_v7   ;;  %1932 = vperm.xlu2 %2951, %v1881_v50  }
 0x16d   :  { %1926 = vperm.xlu0 %2949, %v1879_v11   ;;  %v1573_v11 = vld [vmem:[#allocation2 + $0x2] sm:$0x1] }
 0x16e   :  { %v1468_v15 = vpop.permute.xlu1 %1467  ;;  %v4428_v1 = vpop.permute.xlu2 %1665 }
 0x16f   :  { %vm1502_vm10 = vcmp.eq.s32.totalorder %v1468_v15, 1  ;;  %v1465_v31 = vpop.permute.xlu0 %1464  ;;  %v6837_v15 = vld [vmem:[#allocation15_spill] sm:$0xff] }
 0x170   :  { %v1534_v27 = vsel %vm1502_vm10, %v3858_v23, -inf  ;;  %vm1501_vm12 = vcmp.eq.s32.totalorder %v1465_v31, 1  ;;  %vm1859_vm5 = vcmp.eq.s32.totalorder %v6837_v15, 4  ;;  %v1893_v31 = vsel %vm1861_vm4, 1, %v6777_v2 }
 0x171   :  { %v1562_v36 = vmax.f32 %v1558_v20, %v1534_v27  ;;  %v1533_v14 = vsel %vm1501_vm12, %v3840_v30, -inf  ;;  %v1892_v20 = vsel %vm1860_vm3, 1, %v6777_v2  ;;  %vm1741_vm3 = vcmp.eq.s32.totalorder %v4402_v3, 1 }
 0x172   :  { %v1561_v12 = vmax.f32 %v1557_v46, %v1533_v14  ;;  %v6838_v46 = vld [vmem:[#allocation26_spill] sm:$0xff]  ;;  %v6840_v14 = vld [vmem:[#allocation25_spill] sm:$0xff]  ;;  %v1773_v3 = vsel %vm1741_vm3, %v4540_v58, -inf  ;;  %v4573_v58 = vld [vmem:[%s6613_s2 + $0x30] sm:$0xff]  ;;  %vm2110_vm3 = vcmp.eq.s32.totalorder %v4040_v25, 5 }
 0x173   :  { %v1565_v32 = vmax.f32 %v1562_v36, %v1563_v9  ;;  %vm1863_vm6 = vcmp.eq.s32.totalorder %v6838_v46, 4  ;;  %v6839_v9 = vld [vmem:[#allocation30_spill] sm:$0xff]  ;;  %vm1862_vm8 = vcmp.eq.s32.totalorder %v6840_v14, 4 }
 0x174   :  { %v1564_v57 = vmax.f32 %v1560_v34, %v1561_v12  ;;  %1938 = vperm.xlu1 %2950, %v1883_v6   ;;  %1941 = vperm.xlu2 %2951, %v1884_v40   ;;  %v1891_v6 = vsel %vm1859_vm5, 1, %v6777_v2  ;;  %vm1864_vm7 = vcmp.eq.s32.totalorder %v6839_v9, 4  ;;  %v1895_v40 = vsel %vm1863_vm6, 1, %v6777_v2 }
 0x175   :  { %1935 = vperm.xlu0 %2949, %v1882_v60   ;;  %v1896_v34 = vsel %vm1864_vm7, 1, %v6777_v2  ;;  %v1894_v12 = vsel %vm1862_vm8, 1, %v6777_v2  ;;  %vm2108_vm6 = vcmp.eq.s32.totalorder %v6827_v19, 5  ;;  %vm1744_vm7 = vcmp.eq.s32.totalorder %v4428_v1, 1 }
 0x176   :  { %v1566_v24 = vmax.f32 %v1564_v57, %v1565_v32  ;;  %v4438_v8 = vpop.permute.xlu1 %1644  ;;  %v4440_v23 = vpop.permute.xlu2 %1674  ;;  %v6841_v57 = vld [vmem:[#allocation29_spill] sm:$0xff] }
 0x177   :  { %v4444_v30 = vpop.permute.xlu0 %1641  ;;  %vm1866_vm9 = vcmp.eq.s32.totalorder %v6841_v57, 4  ;;  %vm1737_vm4 = vcmp.eq.s32.totalorder %v4438_v8, 1 }
 0x178   :  { %v1567_v43 = vrot.slane %v1566_v24, 4 }
 0x17a   :  { %v1568_v47 = vmax.f32 %v1566_v24, %v1567_v43  ;;  %v6842_v24 = vld [vmem:[#allocation33_spill] sm:$0xff] }
 0x17b   :  { %vm1867_vm10 = vcmp.eq.s32.totalorder %v6842_v24, 4 }
 0x17c   :  { %v1569_v18 = vrot.slane %v1568_v47, 2  ;;  %1947 = vperm.xlu1 %2950, %v1886_v16   ;;  %1950 = vperm.xlu2 %2951, %v1887_v33   ;;  %v6843_v16 = vld [vmem:[#allocation28_spill] sm:$0xff]  ;;  %v1898_v33 = vsel %vm1866_vm9, 1, %v6777_v2 }
 0x17d   :  { %1944 = vperm.xlu0 %2949, %v1885_v0   ;;  %vm1865_vm11 = vcmp.eq.s32.totalorder %v6843_v16, 4 }
 0x17e   :  { %v1570_v7 = vmax.f32 %v1568_v47, %v1569_v18  ;;  %v4450_v50 = vpop.permute.xlu1 %1653  ;;  %v4452_v10 = vpop.permute.xlu2 %1683  ;;  %v1899_v47 = vsel %vm1867_vm10, 1, %v6777_v2  ;;  %v1897_v0 = vsel %vm1865_vm11, 1, %v6777_v2  ;;  %vm1747_vm10 = vcmp.eq.s32.totalorder %v4440_v23, 1 }
 0x17f   :  { %v4456_v42 = vpop.permute.xlu0 %1650  ;;  %vm1740_vm8 = vcmp.eq.s32.totalorder %v4450_v50, 1  ;;  %vm1736_vm11 = vcmp.eq.s32.totalorder %v4444_v30, 1 }
 0x180   :  { %v1571_v22 = vrot.slane %v1570_v7, 1 }
 0x182   :  { %v1572_v54 = vmax.f32 %v1570_v7, %v1571_v22  ;;  %v6844_v22 = vld [vmem:[#allocation32_spill] sm:$0xff] }
 0x183   :  { %vm1869_vm12 = vcmp.eq.s32.totalorder %v6844_v22, 4  ;;  %v4579_v22 = vld [vmem:[%s6613_s2] sm:$0xff] }
 0x184   :  { %v1574_v62 = vmax.f32 %v1573_v11, %v1572_v54  ;;  %1956 = vperm.xlu1 %2950, %v1889_v17   ;;  %1959 = vperm.xlu2 %2951, %v1890_v37   ;;  %v6845_v11 = vld [vmem:[#allocation35_spill] sm:$0xff]  ;;  %v1901_v54 = vsel %vm1869_vm12, 1, %v6777_v2  ;;  %v1768_v1 = vsel %vm1736_vm11, %v4579_v22, -inf }
 0x185   :  { %1953 = vperm.xlu0 %2949, %v1888_v44   ;;  %vm1870_vm13 = vcmp.eq.s32.totalorder %v6845_v11, 4  ;;  %v6846_v37 = vld [vmem:[#allocation31_spill] sm:$0xff] }
 0x186   :  { %1575 = vst [vmem:[#allocation2 + $0x2] sm:$0x1] %v1574_v62  ;;  %v4462_v48 = vpop.permute.xlu1 %1662  ;;  %v4464_v13 = vpop.permute.xlu2 %1692  ;;  %vm1868_vm14 = vcmp.eq.s32.totalorder %v6846_v37, 4  ;;  %v1902_v44 = vsel %vm1870_vm13, 1, %v6777_v2  ;;  %vm1750_vm13 = vcmp.eq.s32.totalorder %v4452_v10, 1 }
 0x187   :  { %v4468_v56 = vpop.permute.xlu0 %1659  ;;  %v1900_v62 = vsel %vm1868_vm14, 1, %v6777_v2  ;;  %vm1743_vm14 = vcmp.eq.s32.totalorder %v4462_v48, 1  ;;  %v4606_v48 = vld [vmem:[%s6613_s2 + $0x50] sm:$0xff] }
 0x188   :  { %vm1742_vm12 = vcmp.eq.s32.totalorder %v4468_v56, 1  ;;  %v1776_v56 = vsel %vm1744_vm7, %v4374_v38, -inf  ;;  %6857 = vst [vmem:[#allocation24_spill] sm:$0xff] %v4606_v48  ;;  %vm1753_vm7 = vcmp.eq.s32.totalorder %v4464_v13, 1 }
 0x18c   :  { %1965 = vperm.xlu1 %2950, %v1892_v20   ;;  %1968 = vperm.xlu2 %2951, %v1893_v31  }
 0x18d   :  { %1962 = vperm.xlu0 %2949, %v1891_v6   ;;  %v6847_v6 = vld [vmem:[#allocation11_spill] sm:$0xff] }
 0x18e   :  { %v4474_v29 = vpop.permute.xlu1 %1671  ;;  %v4476_v27 = vpop.permute.xlu2 %1701  ;;  %vm2104_vm15 = vcmp.eq.s32.totalorder %v6847_v6, 5 }
 0x18f   :  { %v4480_v36 = vpop.permute.xlu0 %1668 }
 0x194   :  { %1974 = vperm.xlu1 %2950, %v1895_v40   ;;  %1977 = vperm.xlu2 %2951, %v1896_v34   ;;  %v6848_v40 = vld [vmem:[#allocation36_spill] sm:$0xff] }
 0x195   :  { %1971 = vperm.xlu0 %2949, %v1894_v12   ;;  %vm2105_vm0 = vcmp.eq.s32.totalorder %v6848_v40, 5  ;;  %v6849_v12 = vld [vmem:[#allocation34_spill] sm:$0xff]  ;;  %v6851_v40 = vld [vmem:[#allocation13_spill] sm:$0xff] }
 0x196   :  { %v4486_v60 = vpop.permute.xlu1 %1680  ;;  %v4488_v32 = vpop.permute.xlu2 %1710  ;;  %vm1871_vm1 = vcmp.eq.s32.totalorder %v6849_v12, 4  ;;  %vm2107_vm5 = vcmp.eq.s32.totalorder %v6851_v40, 5  ;;  %v4551_v40 = vld [vmem:[%s6613_s2 + $0x8] sm:$0xff] }
 0x197   :  { %v4492_v43 = vpop.permute.xlu0 %1677  ;;  %6854 = vst [vmem:[#allocation14_spill] sm:$0xff] %v4551_v40  ;;  %v1769_v19 = vsel %vm1737_vm4, %v4551_v40, -inf  ;;  %v2139_v50 = vsel %vm2107_vm5, 1, %v6777_v2  ;;  %v1779_v40 = vsel %vm1747_vm10, %v4358_v45, -inf  ;;  %v4587_v45 = vld [vmem:[%s6613_s2 + $0x38] sm:$0xff]  ;;  %vm2111_vm4 = vcmp.eq.s32.totalorder %v4027_v28, 5 }
 0x198   :  { %v1775_v38 = vsel %vm1743_vm14, %v4587_v45, -inf  ;;  %vm1748_vm5 = vcmp.eq.s32.totalorder %v4492_v43, 1  ;;  %v4654_v43 = vld [vmem:[%s6613_s2 + $0x60] sm:$0xff]  ;;  %vm2113_vm14 = vcmp.eq.s32.totalorder %v4086_v21, 5 }
 0x19c   :  { %1983 = vperm.xlu1 %2950, %v1898_v33   ;;  %1986 = vperm.xlu2 %2951, %v1899_v47   ;;  %v2136_v33 = vsel %vm2104_vm15, 1, %v6777_v2  ;;  %v2137_v47 = vsel %vm2105_vm0, 1, %v6777_v2  ;;  %vm1746_vm15 = vcmp.eq.s32.totalorder %v4474_v29, 1  ;;  %vm1745_vm0 = vcmp.eq.s32.totalorder %v4480_v36, 1 }
 0x19d   :  { %1980 = vperm.xlu0 %2949, %v1897_v0   ;;  %v1903_v0 = vsel %vm1871_vm1, 1, %v6777_v2  ;;  %vm1739_vm1 = vcmp.eq.s32.totalorder %v4456_v42, 1 }
 0x19e   :  { %v4498_v18 = vpop.permute.xlu1 %1689  ;;  %v4500_v7 = vpop.permute.xlu2 %1719 }
 0x19f   :  { %v4504_v17 = vpop.permute.xlu0 %1686 }
 0x1a0   :  { %vm1751_vm10 = vcmp.eq.s32.totalorder %v4504_v17, 1 }
 0x1a4   :  { %1992 = vperm.xlu1 %2950, %v1901_v54   ;;  %1995 = vperm.xlu2 %2951, %v1902_v44   ;;  %v4528_v54 = vld [vmem:[%s6613_s2 + $0x10] sm:$0xff] }
 0x1a5   :  { %1989 = vperm.xlu0 %2949, %v1900_v62   ;;  %v1770_v44 = vsel %vm1738_vm2, %v4528_v54, -inf  ;;  %vm1749_vm2 = vcmp.eq.s32.totalorder %v4486_v60, 1  ;;  %v2143_v60 = vsel %vm2111_vm4, 1, %v6777_v2 }
 0x1a6   :  { %v4510_v20 = vpop.permute.xlu1 %1698  ;;  %v4512_v31 = vpop.permute.xlu2 %1728 }
 0x1a7   :  { %v4516_v34 = vpop.permute.xlu0 %1695  ;;  %vm1755_vm11 = vcmp.eq.s32.totalorder %v4510_v20, 1 }
 0x1ac   :  { %2169 = vperm.xlu1 %2950, %v2136_v33   ;;  %2172 = vperm.xlu2 %2951, %v2137_v47   ;;  %v6853_v33 = vld [vmem:[#allocation12_spill] sm:$0xff]  ;;  %v2140_v47 = vsel %vm2108_vm6, 1, %v6777_v2  ;;  %vm2109_vm6 = vcmp.eq.s32.totalorder %v6826_v49, 5  ;;  %v1780_v49 = vsel %vm1748_vm5, %v4654_v43, -inf }
 0x1ad   :  { %1998 = vperm.xlu0 %2949, %v1903_v0   ;;  %vm2106_vm9 = vcmp.eq.s32.totalorder %v6853_v33, 5  ;;  %v6855_v0 = vld [vmem:[#allocation37_spill] sm:$0xff] }
 0x1ae   :  { %v4531_v62 = vpop.permute.xlu1 %1707  ;;  %v4533_v6 = vpop.permute.xlu2 %1905  ;;  %v1772_v33 = vsel %vm1740_vm8, %v6855_v0, -inf  ;;  %v2138_v23 = vsel %vm2106_vm9, 1, %v6777_v2  ;;  %v1774_v0 = vsel %vm1742_vm12, %v4573_v58, -inf  ;;  %vm1756_vm8 = vcmp.eq.s32.totalorder %v4476_v27, 1 }
 0x1af   :  { %6850 = vst [vmem:[#allocation21_spill] sm:$0xff] %v4533_v6  ;;  %v4545_v8 = vpop.permute.xlu0 %1704  ;;  %v1801_v6 = vmax.f32 %v1769_v19, %v1773_v3  ;;  %v1800_v3 = vmax.f32 %v1768_v1, %v1772_v33  ;;  %v4596_v19 = vld [vmem:[%s6613_s2 + $0x70] sm:$0xff]  ;;  %v4622_v33 = vld [vmem:[%s6613_s2 + $0x18] sm:$0xff]  ;;  %v1802_v1 = vmax.f32 %v1770_v44, %v1774_v0  ;;  %vm1752_vm9 = vcmp.eq.s32.totalorder %v4498_v18, 1  ;;  %v4661_v18 = vld [vmem:[%s6613_s2 + $0x88] sm:$0xff] }
 0x1b0   :  { %6856 = vst [vmem:[#allocation9_spill] sm:$0xff] %v4596_v19  ;;  %v4601_v30 = vsel %vm1750_vm13, %v4596_v19, -inf  ;;  %v1771_v29 = vsel %vm1739_vm1, %v4622_v33, -inf  ;;  %v2141_v27 = vsel %vm2109_vm6, 1, %v6777_v2  ;;  %vm1754_vm12 = vcmp.eq.s32.totalorder %v4516_v34, 1  ;;  %v4717_v34 = vld [vmem:[%s6613_s2 + $0xb0] sm:$0xff] }
 0x1b1   :  { %v1803_v36 = vmax.f32 %v1771_v29, %v1775_v38  ;;  %v2142_v38 = vsel %vm2110_vm3, 1, %v6777_v2  ;;  %v1804_v13 = vmax.f32 %v1800_v3, %v1776_v56  ;;  %v4671_v29 = vld [vmem:[%s6613_s2 + $0x80] sm:$0xff]  ;;  %v4677_v3 = vld [vmem:[%s6613_s2 + $0x78] sm:$0xff]  ;;  %vm1759_vm13 = vcmp.eq.s32.totalorder %v4488_v32, 1  ;;  %6858 = vst [vmem:[#allocation16_spill] sm:$0xff] %v4717_v34 }
 0x1b2   :  { %v1784_v56 = vsel %vm1752_vm9, %v4671_v29, -inf  ;;  %vm1757_vm1 = vcmp.eq.s32.totalorder %v4545_v8, 1  ;;  %vm1762_vm6 = vcmp.eq.s32.totalorder %v4500_v7, 1  ;;  %v4743_v8 = vld [vmem:[%s6613_s2 + $0xc8] sm:$0xff]  ;;  %vm2116_vm9 = vcmp.eq.s32.totalorder %v4135_v55, 5 }
 0x1b3   :  { %v4787_v7 = vld [vmem:[%s6613_s2 + $0xe8] sm:$0xff] }
 0x1b4   :  { %2178 = vperm.xlu1 %2950, %v2139_v50   ;;  %2181 = vperm.xlu2 %2951, %v2140_v47   ;;  %v1778_v50 = vsel %vm1746_vm15, %v4606_v48, -inf  ;;  %v4614_v47 = vld [vmem:[%s6613_s2 + $0x48] sm:$0xff]  ;;  %vm2114_vm15 = vcmp.eq.s32.totalorder %v4066_v39, 5 }
 0x1b5   :  { %v1777_v10 = vsel %vm1745_vm0, %v4614_v47, -inf  ;;  %2175 = vperm.xlu0 %2949, %v2138_v23   ;;  %v4636_v23 = vld [vmem:[%s6613_s2 + $0x68] sm:$0xff]  ;;  %v1806_v25 = vmax.f32 %v1802_v1, %v1778_v50  ;;  %v4665_v50 = vsel %vm1756_vm8, %v4415_v41, -inf  ;;  %v1783_v1 = vsel %vm1751_vm10, %v4677_v3, -inf }
 0x1b6   :  { %v4627_v19 = vpop.permute.xlu1 %1716  ;;  %v4629_v48 = vpop.permute.xlu2 %1914  ;;  %v1781_v42 = vsel %vm1749_vm2, %v4636_v23, -inf  ;;  %v1805_v28 = vmax.f32 %v1801_v6, %v1777_v10  ;;  %v1785_v6 = vsel %vm1753_vm7, %v4661_v18, -inf  ;;  %v1807_v10 = vmax.f32 %v1803_v36, %v1779_v40  ;;  %v4690_v36 = vld [vmem:[%s6613_s2 + $0x98] sm:$0xff] }
 0x1b7   :  { %v4642_v44 = vpop.permute.xlu0 %1713  ;;  %v1810_v20 = vmax.f32 %v1806_v25, %v4601_v30  ;;  %v1808_v40 = vmax.f32 %v1804_v13, %v1780_v49  ;;  %v1787_v17 = vsel %vm1755_vm11, %v4690_v36, -inf  ;;  %vm1758_vm0 = vcmp.eq.s32.totalorder %v4531_v62, 1  ;;  %v4735_v62 = vld [vmem:[%s6613_s2 + $0xb8] sm:$0xff] }
 0x1b8   :  { %v1809_v0 = vmax.f32 %v1805_v28, %v1781_v42  ;;  %vm2112_vm2 = vcmp.eq.s32.totalorder %v4033_v59, 5  ;;  %vm1761_vm3 = vcmp.eq.s32.totalorder %v4627_v19, 1  ;;  %vm1760_vm4 = vcmp.eq.s32.totalorder %v4642_v44, 1  ;;  %v4761_v19 = vld [vmem:[%s6613_s2 + $0xd8] sm:$0xff]  ;;  %v4768_v44 = vld [vmem:[%s6613_s2 + $0xd0] sm:$0xff] }
 0x1b9   :  { %v1812_v28 = vmax.f32 %v1808_v40, %v1784_v56  ;;  %v1790_v59 = vsel %vm1758_vm0, %v4717_v34, -inf  ;;  %v2144_v56 = vsel %vm2112_vm2, 1, %v6777_v2  ;;  %v4751_v40 = vld [vmem:[%s6613_s2 + $0xc0] sm:$0xff]  ;;  %vm1765_vm8 = vcmp.eq.s32.totalorder %v4512_v31, 1  ;;  %v4802_v31 = vld [vmem:[%s6613_s2 + $0xf0] sm:$0xff] }
 0x1ba   :  { %v1813_v30 = vmax.f32 %v1809_v0, %v1785_v6  ;;  %v2145_v0 = vsel %vm2113_vm14, 1, %v6777_v2  ;;  %vm2117_vm10 = vcmp.eq.s32.totalorder %v6831_v52, 5  ;;  %vm2120_vm0 = vcmp.eq.s32.totalorder %v6834_v61, 5 }
 0x1bb   :  { %v1816_v32 = vmax.f32 %v1812_v28, %v4665_v50  ;;  %v1794_v50 = vsel %vm1762_vm6, %v4768_v44, -inf  ;;  %vm2118_vm2 = vcmp.eq.s32.totalorder %v4126_v26, 5  ;;  %vm2125_vm6 = vcmp.eq.s32.totalorder %v6836_v63, 5 }
 0x1bc   :  { %2187 = vperm.xlu1 %2950, %v2142_v38   ;;  %2190 = vperm.xlu2 %2951, %v2143_v60   ;;  %v1811_v38 = vmax.f32 %v1807_v10, %v1783_v1  ;;  %v4700_v60 = vld [vmem:[%s6613_s2 + $0x90] sm:$0xff]  ;;  %v4725_v10 = vld [vmem:[%s6613_s2 + $0xa8] sm:$0xff]  ;;  %v1791_v1 = vsel %vm1759_vm13, %v4735_v62, -inf }
 0x1bd   :  { %2184 = vperm.xlu0 %2949, %v2141_v27   ;;  %v1786_v49 = vsel %vm1754_vm12, %v4700_v60, -inf  ;;  %v2146_v27 = vsel %vm2114_vm15, 1, %v6777_v2  ;;  %v1789_v39 = vsel %vm1757_vm1, %v4725_v10, -inf  ;;  %vm2115_vm12 = vcmp.eq.s32.totalorder %v4077_v53, 5 }
 0x1be   :  { %v1726_v42 = vpop.permute.xlu1 %1725  ;;  %v4695_v25 = vpop.permute.xlu2 %1923  ;;  %v1815_v6 = vmax.f32 %v1811_v38, %v1787_v17  ;;  %v1814_v21 = vmax.f32 %v1810_v20, %v1786_v49  ;;  %v1793_v20 = vsel %vm1761_vm3, %v4743_v8, -inf  ;;  %v1792_v17 = vsel %vm1760_vm4, %v4751_v40, -inf }
 0x1bf   :  { %v1723_v13 = vpop.permute.xlu0 %1722  ;;  %vm1764_vm7 = vcmp.eq.s32.totalorder %v1726_v42, 1  ;;  %v1817_v49 = vmax.f32 %v1813_v30, %v1789_v39  ;;  %v4776_v30 = vld [vmem:[%s6613_s2 + $0xe0] sm:$0xff]  ;;  %v1797_v42 = vsel %vm1765_vm8, %v4787_v7, -inf  ;;  %v2148_v53 = vsel %vm2116_vm9, 1, %v6777_v2 }
 0x1c0   :  { %vm1763_vm5 = vcmp.eq.s32.totalorder %v1723_v13, 1  ;;  %v1818_v38 = vmax.f32 %v1814_v21, %v1790_v59  ;;  %v1796_v28 = vsel %vm1764_vm7, %v4776_v30, -inf  ;;  %v1819_v13 = vmax.f32 %v1815_v6, %v1791_v1  ;;  %v4796_v1 = vld [vmem:[%s6613_s2 + $0xf8] sm:$0xff] }
 0x1c1   :  { %v1795_v34 = vsel %vm1763_vm5, %v4761_v19, -inf  ;;  %vm2006_vm14 = vcmp.eq.s32.totalorder %v4695_v25, 1  ;;  %vm2119_vm15 = vcmp.eq.s32.totalorder %v6830_v35, 5  ;;  %v2152_v35 = vsel %vm2120_vm0, 1, %v6777_v2 }
 0x1c2   :  { %v1823_v6 = vmax.f32 %v1819_v13, %v1795_v34  ;;  %v4821_v52 = vsel %vm2006_vm14, %v4573_v58, -inf  ;;  %vm2122_vm3 = vcmp.eq.s32.totalorder %v6833_v4, 5  ;;  %vm2123_vm4 = vcmp.eq.s32.totalorder %v6837_v15, 5 }
 0x1c3   :  { %vm2121_vm5 = vcmp.eq.s32.totalorder %v6832_v5, 5  ;;  %vm2126_vm7 = vcmp.eq.s32.totalorder %v6840_v14, 5  ;;  %vm2124_vm8 = vcmp.eq.s32.totalorder %v6835_v51, 5  ;;  %vm2128_vm9 = vcmp.eq.s32.totalorder %v6839_v9, 5 }
 0x1c4   :  { %2196 = vperm.xlu1 %2950, %v2145_v0   ;;  %2199 = vperm.xlu2 %2951, %v2146_v27   ;;  %v1821_v0 = vmax.f32 %v1817_v49, %v1793_v20  ;;  %v1820_v27 = vmax.f32 %v1816_v32, %v1792_v17  ;;  %v1822_v17 = vmax.f32 %v1818_v38, %v1794_v50  ;;  %v2149_v49 = vsel %vm2117_vm10, 1, %v6777_v2 }
 0x1c5   :  { %2193 = vperm.xlu0 %2949, %v2144_v56   ;;  %v2147_v38 = vsel %vm2115_vm12, 1, %v6777_v2  ;;  %vm2129_vm10 = vcmp.eq.s32.totalorder %v6843_v16, 5  ;;  %v2160_v51 = vsel %vm2128_vm9, 1, %v6777_v2  ;;  %vm2131_vm12 = vcmp.eq.s32.totalorder %v6842_v24, 5 }
 0x1c6   :  { %v1735_v59 = vpop.permute.xlu1 %1734  ;;  %v4780_v39 = vpop.permute.xlu2 %1932  ;;  %v1824_v56 = vmax.f32 %v1820_v27, %v1796_v28  ;;  %v1825_v28 = vmax.f32 %v1821_v0, %v1797_v42  ;;  %v2161_v14 = vsel %vm2129_vm10, 1, %v6777_v2  ;;  %vm2130_vm14 = vcmp.eq.s32.totalorder %v6841_v57, 5  ;;  %v6859_v57 = vld [vmem:[#allocation32_spill] sm:$0xff] }
 0x1c7   :  { %vm1767_vm11 = vcmp.eq.s32.totalorder %v1735_v59, 1  ;;  %v1732_v21 = vpop.permute.xlu0 %1731  ;;  %vm2135_vm0 = vcmp.eq.s32.totalorder %v6849_v12, 5  ;;  %v4899_v12 = vld [vmem:[%s6612_s1 + $0x10] sm:$0xff]  ;;  %vm2003_vm10 = vcmp.eq.s32.totalorder %v4629_v48, 1 }
 0x1c8   :  { %v1799_v20 = vsel %vm1767_vm11, %v4796_v1, -inf  ;;  %vm1766_vm13 = vcmp.eq.s32.totalorder %v1732_v21, 1  ;;  %v1828_v50 = vmax.f32 %v1824_v56, %v1825_v28  ;;  %v2151_v56 = vsel %vm2119_vm15, 1, %v6777_v2  ;;  %v1837_v28 = vld [vmem:[#allocation2 + $0x3] sm:$0x1] }
 0x1c9   :  { %v1827_v32 = vmax.f32 %v1823_v6, %v1799_v20  ;;  %v1798_v34 = vsel %vm1766_vm13, %v4802_v31, -inf  ;;  %v2150_v20 = vsel %vm2118_vm2, 1, %v6777_v2  ;;  %vm2127_vm11 = vcmp.eq.s32.totalorder %v6838_v46, 5 }
 0x1ca   :  { %v1826_v13 = vmax.f32 %v1822_v17, %v1798_v34  ;;  %vm2132_vm13 = vcmp.eq.s32.totalorder %v6846_v37, 5  ;;  %v2163_v46 = vsel %vm2131_vm12, 1, %v6777_v2  ;;  %vm2134_vm15 = vcmp.eq.s32.totalorder %v6845_v11, 5  ;;  %v6860_v11 = vld [vmem:[#allocation36_spill] sm:$0xff] }
 0x1cb   :  { %v2164_v16 = vsel %vm2132_vm13, 1, %v6777_v2  ;;  %v2166_v37 = vsel %vm2134_vm15, 1, %v6777_v2  ;;  %vm2369_vm2 = vcmp.eq.s32.totalorder %v6860_v11, 6  ;;  %v6865_v11 = vld [vmem:[#allocation14_spill] sm:$0xff] }
 0x1cc   :  { %v1829_v27 = vmax.f32 %v1826_v13, %v1827_v32  ;;  %2205 = vperm.xlu1 %2950, %v2148_v53   ;;  %2208 = vperm.xlu2 %2951, %v2149_v49   ;;  %v2154_v13 = vsel %vm2122_vm3, 1, %v6777_v2  ;;  %vm2370_vm3 = vcmp.eq.s32.totalorder %v4899_v12, 6 }
 0x1cd   :  { %2202 = vperm.xlu0 %2949, %v2147_v38   ;;  %v2155_v38 = vsel %vm2123_vm4, 1, %v6777_v2 }
 0x1ce   :  { %v1830_v59 = vmax.f32 %v1828_v50, %v1829_v27  ;;  %v1912_v6 = vpop.permute.xlu1 %1911  ;;  %v4813_v21 = vpop.permute.xlu2 %1941  ;;  %v2153_v27 = vsel %vm2121_vm5, 1, %v6777_v2 }
 0x1cf   :  { %vm2002_vm1 = vcmp.eq.s32.totalorder %v1912_v6, 1  ;;  %v4817_v55 = vpop.permute.xlu0 %1908  ;;  %v2157_v6 = vsel %vm2125_vm6, 1, %v6777_v2 }
 0x1d0   :  { %v1831_v0 = vrot.slane %v1830_v59, 4  ;;  %v4824_v25 = vsel %vm2002_vm1, %v4528_v54, -inf  ;;  %vm2133_vm1 = vcmp.eq.s32.totalorder %v6859_v57, 5  ;;  %v6863_v57 = vld [vmem:[#allocation37_spill] sm:$0xff] }
 0x1d2   :  { %v1832_v61 = vmax.f32 %v1830_v59, %v1831_v0  ;;  %v2158_v0 = vsel %vm2126_vm7, 1, %v6777_v2 }
 0x1d4   :  { %v1833_v17 = vrot.slane %v1832_v61, 2  ;;  %2214 = vperm.xlu1 %2950, %v2151_v56   ;;  %2217 = vperm.xlu2 %2951, %v2152_v35   ;;  %v2156_v56 = vsel %vm2124_vm8, 1, %v6777_v2  ;;  %vm2001_vm8 = vcmp.eq.s32.totalorder %v4817_v55, 1 }
 0x1d5   :  { %2211 = vperm.xlu0 %2949, %v2150_v20   ;;  %v2159_v20 = vsel %vm2127_vm11, 1, %v6777_v2  ;;  %vm2009_vm11 = vcmp.eq.s32.totalorder %v4780_v39, 1 }
 0x1d6   :  { %v1834_v26 = vmax.f32 %v1832_v61, %v1833_v17  ;;  %v4831_v32 = vpop.permute.xlu1 %1920  ;;  %v4833_v34 = vpop.permute.xlu2 %1950 }
 0x1d7   :  { %v4837_v53 = vpop.permute.xlu0 %1917  ;;  %vm2005_vm6 = vcmp.eq.s32.totalorder %v4831_v32, 1 }
 0x1d8   :  { %v1835_v49 = vrot.slane %v1834_v26, 1  ;;  %vm2004_vm7 = vcmp.eq.s32.totalorder %v4837_v53, 1 }
 0x1da   :  { %v1836_v50 = vmax.f32 %v1834_v26, %v1835_v49  ;;  %v2162_v49 = vsel %vm2130_vm14, 1, %v6777_v2 }
 0x1dc   :  { %v1838_v59 = vmax.f32 %v1837_v28, %v1836_v50  ;;  %2223 = vperm.xlu1 %2950, %v2154_v13   ;;  %2226 = vperm.xlu2 %2951, %v2155_v38   ;;  %v2167_v38 = vsel %vm2135_vm0, 1, %v6777_v2  ;;  %v2165_v50 = vsel %vm2133_vm1, 1, %v6777_v2  ;;  %vm2012_vm0 = vcmp.eq.s32.totalorder %v4813_v21, 1 }
 0x1dd   :  { %2220 = vperm.xlu0 %2949, %v2153_v27   ;;  %vm2015_vm1 = vcmp.eq.s32.totalorder %v4833_v34, 1  ;;  %v2041_v34 = vsel %vm2009_vm11, %v4614_v47, -inf  ;;  %v2044_v48 = vsel %vm2012_vm0, %v4654_v43, -inf }
 0x1de   :  { %1839 = vst [vmem:[#allocation2 + $0x3] sm:$0x1] %v1838_v59  ;;  %v4843_v4 = vpop.permute.xlu1 %1929  ;;  %v4845_v15 = vpop.permute.xlu2 %1959 }
 0x1df   :  { %v4849_v5 = vpop.permute.xlu0 %1926  ;;  %vm2008_vm9 = vcmp.eq.s32.totalorder %v4843_v4, 1  ;;  %v2035_v4 = vsel %vm2003_vm10, %v4622_v33, -inf }
 0x1e0   :  { %vm2007_vm14 = vcmp.eq.s32.totalorder %v4849_v5, 1 }
 0x1e4   :  { %2232 = vperm.xlu1 %2950, %v2157_v6   ;;  %2235 = vperm.xlu2 %2951, %v2158_v0   ;;  %v4907_v0 = vld [vmem:[%s6612_s1] sm:$0xff] }
 0x1e5   :  { %2229 = vperm.xlu0 %2949, %v2156_v56   ;;  %vm2368_vm4 = vcmp.eq.s32.totalorder %v4907_v0, 6  ;;  %v2401_v56 = vsel %vm2369_vm2, 1, %v6777_v2 }
 0x1e6   :  { %v4855_v35 = vpop.permute.xlu1 %1938  ;;  %v4857_v61 = vpop.permute.xlu2 %1968 }
 0x1e7   :  { %v4861_v63 = vpop.permute.xlu0 %1935 }
 0x1ec   :  { %2241 = vperm.xlu1 %2950, %v2160_v51   ;;  %2244 = vperm.xlu2 %2951, %v2161_v14   ;;  %v2402_v51 = vsel %vm2370_vm3, 1, %v6777_v2  ;;  %v6861_v14 = vld [vmem:[#allocation21_spill] sm:$0xff]  ;;  %vm2011_vm3 = vcmp.eq.s32.totalorder %v4855_v35, 1 }
 0x1ed   :  { %2238 = vperm.xlu0 %2949, %v2159_v20   ;;  %vm2000_vm5 = vcmp.eq.s32.totalorder %v6861_v14, 1  ;;  %v2400_v20 = vsel %vm2368_vm4, 1, %v6777_v2 }
 0x1ee   :  { %v4867_v17 = vpop.permute.xlu1 %1947  ;;  %v4869_v26 = vpop.permute.xlu2 %1977 }
 0x1ef   :  { %v4873_v9 = vpop.permute.xlu0 %1944  ;;  %vm2014_vm11 = vcmp.eq.s32.totalorder %v4867_v17, 1 }
 0x1f0   :  { %vm2013_vm2 = vcmp.eq.s32.totalorder %v4873_v9, 1 }
 0x1f1   :  { %v2045_v9 = vsel %vm2013_vm2, %v4636_v23, -inf }
 0x1f4   :  { %2250 = vperm.xlu1 %2950, %v2163_v46   ;;  %2253 = vperm.xlu2 %2951, %v2164_v16   ;;  %v2032_v46 = vsel %vm2000_vm5, %v4579_v22, -inf  ;;  %v6862_v16 = vld [vmem:[#allocation23_spill] sm:$0xff]  ;;  %vm2018_vm5 = vcmp.eq.s32.totalorder %v4845_v15, 1 }
 0x1f5   :  { %2247 = vperm.xlu0 %2949, %v2162_v49   ;;  %v2037_v49 = vsel %vm2005_vm6, %v6862_v16, -inf  ;;  %v4951_v16 = vld [vmem:[%s6612_s1 + $0x18] sm:$0xff] }
 0x1f6   :  { %v4879_v28 = vpop.permute.xlu1 %1956  ;;  %v4881_v13 = vpop.permute.xlu2 %1986  ;;  %vm2371_vm15 = vcmp.eq.s32.totalorder %v4951_v16, 6 }
 0x1f7   :  { %v4885_v24 = vpop.permute.xlu0 %1953  ;;  %v2403_v21 = vsel %vm2371_vm15, 1, %v6777_v2  ;;  %vm2017_vm4 = vcmp.eq.s32.totalorder %v4879_v28, 1  ;;  %vm2024_vm15 = vcmp.eq.s32.totalorder %v4869_v26, 1 }
 0x1f8   :  { %vm2016_vm6 = vcmp.eq.s32.totalorder %v4885_v24, 1  ;;  %v2049_v28 = vsel %vm2017_vm4, %v4661_v18, -inf }
 0x1f9   :  { %v2048_v18 = vsel %vm2016_vm6, %v4671_v29, -inf }
 0x1fc   :  { %2259 = vperm.xlu1 %2950, %v2166_v37   ;;  %2262 = vperm.xlu2 %2951, %v2167_v38   ;;  %v2036_v37 = vsel %vm2004_vm7, %v6863_v57, -inf  ;;  %v4930_v38 = vld [vmem:[%s6612_s1 + $0x20] sm:$0xff]  ;;  %vm2010_vm7 = vcmp.eq.s32.totalorder %v4861_v63, 1 }
 0x1fd   :  { %2256 = vperm.xlu0 %2949, %v2165_v50   ;;  %6864 = vst [vmem:[#allocation10_spill] sm:$0xff] %v4930_v38  ;;  %vm2372_vm12 = vcmp.eq.s32.totalorder %v4930_v38, 6  ;;  %v4936_v50 = vld [vmem:[%s6612_s1 + $0x28] sm:$0xff]  ;;  %v2064_v55 = vmax.f32 %v2032_v46, %v2036_v37  ;;  %v2039_v38 = vsel %vm2007_vm14, %v4587_v45, -inf  ;;  %v4970_v46 = vsel %vm2015_vm1, %v4677_v3, -inf  ;;  %v6867_v37 = vld [vmem:[#allocation22_spill] sm:$0xff] }
 0x1fe   :  { %v4891_v27 = vpop.permute.xlu1 %1965  ;;  %v4893_v59 = vpop.permute.xlu2 %1995  ;;  %vm2373_vm13 = vcmp.eq.s32.totalorder %v4936_v50, 6  ;;  %v2404_v5 = vsel %vm2372_vm12, 1, %v6777_v2  ;;  %v2067_v35 = vmax.f32 %v2035_v4, %v2039_v38  ;;  %v2043_v39 = vsel %vm2011_vm3, %v6867_v37, -inf }
 0x1ff   :  { %v4902_v6 = vpop.permute.xlu0 %1962  ;;  %v2050_v37 = vsel %vm2018_vm5, %v4700_v60, -inf  ;;  %v5035_v60 = vld [vmem:[%s6612_s1 + $0x58] sm:$0xff] }
 0x200   :  { %vm2019_vm1 = vcmp.eq.s32.totalorder %v4902_v6, 1  ;;  %vm2379_vm2 = vcmp.eq.s32.totalorder %v5035_v60, 6 }
 0x204   :  { %2436 = vperm.xlu1 %2950, %v2401_v56   ;;  %2439 = vperm.xlu2 %2951, %v2402_v51   ;;  %v2033_v56 = vsel %vm2001_vm8, %v6865_v11, -inf  ;;  %v6866_v51 = vld [vmem:[#allocation19_spill] sm:$0xff] }
 0x205   :  { %2433 = vperm.xlu0 %2949, %v2400_v20   ;;  %v2040_v14 = vsel %vm2008_vm9, %v6866_v51, -inf  ;;  %v2065_v57 = vmax.f32 %v2033_v56, %v2037_v49  ;;  %v2405_v51 = vsel %vm2373_vm13, 1, %v6777_v2  ;;  %v4981_v56 = vld [vmem:[%s6612_s1 + $0x38] sm:$0xff]  ;;  %vm2020_vm9 = vcmp.eq.s32.totalorder %v4891_v27, 1 }
 0x206   :  { %v4923_v32 = vpop.permute.xlu1 %1974  ;;  %v4925_v53 = vpop.permute.xlu2 %2172  ;;  %v2068_v42 = vmax.f32 %v2064_v55, %v2040_v14  ;;  %vm2375_vm8 = vcmp.eq.s32.totalorder %v4981_v56, 6  ;;  %v4993_v55 = vld [vmem:[%s6612_s1 + $0x40] sm:$0xff]  ;;  %vm2021_vm13 = vcmp.eq.s32.totalorder %v4857_v61, 1  ;;  %v6870_v27 = vmax.f32 %v4824_v25, %v4821_v52 }
 0x207   :  { %v4946_v20 = vpop.permute.xlu0 %1971  ;;  %v2069_v49 = vmax.f32 %v2065_v57, %v2041_v34  ;;  %vm2376_vm10 = vcmp.eq.s32.totalorder %v4993_v55, 6  ;;  %v2407_v24 = vsel %vm2375_vm8, 1, %v6777_v2  ;;  %v2056_v52 = vsel %vm2024_vm15, %v4751_v40, -inf }
 0x208   :  { %v2072_v14 = vmax.f32 %v2068_v42, %v2044_v48  ;;  %v2052_v48 = vsel %vm2020_vm9, %v4415_v41, -inf  ;;  %vm2023_vm3 = vcmp.eq.s32.totalorder %v4923_v32, 1  ;;  %vm2022_vm4 = vcmp.eq.s32.totalorder %v4946_v20, 1 }
 0x209   :  { %v2073_v4 = vmax.f32 %v2069_v49, %v2045_v9  ;;  %v2408_v9 = vsel %vm2376_vm10, 1, %v6777_v2  ;;  %v6869_v49 = vld [vmem:[#allocation9_spill] sm:$0xff]  ;;  %v2051_v40 = vsel %vm2019_vm1, %v4690_v36, -inf  ;;  %vm2027_vm9 = vcmp.eq.s32.totalorder %v4881_v13, 1 }
 0x20a   :  { %v2076_v61 = vmax.f32 %v2072_v14, %v2048_v18  ;;  %vm2030_vm10 = vcmp.eq.s32.totalorder %v4893_v59, 1  ;;  %vm2265_vm1 = vcmp.eq.s32.totalorder %v4925_v53, 1 }
 0x20b   :  { %v2077_v34 = vmax.f32 %v2073_v4, %v2049_v28  ;;  %v3024_v28 = vld [vmem:[%s6612_s1 + $0x50] sm:$0xff] }
 0x20c   :  { %2445 = vperm.xlu1 %2950, %v2404_v5   ;;  %2448 = vperm.xlu2 %2951, %v2405_v51   ;;  %v5003_v5 = vld [vmem:[%s6612_s1 + $0x30] sm:$0xff]  ;;  %v2071_v51 = vmax.f32 %v2067_v35, %v2043_v39  ;;  %v2046_v35 = vsel %vm2014_vm11, %v6869_v49, -inf  ;;  %v2053_v39 = vsel %vm2021_vm13, %v4725_v10, -inf  ;;  %vm2378_vm0 = vcmp.eq.s32.totalorder %v3024_v28, 6  ;;  %v5087_v28 = vld [vmem:[%s6612_s1 + $0x60] sm:$0xff] }
 0x20d   :  { %2442 = vperm.xlu0 %2949, %v2403_v21   ;;  %vm2374_vm12 = vcmp.eq.s32.totalorder %v5003_v5, 6  ;;  %v6868_v21 = vld [vmem:[#allocation24_spill] sm:$0xff]  ;;  %v2080_v4 = vmax.f32 %v2076_v61, %v2052_v48  ;;  %v2081_v15 = vmax.f32 %v2077_v34, %v2053_v39  ;;  %v2055_v48 = vsel %vm2023_vm3, %v4735_v62, -inf }
 0x20e   :  { %v4986_v57 = vpop.permute.xlu1 %1983  ;;  %v4988_v38 = vpop.permute.xlu2 %2181  ;;  %v2042_v17 = vsel %vm2010_vm7, %v6868_v21, -inf  ;;  %v2406_v63 = vsel %vm2374_vm12, 1, %v6777_v2  ;;  %v2075_v25 = vmax.f32 %v2071_v51, %v4970_v46  ;;  %v2411_v51 = vsel %vm2379_vm2, 1, %v6777_v2 }
 0x20f   :  { %v1981_v42 = vpop.permute.xlu0 %1980  ;;  %v2070_v41 = vmax.f32 %v6870_v27, %v2042_v17  ;;  %v5051_v17 = vld [vmem:[%s6612_s1 + $0x48] sm:$0xff]  ;;  %vm2026_vm7 = vcmp.eq.s32.totalorder %v4986_v57, 1  ;;  %v2084_v34 = vmax.f32 %v2080_v4, %v2056_v52  ;;  %vm2268_vm12 = vcmp.eq.s32.totalorder %v4988_v38, 1  ;;  %v5100_v52 = vld [vmem:[%s6613_s2 + $0x20] sm:$0xff] }
 0x210   :  { %vm2025_vm14 = vcmp.eq.s32.totalorder %v1981_v42, 1  ;;  %v2410_v42 = vsel %vm2378_vm0, 1, %v6777_v2  ;;  %vm2377_vm5 = vcmp.eq.s32.totalorder %v5051_v17, 6  ;;  %v2079_v61 = vmax.f32 %v2075_v25, %v2051_v40 }
 0x211   :  { %v2057_v14 = vsel %vm2025_vm14, %v4743_v8, -inf  ;;  %v2074_v10 = vmax.f32 %v2070_v41, %v2046_v35  ;;  %v2058_v62 = vsel %vm2026_vm7, %v4768_v44, -inf  ;;  %v3028_v44 = vld [vmem:[%s6612_s1 + $0x70] sm:$0xff]  ;;  %vm2380_vm14 = vcmp.eq.s32.totalorder %v5087_v28, 6 }
 0x212   :  { %v2085_v26 = vmax.f32 %v2081_v15, %v2057_v14  ;;  %v2083_v32 = vmax.f32 %v2079_v61, %v2055_v48  ;;  %vm2382_vm13 = vcmp.eq.s32.totalorder %v3028_v44, 6  ;;  %v2059_v38 = vsel %vm2027_vm9, %v4761_v19, -inf }
 0x213   :  { %v2062_v4 = vsel %vm2030_vm10, %v4802_v31, -inf  ;;  %v5103_v25 = vsel %vm2268_vm12, %v5100_v52, -inf  ;;  %v5132_v48 = vand.u32 4294901760, %v6869_v49 }
 0x214   :  { %2454 = vperm.xlu1 %2950, %v2407_v24   ;;  %2457 = vperm.xlu2 %2951, %v2408_v9   ;;  %v6871_v9 = vld [vmem:[#allocation16_spill] sm:$0xff]  ;;  %v2087_v19 = vmax.f32 %v2083_v32, %v2059_v38 }
 0x215   :  { %2451 = vperm.xlu0 %2949, %v2406_v63   ;;  %v2054_v36 = vsel %vm2022_vm4, %v6871_v9, -inf  ;;  %v2078_v63 = vmax.f32 %v2074_v10, %v2050_v37 }
 0x216   :  { %v1993_v8 = vpop.permute.xlu1 %1992  ;;  %v5044_v18 = vpop.permute.xlu2 %2190 }
 0x217   :  { %vm2029_vm6 = vcmp.eq.s32.totalorder %v1993_v8, 1  ;;  %v1990_v46 = vpop.permute.xlu0 %1989  ;;  %v2082_v57 = vmax.f32 %v2078_v63, %v2054_v36  ;;  %v2414_v8 = vsel %vm2382_vm13, 1, %v6777_v2 }
 0x218   :  { %v2061_v24 = vsel %vm2029_vm6, %v4787_v7, -inf  ;;  %vm2028_vm8 = vcmp.eq.s32.totalorder %v1990_v46, 1  ;;  %v2409_v7 = vsel %vm2377_vm5, 1, %v6777_v2  ;;  %v5115_v46 = vand.u32 4294901760, %v4677_v3 }
 0x219   :  { %v2089_v6 = vmax.f32 %v2085_v26, %v2061_v24  ;;  %v2060_v35 = vsel %vm2028_vm8, %v4776_v30, -inf  ;;  %v3027_v30 = vld [vmem:[%s6612_s1 + $0x68] sm:$0xff]  ;;  %v2086_v37 = vmax.f32 %v2082_v57, %v2058_v62  ;;  %v5161_v62 = vsub.f32 %v6869_v49, %v5132_v48  ;;  %v3035_v57 = vld [vmem:[%s6612_s1 + $0xa0] sm:$0xff] }
 0x21a   :  { %v2088_v39 = vmax.f32 %v2084_v34, %v2060_v35  ;;  %vm2381_vm11 = vcmp.eq.s32.totalorder %v3027_v30, 6  ;;  %v3032_v24 = vld [vmem:[%s6612_s1 + $0x88] sm:$0xff]  ;;  %v5125_v53 = vsub.f32 %v4677_v3, %v5115_v46  ;;  %v5128_v34 = vsel %vm2265_vm1, %v6865_v11, -inf  ;;  %101 = vmatpush.msra.mxu0 %v5115_v46  ;;  %v5141_v35 = vld [vmem:[%s6612_s1 + $0x78] sm:$0xff]  ;;  %297 = vmatpush.msra.mxu3 %v5115_v46  ;;  %v3037_v30 = vld [vmem:[%s6612_s1 + $0xb0] sm:$0xff] }
 0x21b   :  { %v2413_v10 = vsel %vm2381_vm11, 1, %v6777_v2  ;;  %v2090_v40 = vmax.f32 %v2086_v37, %v2062_v4  ;;  %vm2385_vm3 = vcmp.eq.s32.totalorder %v3032_v24, 6  ;;  %6872 = vst [vmem:[#allocation18_spill] sm:$0xff] %v5141_v35  ;;  %vm2383_vm4 = vcmp.eq.s32.totalorder %v5141_v35, 6 }
 0x21c   :  { %v2092_v20 = vmax.f32 %v2088_v39, %v2089_v6  ;;  %2463 = vperm.xlu1 %2950, %v2410_v42   ;;  %2466 = vperm.xlu2 %2951, %v2411_v51   ;;  %v2412_v42 = vsel %vm2380_vm14, 1, %v6777_v2  ;;  %v3031_v51 = vld [vmem:[%s6612_s1 + $0x80] sm:$0xff]  ;;  %v6700_v3 = vand.u32 4294901760, %v5125_v53  ;;  %v5148_v11 = vand.u32 4294901760, %v4636_v23 }
 0x21d   :  { %2460 = vperm.xlu0 %2949, %v2409_v7   ;;  %vm2384_vm2 = vcmp.eq.s32.totalorder %v3031_v51, 6  ;;  %244 = vmatpush.msra.mxu2 %v5125_v53  ;;  %v2417_v39 = vsel %vm2385_vm3, 1, %v6777_v2  ;;  %v3034_v7 = vld [vmem:[%s6612_s1 + $0x98] sm:$0xff]  ;;  %vm2271_vm6 = vcmp.eq.s32.totalorder %v5044_v18, 1  ;;  %vm2388_vm7 = vcmp.eq.s32.totalorder %v3035_v57, 6 }
 0x21e   :  { %v2170_v27 = vpop.permute.xlu1 %2169  ;;  %v5079_v41 = vpop.permute.xlu2 %2199  ;;  %v2416_v63 = vsel %vm2384_vm2, 1, %v6777_v2  ;;  %vm2387_vm5 = vcmp.eq.s32.totalorder %v3034_v7, 6  ;;  %103 = vmatpush.msra.mxu0 %v5132_v48  ;;  %299 = vmatpush.msra.mxu3 %v5132_v48  ;;  %v2415_v49 = vsel %vm2383_vm4, 1, %v6777_v2  ;;  %vm2390_vm9 = vcmp.eq.s32.totalorder %v3037_v30, 6  ;;  %v3038_v18 = vld [vmem:[%s6612_s1 + $0xb8] sm:$0xff] }
 0x21f   :  { %vm2264_vm15 = vcmp.eq.s32.totalorder %v2170_v27, 1  ;;  %v1999_v14 = vpop.permute.xlu0 %1998  ;;  %247 = vmatpush.msra.mxu2 %v5161_v62  ;;  %v144_v37 = vsub.f32 %v5125_v53, %v6700_v3  ;;  %v5184_v27 = vsub.f32 %v4636_v23, %v5148_v11  ;;  %v5189_v38 = vsel %vm2387_vm5, 1, %v6777_v2 }
 0x220   :  { %v5106_v15 = vsel %vm2264_vm15, %v4579_v22, -inf  ;;  %vm2031_vm0 = vcmp.eq.s32.totalorder %v1999_v14, 1  ;;  %105 = vmatpush.msra.mxu0 %v5148_v11  ;;  %v6699_v4 = vand.u32 4294901760, %v5161_v62  ;;  %v5193_v14 = vand.u32 4294901760, %v4654_v43  ;;  %301 = vmatpush.msra.mxu3 %v5148_v11 }
 0x221   :  { %v2063_v59 = vsel %vm2031_vm0, %v4796_v1, -inf  ;;  %250 = vmatpush.msra.mxu2 %v5184_v27  ;;  %vm2391_vm10 = vcmp.eq.s32.totalorder %v3038_v18, 6  ;;  %v6698_v24 = vand.u32 4294901760, %v5184_v27  ;;  %vm2274_vm12 = vcmp.eq.s32.totalorder %v5079_v41, 1  ;;  %v2101_v18 = vld [vmem:[#allocation2 + $0x4] sm:$0x1] }
 0x222   :  { %v2091_v26 = vmax.f32 %v2087_v19, %v2063_v59  ;;  %v5203_v19 = vsel %vm2388_vm7, 1, %v6777_v2  ;;  %v5225_v51 = vsub.f32 %v4654_v43, %v5193_v14  ;;  %107 = vmatpush.msra.mxu0 %v5193_v14  ;;  %303 = vmatpush.msra.mxu3 %v5193_v14  ;;  %v5244_v43 = vand.u32 4294901760, %v6868_v21 }
 0x223   :  { %v156_v30 = vsub.f32 %v5184_v27, %v6698_v24  ;;  %v3042_v24 = vld [vmem:[%s6612_s1 + $0xd0] sm:$0xff]  ;;  %v5356_v35 = vand.u32 4294901760, %v4587_v45 }
 0x224   :  { %v2093_v22 = vmax.f32 %v2090_v40, %v2091_v26  ;;  %2472 = vperm.xlu1 %2950, %v2413_v10   ;;  %2475 = vperm.xlu2 %2951, %v2414_v8   ;;  %v5199_v10 = vsel %vm2271_vm6, %v4587_v45, -inf  ;;  %v145_v8 = vand.u32 4294901760, %v144_v37  ;;  %v5212_v40 = vsel %vm2390_vm9, 1, %v6777_v2  ;;  %6873 = vst [vmem:[#allocation20_spill] sm:$0xff] %v5244_v43 }
 0x225   :  { %2469 = vperm.xlu0 %2949, %v2412_v42   ;;  %v150_v26 = vsub.f32 %v5161_v62, %v6699_v4  ;;  %253 = vmatpush.msra.mxu2 %v5225_v51  ;;  %vm2394_vm14 = vcmp.eq.s32.totalorder %v3042_v24, 6  ;;  %v5277_v4 = vsel %vm2274_vm12, %v6868_v21, -inf  ;;  %v157_v3 = vand.u32 4294901760, %v156_v30  ;;  %6879 = vst [vmem:[#allocation15_spill] sm:$0xff] %v5356_v35 }
 0x226   :  { %v2094_v9 = vmax.f32 %v2092_v20, %v2093_v22  ;;  %v5134_v36 = vpop.permute.xlu1 %2178  ;;  %v5136_v6 = vpop.permute.xlu2 %2208  ;;  %v3036_v20 = vld [vmem:[%s6612_s1 + $0x90] sm:$0xff]  ;;  %v3039_v22 = vld [vmem:[%s6612_s1 + $0xa8] sm:$0xff]  ;;  %146 = vmatpush.msra.mxu1 %v145_v8  ;;  %v5289_v41 = vsub.f32 %v6868_v21, %v5244_v43  ;;  %v5294_v30 = vsel %vm2394_vm14, 1, %v6777_v2 }
 0x227   :  { %v5150_v61 = vpop.permute.xlu0 %2175  ;;  %vm2386_vm8 = vcmp.eq.s32.totalorder %v3036_v20, 6  ;;  %vm2389_vm11 = vcmp.eq.s32.totalorder %v3039_v22, 6  ;;  %v151_v57 = vand.u32 4294901760, %v150_v26  ;;  %vm2267_vm15 = vcmp.eq.s32.totalorder %v5134_v36, 1  ;;  %v3043_v22 = vld [vmem:[%s6612_s1 + $0xc0] sm:$0xff] }
 0x228   :  { %v2095_v32 = vrot.slane %v2094_v9, 4  ;;  %v5207_v59 = vsel %vm2386_vm8, 1, %v6777_v2  ;;  %v5268_v26 = vsel %vm2389_vm11, 1, %v6777_v2  ;;  %vm2392_vm0 = vcmp.eq.s32.totalorder %v3043_v22, 6 }
 0x229   :  { %152 = vmatpush.msra.mxu1 %v151_v57  ;;  %v5310_v57 = vsel %vm2267_vm15, %v4622_v33, -inf  ;;  %vm2277_vm1 = vcmp.eq.s32.totalorder %v5136_v6, 1  ;;  %vm2266_vm2 = vcmp.eq.s32.totalorder %v5150_v61, 1  ;;  %v6703_v33 = vand.u32 4294901760, %v5289_v41  ;;  %v3045_v6 = vld [vmem:[%s6612_s1 + $0xe0] sm:$0xff] }
 0x22a   :  { %v2096_v44 = vmax.f32 %v2094_v9, %v2095_v32  ;;  %v5231_v9 = vld [vmem:[%s6613_s2 + $0x58] sm:$0xff]  ;;  %v2298_v22 = vsel %vm2266_vm2, %v4528_v54, -inf  ;;  %vm2396_vm4 = vcmp.eq.s32.totalorder %v3045_v6, 6  ;;  %v3046_v54 = vld [vmem:[%s6612_s1 + $0xe8] sm:$0xff]  ;;  %vm2632_vm11 = vcmp.eq.s32.totalorder %v4907_v0, 7 }
 0x22b   :  { %158 = vmatpush.msra.mxu1 %v157_v3  ;;  %vm2397_vm6 = vcmp.eq.s32.totalorder %v3046_v54, 6  ;;  %vm2634_vm15 = vcmp.eq.s32.totalorder %v4899_v12, 7 }
 0x22c   :  { %v2097_v42 = vrot.slane %v2096_v44, 2  ;;  %2481 = vperm.xlu1 %2950, %v2416_v63   ;;  %2484 = vperm.xlu2 %2951, %v2417_v39   ;;  %v5234_v63 = vand.u32 4294901760, %v5231_v9  ;;  %v5585_v0 = vsel %vm2634_vm15, 1, %v6777_v2 }
 0x22d   :  { %2478 = vperm.xlu0 %2949, %v2415_v49   ;;  %v3041_v49 = vld [vmem:[%s6612_s1 + $0xc8] sm:$0xff] }
 0x22e   :  { %v2098_v39 = vmax.f32 %v2096_v44, %v2097_v42  ;;  %v5237_v7 = vpop.permute.xlu1 %2187  ;;  %v5239_v32 = vpop.permute.xlu2 %2217  ;;  %vm2393_vm13 = vcmp.eq.s32.totalorder %v3041_v49, 6  ;;  %v5257_v37 = vsub.f32 %v5231_v9, %v5234_v63  ;;  %v5260_v44 = vand.u32 4294901760, %v4614_v47  ;;  %109 = vmatpush.msra.mxu0 %v5234_v63  ;;  %305 = vmatpush.msra.mxu3 %v5234_v63 }
 0x22f   :  { %v5246_v20 = vpop.permute.xlu0 %2184  ;;  %v5264_v42 = vsel %vm2391_vm10, 1, %v6777_v2  ;;  %v5285_v24 = vsel %vm2393_vm13, 1, %v6777_v2  ;;  %vm2270_vm3 = vcmp.eq.s32.totalorder %v5237_v7, 1  ;;  %vm2280_vm8 = vcmp.eq.s32.totalorder %v5239_v32, 1  ;;  %v3050_v32 = vld [vmem:[%s6612_s1 + $0xf8] sm:$0xff] }
 0x230   :  { %6874 = vst [vmem:[#allocation8_spill] sm:$0xff] %v5260_v44  ;;  %v2099_v8 = vrot.slane %v2098_v39, 1  ;;  %256 = vmatpush.msra.mxu2 %v5257_v37  ;;  %111 = vmatpush.msra.mxu0 %v5244_v43  ;;  %v5304_v21 = vsub.f32 %v4614_v47, %v5260_v44  ;;  %v6876_v3 = vand.u32 4294901760, %v5257_v37  ;;  %vm2269_vm5 = vcmp.eq.s32.totalorder %v5246_v20, 1 }
 0x231   :  { %307 = vmatpush.msra.mxu3 %v5244_v43  ;;  %v5398_v43 = vld [vmem:[%s6613_s2 + $0x28] sm:$0xff]  ;;  %v5420_v20 = vsel %vm2396_vm4, 1, %v6777_v2  ;;  %vm2399_vm10 = vcmp.eq.s32.totalorder %v3050_v32, 6 }
 0x232   :  { %v2100_v13 = vmax.f32 %v2098_v39, %v2099_v8  ;;  %v6875_v39 = vand.u32 4294901760, %v5225_v51  ;;  %259 = vmatpush.msra.mxu2 %v5289_v41  ;;  %113 = vmatpush.msra.mxu0 %v5260_v44  ;;  %6882 = vst [vmem:[#allocation25_spill] sm:$0xff] %v5398_v43 }
 0x233   :  { %309 = vmatpush.msra.mxu3 %v5260_v44 }
 0x234   :  { %v162_v49 = vsub.f32 %v5225_v51, %v6875_v39  ;;  %v2102_v8 = vmax.f32 %v2101_v18, %v2100_v13  ;;  %2490 = vperm.xlu1 %2950, %v5189_v38   ;;  %2493 = vperm.xlu2 %2951, %v5203_v19   ;;  %v168_v39 = vsub.f32 %v5257_v37, %v6876_v3  ;;  %v5329_v38 = vsel %vm2392_vm0, 1, %v6777_v2 }
 0x235   :  { %2487 = vperm.xlu0 %2949, %v5207_v59   ;;  %v5335_v59 = vld [vmem:[%s6613_s2 + $0x40] sm:$0xff]  ;;  %262 = vmatpush.msra.mxu2 %v5304_v21 }
 0x236   :  { %v163_v47 = vand.u32 4294901760, %v162_v49  ;;  %2103 = vst [vmem:[#allocation2 + $0x4] sm:$0x1] %v2102_v8  ;;  %v5323_v13 = vpop.permute.xlu1 %2196  ;;  %v5325_v36 = vpop.permute.xlu2 %2226  ;;  %v169_v19 = vand.u32 4294901760, %v168_v39  ;;  %v5338_v18 = vand.u32 4294901760, %v5335_v59  ;;  %v6706_v49 = vand.u32 4294901760, %v5304_v21 }
 0x237   :  { %6877 = vst [vmem:[#allocation17_spill] sm:$0xff] %v5335_v59  ;;  %v5347_v8 = vsel %vm2277_vm1, %v4636_v23, -inf  ;;  %v5349_v3 = vpop.permute.xlu0 %2193  ;;  %v174_v39 = vsub.f32 %v5289_v41, %v6703_v33  ;;  %v2302_v23 = vsel %vm2270_vm3, %v4573_v58, -inf  ;;  %v3047_v33 = vld [vmem:[%s6612_s1 + $0xd8] sm:$0xff]  ;;  %vm2273_vm9 = vcmp.eq.s32.totalorder %v5323_v13, 1 }
 0x238   :  { %6878 = vst [vmem:[#allocation27_spill] sm:$0xff] %v5338_v18  ;;  %164 = vmatpush.msra.mxu1 %v163_v47  ;;  %v5369_v47 = vsub.f32 %v5335_v59, %v5338_v18  ;;  %115 = vmatpush.msra.mxu0 %v5338_v18  ;;  %v180_v7 = vsub.f32 %v5304_v21, %v6706_v49  ;;  %vm2395_vm7 = vcmp.eq.s32.totalorder %v3047_v33, 6  ;;  %vm2272_vm13 = vcmp.eq.s32.totalorder %v5349_v3, 1 }
 0x239   :  { %311 = vmatpush.msra.mxu3 %v5338_v18  ;;  %v175_v61 = vand.u32 4294901760, %v174_v39  ;;  %v5386_v18 = vsub.f32 %v4587_v45, %v5356_v35  ;;  %v5391_v39 = vand.u32 4294901760, %v4573_v58  ;;  %v2330_v44 = vmax.f32 %v2298_v22, %v2302_v23 }
 0x23a   :  { %6880 = vst [vmem:[#allocation26_spill] sm:$0xff] %v5369_v47  ;;  %170 = vmatpush.msra.mxu1 %v169_v19  ;;  %265 = vmatpush.msra.mxu2 %v5369_v47  ;;  %v181_v49 = vand.u32 4294901760, %v180_v7  ;;  %v5401_v45 = vand.u32 4294901760, %v5398_v43  ;;  %v2301_v19 = vsel %vm2269_vm5, %v5398_v43, -inf  ;;  %v6884_v22 = vand.u32 4294901760, %v5369_v47 }
 0x23b   :  { %117 = vmatpush.msra.mxu0 %v5356_v35  ;;  %6881 = vst [vmem:[#allocation30_spill] sm:$0xff] %v5391_v39  ;;  %313 = vmatpush.msra.mxu3 %v5356_v35  ;;  %v5435_v7 = vsel %vm2397_vm6, 1, %v6777_v2  ;;  %v6887_v6 = vand.u32 4294901760, %v5386_v18  ;;  %v5449_v35 = vsel %vm2280_vm8, %v4671_v29, -inf  ;;  %v2329_v54 = vmax.f32 %v5128_v34, %v2301_v19  ;;  %v3051_v19 = vld [vmem:[%s6612_s1 + $0xf0] sm:$0xff] }
 0x23c   :  { %176 = vmatpush.msra.mxu1 %v175_v61  ;;  %6883 = vst [vmem:[#allocation29_spill] sm:$0xff] %v5401_v45  ;;  %2499 = vperm.xlu1 %2950, %v5212_v40   ;;  %v186_v23 = vsub.f32 %v5369_v47, %v6884_v22  ;;  %v5413_v61 = vsub.f32 %v4573_v58, %v5391_v39  ;;  %vm2398_vm12 = vcmp.eq.s32.totalorder %v3051_v19, 6  ;;  %vm2283_vm14 = vcmp.eq.s32.totalorder %v5325_v36, 1 }
 0x23d   :  { %2502 = vperm.xlu2 %2951, %v5264_v42   ;;  %2496 = vperm.xlu0 %2949, %v5268_v26   ;;  %v5424_v40 = vsub.f32 %v5398_v43, %v5401_v45  ;;  %v5427_v42 = vand.u32 4294901760, %v5100_v52  ;;  %v5439_v26 = vsel %vm2395_vm7, 1, %v6777_v2  ;;  %v192_v43 = vsub.f32 %v5386_v18, %v6887_v6  ;;  %v5463_v6 = vld [vmem:[%s6613_s2 + $0x48] sm:$0xff] }
 0x23e   :  { %6885 = vst [vmem:[#allocation33_spill] sm:$0xff] %v5413_v61  ;;  %182 = vmatpush.msra.mxu1 %v181_v49  ;;  %v5429_v58 = vpop.permute.xlu1 %2205  ;;  %v5431_v22 = vpop.permute.xlu2 %2235  ;;  %268 = vmatpush.msra.mxu2 %v5386_v18  ;;  %v187_v49 = vand.u32 4294901760, %v186_v23  ;;  %v6711_v33 = vand.u32 4294901760, %v5413_v61  ;;  %v2305_v29 = vsel %vm2273_vm9, %v5463_v6, -inf  ;;  %v5469_v34 = vmax.f32 %v2330_v44, %v5277_v4 }
 0x23f   :  { %6886 = vst [vmem:[#allocation28_spill] sm:$0xff] %v5427_v42  ;;  %119 = vmatpush.msra.mxu0 %v5391_v39  ;;  %v5452_v47 = vpop.permute.xlu0 %2202  ;;  %315 = vmatpush.msra.mxu3 %v5391_v39  ;;  %v5458_v23 = vsub.f32 %v5100_v52, %v5427_v42  ;;  %v193_v52 = vand.u32 4294901760, %v192_v43  ;;  %v5490_v43 = vld [vmem:[%s6613_s2 + $0x18] sm:$0xff]  ;;  %vm2276_vm0 = vcmp.eq.s32.totalorder %v5429_v58, 1  ;;  %v6899_v36 = vmax.f32 %v5106_v15, %v5103_v25  ;;  %v5595_v25 = vld [vmem:[%s6613_s2 + $0x60] sm:$0xff] }
 0x240   :  { %6889 = vst [vmem:[#allocation31_spill] sm:$0xff] %v5463_v6  ;;  %188 = vmatpush.msra.mxu1 %v187_v49  ;;  %271 = vmatpush.msra.mxu2 %v5413_v61  ;;  %v198_v4 = vsub.f32 %v5413_v61, %v6711_v33  ;;  %v5493_v13 = vand.u32 4294901760, %v5490_v43  ;;  %v5499_v33 = vld [vmem:[%s6613_s2 + $0x10] sm:$0xff]  ;;  %v5514_v49 = vld [vmem:[%s6613_s2 + $0x8] sm:$0xff]  ;;  %v2308_v15 = vsel %vm2276_vm0, %v5595_v25, -inf  ;;  %vm2635_vm1 = vcmp.eq.s32.totalorder %v4951_v16, 7 }
 0x241   :  { %6888 = vst [vmem:[#allocation35_spill] sm:$0xff] %v5458_v23  ;;  %121 = vmatpush.msra.mxu0 %v5401_v45  ;;  %317 = vmatpush.msra.mxu3 %v5401_v45  ;;  %v5502_v44 = vand.u32 4294901760, %v5499_v33  ;;  %v6894_v45 = vand.u32 4294901760, %v5424_v40  ;;  %v5517_v61 = vand.u32 4294901760, %v5514_v49  ;;  %vm2275_vm2 = vcmp.eq.s32.totalorder %v5452_v47, 1 }
 0x242   :  { %194 = vmatpush.msra.mxu1 %v193_v52  ;;  %274 = vmatpush.msra.mxu2 %v5424_v40  ;;  %6890 = vst [vmem:[#allocation11_spill] sm:$0xff] %v5490_v43  ;;  %v5504_v52 = vmax.f32 %v2329_v54, %v2305_v29  ;;  %v199_v6 = vand.u32 4294901760, %v198_v4  ;;  %v5524_v54 = vsub.f32 %v5490_v43, %v5493_v13  ;;  %vm2286_vm4 = vcmp.eq.s32.totalorder %v5431_v22, 1 }
 0x243   :  { %6891 = vst [vmem:[#allocation34_spill] sm:$0xff] %v5493_v13  ;;  %123 = vmatpush.msra.mxu0 %v5427_v42  ;;  %v204_v39 = vsub.f32 %v5424_v40, %v6894_v45  ;;  %319 = vmatpush.msra.mxu3 %v5427_v42  ;;  %v6897_v45 = vand.u32 4294901760, %v5458_v23  ;;  %v5531_v4 = vsub.f32 %v5499_v33, %v5502_v44  ;;  %v2304_v42 = vsel %vm2272_vm13, %v5335_v59, -inf }
 0x244   :  { %6892 = vst [vmem:[#allocation13_spill] sm:$0xff] %v5499_v33  ;;  %2508 = vperm.xlu1 %2950, %v5285_v24   ;;  %v5539_v24 = vsel %vm2399_vm10, 1, %v6777_v2  ;;  %200 = vmatpush.msra.mxu1 %v199_v6  ;;  %v5552_v32 = vsub.f32 %v5514_v49, %v5517_v61  ;;  %v2332_v33 = vmax.f32 %v6899_v36, %v2304_v42  ;;  %v6900_v19 = vand.u32 4294901760, %v5524_v54  ;;  %v5608_v42 = vld [vmem:[%s6613_s2] sm:$0xff] }
 0x245   :  { %6893 = vst [vmem:[#allocation12_spill] sm:$0xff] %v5502_v44  ;;  %2511 = vperm.xlu2 %2951, %v5294_v30   ;;  %v210_v29 = vsub.f32 %v5458_v23, %v6897_v45  ;;  %2505 = vperm.xlu0 %2949, %v5329_v38   ;;  %v205_v30 = vand.u32 4294901760, %v204_v39  ;;  %v5557_v39 = vld [vmem:[%s6613_s2 + $0x98] sm:$0xff]  ;;  %v5573_v38 = vsel %vm2398_vm12, 1, %v6777_v2  ;;  %v5611_v36 = vand.u32 4294901760, %v5608_v42 }
 0x246   :  { %6895 = vst [vmem:[#allocation32_spill] sm:$0xff] %v5514_v49  ;;  %v5543_v45 = vpop.permute.xlu1 %2214  ;;  %v5545_v43 = vpop.permute.xlu2 %2244  ;;  %277 = vmatpush.msra.mxu2 %v5458_v23  ;;  %125 = vmatpush.msra.mxu0 %v5493_v13  ;;  %v5562_v6 = vsel %vm2283_vm14, %v5557_v39, -inf  ;;  %v6722_v49 = vand.u32 4294901760, %v5531_v4  ;;  %vm2637_vm5 = vcmp.eq.s32.totalorder %v4936_v50, 7  ;;  %vm2638_vm7 = vcmp.eq.s32.totalorder %v5003_v5, 7 }
 0x247   :  { %6896 = vst [vmem:[#allocation36_spill] sm:$0xff] %v5517_v61  ;;  %v211_v3 = vand.u32 4294901760, %v210_v29  ;;  %v5564_v59 = vpop.permute.xlu0 %2211  ;;  %v5569_v29 = vsel %vm2632_vm11, 1, %v6777_v2  ;;  %206 = vmatpush.msra.mxu1 %v205_v30  ;;  %321 = vmatpush.msra.mxu3 %v5493_v13  ;;  %v216_v30 = vsub.f32 %v5524_v54, %v6900_v19  ;;  %v5636_v19 = vsel %vm2635_vm1, 1, %v6777_v2 }
 0x248   :  { %6898 = vst [vmem:[#allocation21_spill] sm:$0xff] %v5552_v32  ;;  %280 = vmatpush.msra.mxu2 %v5524_v54  ;;  %127 = vmatpush.msra.mxu0 %v5502_v44  ;;  %v222_v12 = vsub.f32 %v5531_v4, %v6722_v49  ;;  %v3058_v49 = vld [vmem:[%s6612_s1 + $0x8] sm:$0xff]  ;;  %vm2279_vm6 = vcmp.eq.s32.totalorder %v5543_v45, 1  ;;  %v5708_v22 = vsel %vm2637_vm5, 1, %v6777_v2  ;;  %vm2278_vm8 = vcmp.eq.s32.totalorder %v5564_v59, 1 }
 0x249   :  { %6901 = vst [vmem:[#allocation23_spill] sm:$0xff] %v5595_v25  ;;  %212 = vmatpush.msra.mxu1 %v211_v3  ;;  %323 = vmatpush.msra.mxu3 %v5502_v44  ;;  %v217_v58 = vand.u32 4294901760, %v216_v30  ;;  %v5617_v3 = vand.u32 4294901760, %v4796_v1  ;;  %vm2633_vm3 = vcmp.eq.s32.totalorder %v3058_v49, 7  ;;  %v5625_v25 = vsub.f32 %v5608_v42, %v5611_v36  ;;  %v5677_v49 = vld [vmem:[%s6613_s2 + $0xe8] sm:$0xff] }
 0x24a   :  { %6902 = vst [vmem:[#allocation37_spill] sm:$0xff] %v5608_v42  ;;  %283 = vmatpush.msra.mxu2 %v5531_v4  ;;  %129 = vmatpush.msra.mxu0 %v5517_v61  ;;  %v223_v23 = vand.u32 4294901760, %v222_v12  ;;  %v5629_v30 = vand.u32 4294901760, %v4802_v31  ;;  %v2336_v44 = vmax.f32 %v2332_v33, %v2308_v15  ;;  %v6905_v12 = vand.u32 4294901760, %v5552_v32  ;;  %v5811_v59 = vld [vmem:[%s6613_s2 + $0xc8] sm:$0xff] }
 0x24b   :  { %6903 = vst [vmem:[#allocation14_spill] sm:$0xff] %v5611_v36  ;;  %325 = vmatpush.msra.mxu3 %v5517_v61  ;;  %v5643_v61 = vsub.f32 %v4796_v1, %v5617_v3  ;;  %218 = vmatpush.msra.mxu1 %v217_v58  ;;  %v6727_v16 = vand.u32 4294901760, %v5625_v25  ;;  %v5661_v1 = vsel %vm2633_vm3, 1, %v6777_v2  ;;  %v6909_v58 = vand.u32 4294901760, %v5125_v53 }
 0x24c   :  { %6904 = vst [vmem:[#allocation19_spill] sm:$0xff] %v5629_v30  ;;  %2517 = vperm.xlu1 %2950, %v5420_v20   ;;  %v228_v42 = vsub.f32 %v5552_v32, %v6905_v12  ;;  %v2307_v20 = vsel %vm2275_vm2, %v5231_v9, -inf  ;;  %286 = vmatpush.msra.mxu2 %v5552_v32  ;;  %vm2289_vm10 = vcmp.eq.s32.totalorder %v5545_v43, 1  ;;  %vm2640_vm11 = vcmp.eq.s32.totalorder %v4993_v55, 7 }
 0x24d   :  { %2520 = vperm.xlu2 %2951, %v5435_v7   ;;  %2514 = vperm.xlu0 %2949, %v5439_v26   ;;  %v5653_v7 = vsub.f32 %v4802_v31, %v5629_v30  ;;  %v234_v26 = vsub.f32 %v5625_v25, %v6727_v16  ;;  %v6908_v16 = vmax.f32 %v5310_v57, %v5199_v10  ;;  %v6910_v32 = vand.u32 4294901760, %v5643_v61  ;;  %v5718_v57 = vld [vmem:[%s6613_s2 + $0x78] sm:$0xff] }
 0x24e   :  { %v5655_v33 = vpop.permute.xlu1 %2223  ;;  %v5657_v15 = vpop.permute.xlu2 %2253  ;;  %131 = vmatpush.msra.mxu0 %v5611_v36  ;;  %v229_v9 = vand.u32 4294901760, %v228_v42  ;;  %224 = vmatpush.msra.mxu1 %v223_v23  ;;  %v5680_v42 = vand.u32 4294901760, %v5677_v49  ;;  %v5686_v23 = vld [vmem:[%s6613_s2 + $0xb0] sm:$0xff]  ;;  %6912 = vst [vmem:[#allocation9_spill] sm:$0xff] %v5718_v57  ;;  %v2311_v50 = vsel %vm2279_vm6, %v5718_v57, -inf  ;;  %vm2641_vm13 = vcmp.eq.s32.totalorder %v5051_v17, 7 }
 0x24f   :  { %v5668_v31 = vpop.permute.xlu0 %2220  ;;  %327 = vmatpush.msra.mxu3 %v5611_v36  ;;  %6907 = vst [vmem:[#allocation24_spill] sm:$0xff] %v5686_v23  ;;  %v5691_v12 = vsel %vm2286_vm4, %v5686_v23, -inf  ;;  %v2335_v47 = vmax.f32 %v6908_v16, %v2307_v20  ;;  %v5697_v36 = vmax.f32 %v2336_v44, %v5449_v35  ;;  %289 = vmatpush.msra.mxu2 %v5625_v25  ;;  %v235_v35 = vand.u32 4294901760, %v234_v26  ;;  %v5729_v20 = vld [vmem:[%s6613_s2 + $0xe0] sm:$0xff] }
 0x250   :  { %6906 = vst [vmem:[#allocation22_spill] sm:$0xff] %v5680_v42  ;;  %338 = vmatpush.msrb.mxu0 %v6909_v58  ;;  %v485_v13 = vsub.f32 %v5643_v61, %v6910_v32  ;;  %230 = vmatpush.msra.mxu1 %v229_v9  ;;  %v6911_v10 = vand.u32 4294901760, %v5653_v7  ;;  %v6913_v32 = vand.u32 4294901760, %v5161_v62  ;;  %v5732_v16 = vand.u32 4294901760, %v5729_v20  ;;  %v6915_v9 = vld [vmem:[#allocation10_spill] sm:$0xff]  ;;  %v5743_v62 = vld [vmem:[%s6613_s2 + $0xd8] sm:$0xff] }
 0x251   :  { %442 = vmatpush.msrb.mxu2 %v5617_v3  ;;  %6914 = vst [vmem:[#allocation16_spill] sm:$0xff] %v5729_v20  ;;  %vm2636_vm9 = vcmp.eq.s32.totalorder %v6915_v9, 7  ;;  %v5746_v26 = vand.u32 4294901760, %v5743_v62  ;;  %v5754_v58 = vsel %vm2638_vm7, 1, %v6777_v2  ;;  %vm2282_vm12 = vcmp.eq.s32.totalorder %v5655_v33, 1 }
 0x252   :  { %v491_v53 = vsub.f32 %v5653_v7, %v6911_v10  ;;  %v486_v44 = vand.u32 4294901760, %v485_v13  ;;  %342 = vmatpush.msrb.mxu0 %v6913_v32  ;;  %236 = vmatpush.msra.mxu1 %v235_v35  ;;  %v5738_v13 = vsub.f32 %v5677_v49, %v5680_v42  ;;  %6917 = vst [vmem:[#allocation38_spill] sm:$0xff] %v5743_v62  ;;  %v5763_v10 = vld [vmem:[%s6613_s2 + $0xd0] sm:$0xff]  ;;  %v6922_v9 = vand.u32 4294901760, %v5184_v27 }
 0x253   :  { %444 = vmatpush.msrb.mxu2 %v5629_v30  ;;  %6918 = vst [vmem:[#allocation39_spill] sm:$0xff] %v5746_v26  ;;  %v5758_v35 = vsub.f32 %v5729_v20, %v5732_v16  ;;  %v5780_v57 = vsub.f32 %v5743_v62, %v5746_v26  ;;  %v5834_v43 = vsel %vm2640_vm11, 1, %v6777_v2  ;;  %vm2281_vm14 = vcmp.eq.s32.totalorder %v5668_v31, 1 }
 0x254   :  { %v492_v45 = vand.u32 4294901760, %v491_v53  ;;  %6916 = vst [vmem:[#allocation10_spill] sm:$0xff] %v5738_v13  ;;  %2526 = vperm.xlu1 %2950, %v5539_v24   ;;  %v5766_v53 = vand.u32 4294901760, %v5763_v10  ;;  %v2339_v24 = vmax.f32 %v2335_v47, %v2311_v50  ;;  %487 = vmatpush.msrb.mxu3 %v486_v44  ;;  %v6737_v32 = vand.u32 4294901760, %v5738_v13 }
 0x255   :  { %2697 = vperm.xlu2 %2951, %v5569_v29   ;;  %v5771_v29 = vld [vmem:[%s6613_s2 + $0x70] sm:$0xff]  ;;  %2523 = vperm.xlu0 %2949, %v5573_v38   ;;  %v5789_v50 = vsel %vm2636_vm9, 1, %v6777_v2  ;;  %6923 = vst [vmem:[#allocation43_spill] sm:$0xff] %v5811_v59  ;;  %vm2292_vm15 = vcmp.eq.s32.totalorder %v5657_v15, 1  ;;  %vm2639_vm0 = vcmp.eq.s32.totalorder %v4981_v56, 7  ;;  %vm2643_vm1 = vcmp.eq.s32.totalorder %v5035_v60, 7 }
 0x256   :  { %6919 = vst [vmem:[#allocation40_spill] sm:$0xff] %v5766_v53  ;;  %v2310_v5 = vsel %vm2278_vm8, %v5771_v29, -inf  ;;  %v5782_v30 = vpop.permute.xlu1 %2232  ;;  %v5784_v47 = vpop.permute.xlu2 %2262  ;;  %405 = vmatpush.msrb.mxu1 %v5115_v46  ;;  %446 = vmatpush.msrb.mxu2 %v5680_v42  ;;  %v5797_v38 = vsub.f32 %v5763_v10, %v5766_v53  ;;  %v497_v46 = vsub.f32 %v5738_v13, %v6737_v32  ;;  %v5814_v42 = vand.u32 4294901760, %v5811_v59  ;;  %v5944_v15 = vld [vmem:[%s6613_s2 + $0xa8] sm:$0xff]  ;;  %v6936_v60 = vld [vmem:[#allocation26_spill] sm:$0xff] }
 0x257   :  { %6920 = vst [vmem:[#allocation41_spill] sm:$0xff] %v5771_v29  ;;  %v5800_v44 = vpop.permute.xlu0 %2229  ;;  %493 = vmatpush.msrb.mxu3 %v492_v45  ;;  %346 = vmatpush.msrb.mxu0 %v6922_v9  ;;  %v5819_v45 = vsel %vm2289_vm10, %v5811_v59, -inf  ;;  %v2338_v27 = vmax.f32 %v5469_v34, %v2310_v5  ;;  %v6924_v9 = vand.u32 4294901760, %v5758_v35  ;;  %v5829_v29 = vmax.f32 %v2339_v24, %v5562_v6 }
 0x258   :  { %6921 = vst [vmem:[#allocation42_spill] sm:$0xff] %v5797_v38  ;;  %407 = vmatpush.msrb.mxu1 %v5132_v48  ;;  %448 = vmatpush.msrb.mxu2 %v5732_v16  ;;  %v498_v13 = vand.u32 4294901760, %v497_v46  ;;  %v6925_v34 = vand.u32 4294901760, %v5225_v51  ;;  %v6926_v48 = vand.u32 4294901760, %v5780_v57  ;;  %v6740_v51 = vand.u32 4294901760, %v5797_v38 }
 0x259   :  { %v503_v32 = vsub.f32 %v5758_v35, %v6924_v9  ;;  %v5844_v9 = vld [vmem:[%s6613_s2 + $0x90] sm:$0xff]  ;;  %v5856_v24 = vsel %vm2641_vm13, 1, %v6777_v2  ;;  %v6927_v46 = vand.u32 4294901760, %v5257_v37  ;;  %v5881_v37 = vld [vmem:[%s6613_s2 + $0xb8] sm:$0xff]  ;;  %vm2644_vm2 = vcmp.eq.s32.totalorder %v5087_v28, 7  ;;  %6933 = vst [vmem:[#allocation46_spill] sm:$0xff] %v5944_v15 }
 0x25a   :  { %350 = vmatpush.msrb.mxu0 %v6925_v34  ;;  %v509_v5 = vsub.f32 %v5780_v57, %v6926_v48  ;;  %v2314_v6 = vsel %vm2282_vm12, %v5844_v9, -inf  ;;  %409 = vmatpush.msrb.mxu1 %v5148_v11  ;;  %v5863_v34 = vld [vmem:[%s6613_s2 + $0xc0] sm:$0xff]  ;;  %v515_v17 = vsub.f32 %v5797_v38, %v6740_v51  ;;  %6928 = vst [vmem:[#allocation44_spill] sm:$0xff] %v5881_v37  ;;  %v5887_v48 = vand.u32 4294901760, %v5686_v23 }
 0x25b   :  { %450 = vmatpush.msrb.mxu2 %v5746_v26  ;;  %v504_v55 = vand.u32 4294901760, %v503_v32  ;;  %499 = vmatpush.msrb.mxu3 %v498_v13  ;;  %v5866_v11 = vand.u32 4294901760, %v5863_v34  ;;  %v5870_v32 = vsub.f32 %v5811_v59, %v5814_v42  ;;  %v5884_v13 = vand.u32 4294901760, %v5881_v37 }
 0x25c   :  { %354 = vmatpush.msrb.mxu0 %v6927_v46  ;;  %v510_v33 = vand.u32 4294901760, %v509_v5  ;;  %2703 = vperm.xlu1 %2950, %v5585_v0   ;;  %6929 = vst [vmem:[#allocation45_spill] sm:$0xff] %v5887_v48  ;;  %v5889_v5 = vmax.f32 %v2338_v27, %v2314_v6  ;;  %v5894_v0 = vld [vmem:[%s6613_s2 + $0x88] sm:$0xff]  ;;  %v516_v31 = vand.u32 4294901760, %v515_v17  ;;  %v5923_v46 = vsel %vm2292_vm15, %v5729_v20, -inf }
 0x25d   :  { %2706 = vperm.xlu2 %2951, %v5636_v19   ;;  %v2313_v19 = vsel %vm2281_vm14, %v5894_v0, -inf  ;;  %2700 = vperm.xlu0 %2949, %v5661_v1   ;;  %v5903_v51 = vsub.f32 %v5863_v34, %v5866_v11  ;;  %v5914_v1 = vsub.f32 %v5881_v37, %v5884_v13  ;;  %v6931_v17 = vand.u32 4294901760, %v5870_v32 }
 0x25e   :  { %505 = vmatpush.msrb.mxu3 %v504_v55  ;;  %v5905_v27 = vpop.permute.xlu1 %2241  ;;  %v5907_v6 = vpop.permute.xlu2 %2439  ;;  %411 = vmatpush.msrb.mxu1 %v5193_v14  ;;  %v5918_v55 = vsub.f32 %v5686_v23, %v5887_v48  ;;  %v6930_v14 = vand.u32 4294901760, %v5289_v41  ;;  %v6932_v23 = vmax.f32 %v5504_v52, %v5347_v8  ;;  %v6934_v52 = vand.u32 4294901760, %v5304_v21 }
 0x25f   :  { %452 = vmatpush.msrb.mxu2 %v5766_v53  ;;  %v2239_v59 = vpop.permute.xlu0 %2238  ;;  %v521_v53 = vsub.f32 %v5870_v32, %v6931_v17  ;;  %v6751_v26 = vand.u32 4294901760, %v5903_v51  ;;  %v6749_v41 = vand.u32 4294901760, %v5914_v1  ;;  %vm2285_vm3 = vcmp.eq.s32.totalorder %v5782_v30, 1  ;;  %v6935_v17 = vld [vmem:[#allocation20_spill] sm:$0xff] }
 0x260   :  { %511 = vmatpush.msrb.mxu3 %v510_v33  ;;  %358 = vmatpush.msrb.mxu0 %v6930_v14  ;;  %v5935_v38 = vmax.f32 %v6932_v23, %v2313_v19  ;;  %v5947_v33 = vand.u32 4294901760, %v5944_v15  ;;  %v5965_v14 = vsel %vm2643_vm1, 1, %v6777_v2  ;;  %v6750_v21 = vand.u32 4294901760, %v5918_v55 }
 0x261   :  { %413 = vmatpush.msrb.mxu1 %v5234_v63  ;;  %454 = vmatpush.msrb.mxu2 %v5814_v42  ;;  %v5954_v63 = vsel %vm2639_vm0, 1, %v6777_v2  ;;  %v522_v23 = vand.u32 4294901760, %v521_v53  ;;  %v527_v19 = vsub.f32 %v5903_v51, %v6751_v26  ;;  %v533_v56 = vsub.f32 %v5914_v1, %v6749_v41 }
 0x262   :  { %517 = vmatpush.msrb.mxu3 %v516_v31  ;;  %362 = vmatpush.msrb.mxu0 %v6934_v52  ;;  %vm2287_vm4 = vcmp.eq.s32.totalorder %v2239_v59, 1  ;;  %v5976_v53 = vsel %vm2644_vm2, 1, %v6777_v2  ;;  %v6937_v31 = vand.u32 4294901760, %v6936_v60  ;;  %vm2295_vm5 = vcmp.eq.s32.totalorder %v5784_v47, 1  ;;  %v6940_v59 = vld [vmem:[#allocation27_spill] sm:$0xff] }
 0x263   :  { %415 = vmatpush.msrb.mxu1 %v6935_v17  ;;  %456 = vmatpush.msrb.mxu2 %v5866_v11  ;;  %v528_v52 = vand.u32 4294901760, %v527_v19  ;;  %v5983_v17 = vld [vmem:[%s6613_s2 + $0xa0] sm:$0xff]  ;;  %v534_v28 = vand.u32 4294901760, %v533_v56  ;;  %v5996_v19 = vsub.f32 %v5944_v15, %v5947_v33  ;;  %v2317_v60 = vsel %vm2285_vm3, %v5944_v15, -inf }
 0x264   :  { %523 = vmatpush.msrb.mxu3 %v522_v23  ;;  %366 = vmatpush.msrb.mxu0 %v6937_v31  ;;  %v5986_v41 = vand.u32 4294901760, %v5983_v17  ;;  %v539_v23 = vsub.f32 %v5918_v55, %v6750_v21  ;;  %vm2284_vm6 = vcmp.eq.s32.totalorder %v5800_v44, 1  ;;  %v2319_v31 = vsel %vm2287_vm4, %v5881_v37, -inf  ;;  %v6944_v37 = vld [vmem:[#allocation15_spill] sm:$0xff] }
 0x265   :  { %2712 = vperm.xlu1 %2950, %v5708_v22   ;;  %2715 = vperm.xlu2 %2951, %v5754_v58   ;;  %v6938_v22 = vld [vmem:[#allocation8_spill] sm:$0xff]  ;;  %v6005_v58 = vand.u32 4294901760, %v5557_v39  ;;  %vm2288_vm7 = vcmp.eq.s32.totalorder %v5905_v27, 1  ;;  %v6939_v20 = vand.u32 4294901760, %v5386_v18  ;;  %v6941_v18 = vand.u32 4294901760, %v5996_v19 }
 0x266   :  { %2709 = vperm.xlu0 %2949, %v5789_v50   ;;  %417 = vmatpush.msrb.mxu1 %v6938_v22  ;;  %v6009_v56 = vsub.f32 %v5983_v17, %v5986_v41  ;;  %v2251_v21 = vpop.permute.xlu1 %2250  ;;  %v6013_v26 = vpop.permute.xlu2 %2448  ;;  %v540_v30 = vand.u32 4294901760, %v539_v23  ;;  %v6018_v22 = vand.u32 4294901760, %v5844_v9  ;;  %v2316_v23 = vsel %vm2284_vm6, %v5983_v17, -inf  ;;  %v3073_v27 = vld [vmem:[%s6612_s1 + $0x50] sm:$0xff] }
 0x267   :  { %458 = vmatpush.msrb.mxu2 %v5884_v13  ;;  %529 = vmatpush.msrb.mxu3 %v528_v52  ;;  %vm2291_vm8 = vcmp.eq.s32.totalorder %v2251_v21, 1  ;;  %v2248_v8 = vpop.permute.xlu0 %2247  ;;  %v6027_v52 = vsub.f32 %v5557_v39, %v6005_v58  ;;  %v2345_v21 = vmax.f32 %v5935_v38, %v2317_v60  ;;  %v6942_v39 = vld [vmem:[#allocation33_spill] sm:$0xff]  ;;  %vm2642_vm10 = vcmp.eq.s32.totalorder %v3073_v27, 7 }
 0x268   :  { %370 = vmatpush.msrb.mxu0 %v6939_v20  ;;  %419 = vmatpush.msrb.mxu1 %v6940_v59  ;;  %v2323_v50 = vsel %vm2291_vm8, %v5743_v62, -inf  ;;  %vm2290_vm9 = vcmp.eq.s32.totalorder %v2248_v8, 1  ;;  %v545_v20 = vsub.f32 %v5996_v19, %v6941_v18  ;;  %v2347_v59 = vmax.f32 %v5829_v29, %v2319_v31  ;;  %v6947_v18 = vld [vmem:[#allocation30_spill] sm:$0xff] }
 0x269   :  { %460 = vmatpush.msrb.mxu2 %v5887_v48  ;;  %535 = vmatpush.msrb.mxu3 %v534_v28  ;;  %v6943_v15 = vand.u32 4294901760, %v6942_v39  ;;  %v6945_v44 = vand.u32 4294901760, %v6009_v56  ;;  %v6046_v48 = vand.u32 4294901760, %v5894_v0  ;;  %v2320_v28 = vsel %vm2288_vm7, %v5863_v34, -inf }
 0x26a   :  { %421 = vmatpush.msrb.mxu1 %v6944_v37  ;;  %v546_v29 = vand.u32 4294901760, %v545_v20  ;;  %v6758_v38 = vand.u32 4294901760, %v6027_v52  ;;  %v6055_v37 = vsub.f32 %v5844_v9, %v6018_v22  ;;  %v2351_v60 = vmax.f32 %v2347_v59, %v2323_v50  ;;  %v6069_v20 = vld [vmem:[%s6611_s0] sm:$0x3] }
 0x26b   :  { %374 = vmatpush.msrb.mxu0 %v6943_v15  ;;  %v551_v62 = vsub.f32 %v6009_v56, %v6945_v44  ;;  %462 = vmatpush.msrb.mxu2 %v5947_v33  ;;  %v2344_v15 = vmax.f32 %v5697_v36, %v2316_v23  ;;  %v2322_v31 = vsel %vm2290_vm9, %v5763_v10, -inf  ;;  %v6074_v36 = vld [vmem:[%s6613_s2 + $0xf8] sm:$0xff]  ;;  %v2349_v39 = vmax.f32 %v2345_v21, %v5819_v45 }
 0x26c   :  { %541 = vmatpush.msrb.mxu3 %v540_v30  ;;  %v6946_v30 = vand.u32 4294901760, %v5424_v40  ;;  %423 = vmatpush.msrb.mxu1 %v6947_v18  ;;  %6948 = vst [vmem:[#allocation20_spill] sm:$0xff] %v6074_v36  ;;  %v2327_v8 = vsel %vm2295_vm5, %v6074_v36, -inf  ;;  %v557_v50 = vsub.f32 %v6027_v52, %v6758_v38  ;;  %v562_v23 = vand.u32 4294901760, %v6055_v37  ;;  %v6952_v36 = vld [vmem:[#allocation29_spill] sm:$0xff] }
 0x26d   :  { %2721 = vperm.xlu1 %2950, %v5834_v43   ;;  %2724 = vperm.xlu2 %2951, %v5856_v24   ;;  %v552_v40 = vand.u32 4294901760, %v551_v62  ;;  %v2348_v59 = vmax.f32 %v2344_v15, %v2320_v28  ;;  %v6090_v47 = vsub.f32 %v5894_v0, %v6046_v48  ;;  %v89_v43 = vlaneseq  ;;  %v6950_v28 = vld [vmem:[#allocation35_spill] sm:$0xff] }
 0x26e   :  { %378 = vmatpush.msrb.mxu0 %v6946_v30  ;;  %2718 = vperm.xlu0 %2949, %v5954_v63   ;;  %v6949_v62 = vmax.f32 %v5889_v5, %v5691_v12  ;;  %v2260_v44 = vpop.permute.xlu1 %2259  ;;  %v6095_v30 = vpop.permute.xlu2 %2457  ;;  %v6951_v15 = vand.u32 4294901760, %v6950_v28  ;;  %v558_v63 = vand.u32 4294901760, %v557_v50  ;;  %v563_v45 = vsub.f32 %v6055_v37, %v562_v23 }
 0x26f   :  { %464 = vmatpush.msrb.mxu2 %v5986_v41  ;;  %547 = vmatpush.msrb.mxu3 %v546_v29  ;;  %v91_v21 = vperm.slane %v6069_v20, 0  ;;  %v2355_v18 = vmax.f32 %v2351_v60, %v2327_v8  ;;  %vm2294_vm11 = vcmp.eq.s32.totalorder %v2260_v44, 1  ;;  %v2257_v38 = vpop.permute.xlu0 %2256  ;;  %v568_v12 = vand.u32 4294901760, %v6090_v47  ;;  %v6111_v29 = vld [vmem:[%s6613_s2 + $0xf0] sm:$0xff] }
 0x270   :  { %v2350_v24 = vmax.f32 %v6949_v62, %v2322_v31  ;;  %382 = vmatpush.msrb.mxu0 %v6951_v15  ;;  %425 = vmatpush.msrb.mxu1 %v6952_v36  ;;  %v6106_v5 = vshrl.u32 %v89_v43, 7  ;;  %v2326_v31 = vsel %vm2294_vm11, %v6111_v29, -inf  ;;  %vm2293_vm12 = vcmp.eq.s32.totalorder %v2257_v38, 1  ;;  %v6119_v36 = vld [vmem:[%s6613_s2 + $0x80] sm:$0xff]  ;;  %v6954_v62 = vld [vmem:[#allocation28_spill] sm:$0xff] }
 0x271   :  { %466 = vmatpush.msrb.mxu2 %v6005_v58  ;;  %553 = vmatpush.msrb.mxu3 %v552_v40  ;;  %v6953_v60 = vand.u32 4294901760, %v5524_v54  ;;  %v6122_v8 = vand.u32 4294901760, %v6119_v36  ;;  %v2325_v43 = vsel %vm2293_vm12, %v5677_v49, -inf  ;;  %v564_v38 = vand.u32 4294901760, %v563_v45 }
 0x272   :  { %v2354_v50 = vmax.f32 %v2350_v24, %v2326_v31  ;;  %427 = vmatpush.msrb.mxu1 %v6954_v62  ;;  %v569_v54 = vsub.f32 %v6090_v47, %v568_v12  ;;  %v2352_v40 = vmax.f32 %v2348_v59, %v5923_v46  ;;  %v2353_v44 = vmax.f32 %v2349_v39, %v2325_v43  ;;  %v6958_v31 = vld [vmem:[#allocation34_spill] sm:$0xff]  ;;  %v6962_v62 = vld [vmem:[#allocation12_spill] sm:$0xff] }
 0x273   :  { %386 = vmatpush.msrb.mxu0 %v6953_v60  ;;  %468 = vmatpush.msrb.mxu2 %v6018_v22  ;;  %v2674_v28 = vsel %vm2642_vm10, 1, %v6777_v2  ;;  %v6955_v24 = vand.u32 4294901760, %v5531_v4  ;;  %vm6136_vm13 = vcmp.eq.s32.totalorder %v91_v21, %v6106_v5  ;;  %v3177_v46 = vmov 0.0  }
 0x274   :  { %559 = vmatpush.msrb.mxu3 %v558_v63  ;;  %v2357_v45 = vmax.f32 %v2354_v50, %v2355_v18  ;;  %429 = vmatpush.msrb.mxu1 %v6958_v31  ;;  %v570_v60 = vand.u32 4294901760, %v569_v54  ;;  %v2935_v27 = vsel %vm6136_vm13, 1.0, %v3177_v46  ;;  %v2356_v59 = vmax.f32 %v2352_v40, %v2353_v44  ;;  %v3077_v63 = vld [vmem:[%s6612_s1 + $0x70] sm:$0xff] }
 0x275   :  { %390 = vmatpush.msrb.mxu0 %v6955_v24  ;;  %470 = vmatpush.msrb.mxu2 %v6046_v48  ;;  %v133_v4 = vsub.f32 %v2935_v27, %v2935_v27  ;;  %v6149_v39 = vsub.f32 %v6119_v36, %v6122_v8  ;;  %vm2533_vm14 = vcmp.eq.s32.totalorder %v6013_v26, 1  ;;  %vm2646_vm15 = vcmp.eq.s32.totalorder %v3077_v63, 7 }
 0x276   :  { %2730 = vperm.xlu1 %2950, %v5965_v14   ;;  %2733 = vperm.xlu2 %2951, %v5976_v53   ;;  %v2358_v21 = vmax.f32 %v2356_v59, %v2357_v45  ;;  %v2437_v18 = vpop.permute.xlu1 %2436  ;;  %v6155_v50 = vpop.permute.xlu2 %2466  ;;  %v6959_v14 = vld [vmem:[#allocation18_spill] sm:$0xff]  ;;  %v6960_v53 = vld [vmem:[#allocation21_spill] sm:$0xff]  ;;  %vm2530_vm1 = vcmp.eq.s32.totalorder %v5907_v6, 1  ;;  %vm2536_vm2 = vcmp.eq.s32.totalorder %v6095_v30, 1  ;;  %v2678_v31 = vsel %vm2646_vm15, 1, %v6777_v2 }
 0x277   :  { %2727 = vperm.xlu0 %2949, %v2674_v28   ;;  %565 = vmatpush.msrb.mxu3 %v564_v38  ;;  %vm2647_vm0 = vcmp.eq.s32.totalorder %v6959_v14, 7  ;;  %v6961_v43 = vand.u32 4294901760, %v6960_v53  ;;  %v6761_v54 = vand.u32 4294901760, %v6149_v39  ;;  %v134_v40 = vand.u32 4294901760, %v133_v4  ;;  %v2434_v44 = vpop.permute.xlu0 %2433  ;;  %v3078_v38 = vld [vmem:[%s6612_s1 + $0x68] sm:$0xff]  ;;  %v6963_v28 = vld [vmem:[#allocation25_spill] sm:$0xff] }
 0x278   :  { %431 = vmatpush.msrb.mxu1 %v6962_v62  ;;  %vm2645_vm3 = vcmp.eq.s32.totalorder %v3078_v38, 7  ;;  %472 = vmatpush.msrb.mxu2 %v6122_v8  ;;  %v2565_v24 = vsel %vm2533_vm14, %v6963_v28, -inf  ;;  %v2359_v45 = vrot.slane %v2358_v21, 4  ;;  %v6964_v27 = vand.u32 4294901760, %v5625_v25  ;;  %v6968_v62 = vld [vmem:[#allocation17_spill] sm:$0xff] }
 0x279   :  { %394 = vmatpush.msrb.mxu0 %v6961_v43  ;;  %571 = vmatpush.msrb.mxu3 %v570_v60  ;;  %vm2529_vm4 = vcmp.eq.s32.totalorder %v2437_v18, 1  ;;  %v2679_v59 = vsel %vm2647_vm0, 1, %v6777_v2  ;;  %v6965_v53 = vand.u32 4294901760, %v5643_v61  ;;  %v6966_v60 = vld [vmem:[#allocation36_spill] sm:$0xff]  ;;  %v575_v26 = vsub.f32 %v6149_v39, %v6761_v54  ;;  %v6967_v43 = vld [vmem:[#allocation13_spill] sm:$0xff] }
 0x27a   :  { %292 = vmatmul.f32.vlgmr.msra.gmra.mxu2 %v133_v4  ;;  %433 = vmatpush.msrb.mxu1 %v6966_v60  ;;  %v135_v63 = vsub.f32 %v133_v4, %v134_v40  ;;  %v2562_v25 = vsel %vm2530_vm1, %v6967_v43, -inf  ;;  %v2568_v28 = vsel %vm2536_vm2, %v6968_v62, -inf  ;;  %v2360_v14 = vmax.f32 %v2358_v21, %v2359_v45  ;;  %v6970_v43 = vld [vmem:[#allocation14_spill] sm:$0xff]  ;;  %v6971_v62 = vld [vmem:[#allocation32_spill] sm:$0xff] }
 0x27b   :  { %398 = vmatpush.msrb.mxu0 %v6964_v27  ;;  %679 = vmatpush.msra.mxu2 %v6965_v53  ;;  %v2677_v27 = vsel %vm2645_vm3, 1, %v6777_v2  ;;  %v3178_v53 = vmov 1.0   ;;  %v2593_v60 = vmax.f32 %v2562_v25, %v2565_v24  ;;  %v576_v4 = vand.u32 4294901760, %v575_v26  ;;  %v3079_v26 = vld [vmem:[%s6612_s1 + $0x88] sm:$0xff]  ;;  %v3080_v18 = vld [vmem:[%s6612_s1 + $0x90] sm:$0xff]  ;;  %v3081_v25 = vld [vmem:[%s6612_s1 + $0x80] sm:$0xff] }
 0x27c   :  { %331 = vmatmul.f32.vlgmr.msra.gmra.mxu3 %v134_v40  ;;  %2937 = vmatmul.msk.f32.vlgmr.msra.gmra.mxu1 %vm6136_vm13, %v3178_v53  ;;  %v136_v54 = vand.u32 4294901760, %v135_v63  ;;  %v6969_v6 = vand.u32 4294901760, %v5653_v7  ;;  %v2361_v30 = vrot.slane %v2360_v14, 2  ;;  %v2561_v21 = vsel %vm2529_vm4, %v6971_v62, -inf  ;;  %v6236_v62 = vld [vmem:[%s6613_s2 + $0x58] sm:$0xff] }
 0x27d   :  { %435 = vmatpush.msrb.mxu1 %v6970_v43  ;;  %v2594_v40 = vmax.f32 %v2568_v28, %v2593_v60  ;;  %vm2528_vm5 = vcmp.eq.s32.totalorder %v2434_v44, 1  ;;  %577 = vmatpush.msrb.mxu3 %v576_v4  ;;  %vm2649_vm6 = vcmp.eq.s32.totalorder %v3079_v26, 7  ;;  %vm2650_vm7 = vcmp.eq.s32.totalorder %v3080_v18, 7  ;;  %v6973_v60 = vld [vmem:[#allocation10_spill] sm:$0xff] }
 0x27e   :  { %683 = vmatpush.msra.mxu2 %v6969_v6  ;;  %2739 = vperm.xlu1 %2950, %v2678_v31   ;;  %v2362_v38 = vmax.f32 %v2360_v14, %v2361_v30  ;;  %v2446_v45 = vpop.permute.xlu1 %2445  ;;  %v6200_v24 = vpop.permute.xlu2 %2475  ;;  %v92_v31 = vperm.slane %v6069_v20, 1  ;;  %vm2539_vm8 = vcmp.eq.s32.totalorder %v6155_v50, 1  ;;  %vm2648_vm10 = vcmp.eq.s32.totalorder %v3081_v25, 7  ;;  %v6972_v14 = vld [vmem:[#allocation37_spill] sm:$0xff]  ;;  %v6975_v6 = vld [vmem:[#allocation19_spill] sm:$0xff] }
 0x27f   :  { %2742 = vperm.xlu2 %2951, %v2679_v59   ;;  %2736 = vperm.xlu0 %2949, %v2677_v27   ;;  %v2598_v59 = vmax.f32 %v2594_v40, %v2561_v21  ;;  %vm2532_vm9 = vcmp.eq.s32.totalorder %v2446_v45, 1  ;;  %v2443_v63 = vpop.permute.xlu0 %2442  ;;  %v2560_v20 = vsel %vm2528_vm5, %v6972_v14, -inf  ;;  %v6974_v4 = vand.u32 4294901760, %v6973_v60  ;;  %v2365_v43 = vld [vmem:[#allocation2 + $0x5] sm:$0x1] }
 0x280   :  { %137 = vmatmul.f32.vlgmr.msra.gmra.mxu0 %v136_v54  ;;  %746 = vmatpush.msra.mxu3 %v5617_v3  ;;  %v2363_v28 = vrot.slane %v2362_v38, 1  ;;  %v6221_v54 = vld [vmem:[%s6613_s2 + $0x20] sm:$0xff]  ;;  %v2682_v44 = vsel %vm2650_vm7, 1, %v6777_v2  ;;  %v2571_v21 = vsel %vm2539_vm8, %v6236_v62, -inf  ;;  %v2680_v40 = vsel %vm2648_vm10, 1, %v6777_v2 }
 0x281   :  { %585 = vmatpush.msra.mxu0 %v5643_v61  ;;  %638 = vmatpush.msra.mxu1 %v5617_v3  ;;  %v2564_v27 = vsel %vm2532_vm9, %v6221_v54, -inf  ;;  %v2681_v3 = vsel %vm2649_vm6, 1, %v6777_v2  ;;  %vm6244_vm11 = vcmp.eq.s32.totalorder %v92_v31, %v6106_v5  ;;  %v2597_v26 = vmax.f32 %v2571_v21, %v2598_v59  ;;  %v3084_v5 = vld [vmem:[%s6612_s1 + $0xa0] sm:$0xff] }
 0x282   :  { %687 = vmatpush.msra.mxu2 %v6974_v4  ;;  %748 = vmatpush.msra.mxu3 %v6975_v6  ;;  %v2592_v61 = vmax.f32 %v2560_v20, %v2564_v27  ;;  %v2364_v30 = vmax.f32 %v2362_v38, %v2363_v28  ;;  %v6979_v38 = vld [vmem:[#allocation22_spill] sm:$0xff]  ;;  %vm2652_vm12 = vcmp.eq.s32.totalorder %v3084_v5, 7  ;;  %vm2542_vm14 = vcmp.eq.s32.totalorder %v6200_v24, 1  ;;  %v3085_v28 = vld [vmem:[%s6612_s1 + $0xa8] sm:$0xff]  ;;  %v6981_v27 = vld [vmem:[#allocation41_spill] sm:$0xff] }
 0x283   :  { %588 = vmatpush.msra.mxu0 %v5653_v7  ;;  %640 = vmatpush.msra.mxu1 %v6975_v6  ;;  %v6978_v7 = vand.u32 4294901760, %v5758_v35  ;;  %vm2531_vm15 = vcmp.eq.s32.totalorder %v2443_v63, 1  ;;  %v2936_v31 = vsel %vm6244_vm11, 1.0, %v3177_v46  ;;  %vm2653_vm0 = vcmp.eq.s32.totalorder %v3085_v28, 7  ;;  %v6982_v4 = vld [vmem:[#allocation11_spill] sm:$0xff]  ;;  %v3090_v28 = vld [vmem:[%s6612_s1 + $0xc0] sm:$0xff] }
 0x284   :  { %750 = vmatpush.msra.mxu3 %v6979_v38  ;;  %v2366_v50 = vmax.f32 %v2365_v43, %v2364_v30  ;;  %v2601_v18 = vmax.f32 %v2597_v26, %v2592_v61  ;;  %v6980_v14 = vand.u32 4294901760, %v5780_v57  ;;  %v2684_v46 = vsel %vm2652_vm12, 1, %v6777_v2  ;;  %v6282_v43 = vld [vmem:[%s6613_s2 + $0x38] sm:$0xff]  ;;  %2939 = vmatmul.msk.f32.vlgmr.msrb.gmra.mxu1 %vm6136_vm13, %v3178_v53 }
 0x285   :  { %691 = vmatpush.msra.mxu2 %v6978_v7  ;;  %591 = vmatpush.msra.mxu0 %v6973_v60  ;;  %v2574_v60 = vsel %vm2542_vm14, %v6981_v27, -inf  ;;  %v2563_v6 = vsel %vm2531_vm15, %v6982_v4, -inf  ;;  %v2685_v63 = vsel %vm2653_vm0, 1, %v6777_v2  ;;  %v6987_v7 = vld [vmem:[#allocation40_spill] sm:$0xff]  ;;  %vm2656_vm6 = vcmp.eq.s32.totalorder %v3090_v28, 7 }
 0x286   :  { %642 = vmatpush.msra.mxu1 %v6979_v38  ;;  %2748 = vperm.xlu1 %2950, %v2681_v3   ;;  %2367 = vst [vmem:[#allocation2 + $0x5] sm:$0x1] %v2366_v50  ;;  %v2455_v59 = vpop.permute.xlu1 %2454  ;;  %v2485_v25 = vpop.permute.xlu2 %2484  ;;  %v6983_v3 = vld [vmem:[#allocation42_spill] sm:$0xff]  ;;  %v2596_v30 = vmax.f32 %v2574_v60, %v2601_v18  ;;  %v6988_v18 = vand.u32 4294901760, %v5903_v51  ;;  %v6328_v27 = vld [vmem:[%s6613_s2 + $0x50] sm:$0xff] }
 0x287   :  { %2751 = vperm.xlu2 %2951, %v2682_v44   ;;  %2745 = vperm.xlu0 %2949, %v2680_v40   ;;  %vm2535_vm1 = vcmp.eq.s32.totalorder %v2455_v59, 1  ;;  %v2452_v20 = vpop.permute.xlu0 %2451  ;;  %v6984_v44 = vand.u32 4294901760, %v6983_v3  ;;  %vm2545_vm3 = vcmp.eq.s32.totalorder %v2485_v25, 1  ;;  %v6986_v40 = vand.u32 4294901760, %v5870_v32 }
 0x288   :  { %594 = vmatpush.msra.mxu0 %v5758_v35  ;;  %695 = vmatpush.msra.mxu2 %v6980_v14  ;;  %v3086_v35 = vld [vmem:[%s6612_s1 + $0x98] sm:$0xff]  ;;  %v2567_v61 = vsel %vm2535_vm1, %v6282_v43, -inf  ;;  %vm2534_vm4 = vcmp.eq.s32.totalorder %v2452_v20, 1  ;;  %v2577_v26 = vsel %vm2545_vm3, %v5894_v0, -inf }
 0x289   :  { %752 = vmatpush.msra.mxu3 %v5732_v16  ;;  %vm2651_vm2 = vcmp.eq.s32.totalorder %v3086_v35, 7  ;;  %644 = vmatpush.msra.mxu1 %v5732_v16  ;;  %v6288_v16 = vsub.f32 %v2936_v31, %v2936_v31  ;;  %v2595_v24 = vmax.f32 %v2563_v6, %v2567_v61  ;;  %v6308_v31 = vld [vmem:[%s6613_s2 + $0x30] sm:$0xff]  ;;  %v3089_v0 = vld [vmem:[%s6612_s1 + $0xb8] sm:$0xff]  ;;  %v6989_v35 = vand.u32 4294901760, %v5914_v1 }
 0x28a   :  { %597 = vmatpush.msra.mxu0 %v5780_v57  ;;  %699 = vmatpush.msra.mxu2 %v6984_v44  ;;  %v6985_v57 = vld [vmem:[#allocation39_spill] sm:$0xff]  ;;  %v2683_v21 = vsel %vm2651_vm2, 1, %v6777_v2  ;;  %vm2655_vm5 = vcmp.eq.s32.totalorder %v3089_v0, 7  ;;  %v2688_v6 = vsel %vm2656_vm6, 1, %v6777_v2  ;;  %v6990_v61 = vand.u32 4294901760, %v5918_v55 }
 0x28b   :  { %754 = vmatpush.msra.mxu3 %v6985_v57  ;;  %646 = vmatpush.msra.mxu1 %v6985_v57  ;;  %v2600_v38 = vmax.f32 %v2596_v30, %v2595_v24  ;;  %v475_v50 = vand.u32 4294901760, %v6288_v16  ;;  %v6991_v57 = vand.u32 4294901760, %v5996_v19  ;;  %v6992_v30 = vld [vmem:[#allocation45_spill] sm:$0xff]  ;;  %v6993_v24 = vld [vmem:[#allocation31_spill] sm:$0xff]  ;;  %v6995_v0 = vand.u32 4294901760, %v6027_v52 }
 0x28c   :  { %600 = vmatpush.msra.mxu0 %v6983_v3  ;;  %703 = vmatpush.msra.mxu2 %v6986_v40 }
 0x28d   :  { %756 = vmatpush.msra.mxu3 %v6987_v7  ;;  %648 = vmatpush.msra.mxu1 %v6987_v7  ;;  %v2604_v5 = vmax.f32 %v2600_v38, %v2577_v26  ;;  %v476_v60 = vsub.f32 %v6288_v16, %v475_v50  ;;  %v6994_v26 = vand.u32 4294901760, %v6009_v56 }
 0x28e   :  { %603 = vmatpush.msra.mxu0 %v5870_v32  ;;  %2757 = vperm.xlu1 %2950, %v2684_v46   ;;  %v2566_v32 = vsel %vm2534_vm4, %v6308_v31, -inf  ;;  %v2464_v59 = vpop.permute.xlu1 %2463  ;;  %v2494_v25 = vpop.permute.xlu2 %2493  ;;  %v3091_v46 = vld [vmem:[%s6612_s1 + $0xb0] sm:$0xff] }
 0x28f   :  { %2760 = vperm.xlu2 %2951, %v2685_v63   ;;  %2754 = vperm.xlu0 %2949, %v2683_v21   ;;  %v2599_v14 = vmax.f32 %v2566_v32, %v2604_v5  ;;  %vm2538_vm7 = vcmp.eq.s32.totalorder %v2464_v59, 1  ;;  %vm2548_vm8 = vcmp.eq.s32.totalorder %v2494_v25, 1  ;;  %v2461_v20 = vpop.permute.xlu0 %2460  ;;  %vm2654_vm9 = vcmp.eq.s32.totalorder %v3091_v46, 7  ;;  %v6370_v5 = vld [vmem:[%s6613_s2 + $0x68] sm:$0xff] }
 0x290   :  { %707 = vmatpush.msra.mxu2 %v6988_v18  ;;  %758 = vmatpush.msra.mxu3 %v5814_v42  ;;  %v2580_v3 = vsel %vm2548_vm8, %v5983_v17, -inf  ;;  %vm2537_vm10 = vcmp.eq.s32.totalorder %v2461_v20, 1  ;;  %v3097_v46 = vld [vmem:[%s6612_s1 + $0xe8] sm:$0xff] }
 0x291   :  { %606 = vmatpush.msra.mxu0 %v5903_v51  ;;  %650 = vmatpush.msra.mxu1 %v5814_v42  ;;  %v2570_v51 = vsel %vm2538_vm7, %v6328_v27, -inf  ;;  %v2687_v42 = vsel %vm2655_vm5, 1, %v6777_v2  ;;  %v2569_v63 = vsel %vm2537_vm10, %v6993_v24, -inf  ;;  %vm2661_vm3 = vcmp.eq.s32.totalorder %v3097_v46, 7 }
 0x292   :  { %711 = vmatpush.msra.mxu2 %v6989_v35  ;;  %760 = vmatpush.msra.mxu3 %v5866_v11  ;;  %v2603_v4 = vmax.f32 %v2599_v14, %v2570_v51 }
 0x293   :  { %609 = vmatpush.msra.mxu0 %v5914_v1  ;;  %652 = vmatpush.msra.mxu1 %v5866_v11  ;;  %v2686_v1 = vsel %vm2654_vm9, 1, %v6777_v2  ;;  %v477_v11 = vand.u32 4294901760, %v476_v60 }
 0x294   :  { %715 = vmatpush.msra.mxu2 %v6990_v61  ;;  %762 = vmatpush.msra.mxu3 %v5884_v13  ;;  %v2607_v44 = vmax.f32 %v2603_v4, %v2580_v3 }
 0x295   :  { %612 = vmatpush.msra.mxu0 %v5918_v55  ;;  %654 = vmatpush.msra.mxu1 %v5884_v13  ;;  %v3093_v13 = vld [vmem:[%s6612_s1 + $0xd0] sm:$0xff]  ;;  %v3094_v55 = vld [vmem:[%s6612_s1 + $0xd8] sm:$0xff] }
 0x296   :  { %719 = vmatpush.msra.mxu2 %v6991_v57  ;;  %2766 = vperm.xlu1 %2950, %v2687_v42   ;;  %v2473_v21 = vpop.permute.xlu1 %2472  ;;  %vm2658_vm12 = vcmp.eq.s32.totalorder %v3093_v13, 7  ;;  %vm2659_vm14 = vcmp.eq.s32.totalorder %v3094_v55, 7  ;;  %v2602_v7 = vmax.f32 %v2569_v63, %v2607_v44  ;;  %v7000_v63 = vld [vmem:[#allocation24_spill] sm:$0xff] }
 0x297   :  { %2769 = vperm.xlu2 %2951, %v2688_v6   ;;  %2763 = vperm.xlu0 %2949, %v2686_v1   ;;  %v2503_v40 = vpop.permute.xlu2 %2502  ;;  %vm2541_vm15 = vcmp.eq.s32.totalorder %v2473_v21, 1  ;;  %v2470_v38 = vpop.permute.xlu0 %2469  ;;  %v2690_v59 = vsel %vm2658_vm12, 1, %v6777_v2  ;;  %v2691_v25 = vsel %vm2659_vm14, 1, %v6777_v2  ;;  %v6998_v6 = vand.u32 4294901760, %v6149_v39  ;;  %v6445_v1 = vld [vmem:[%s6613_s2 + $0x98] sm:$0xff] }
 0x298   :  { %764 = vmatpush.msra.mxu3 %v6992_v30  ;;  %615 = vmatpush.msra.mxu0 %v5996_v19  ;;  %v3095_v19 = vld [vmem:[%s6612_s1 + $0xc8] sm:$0xff]  ;;  %v2573_v18 = vsel %vm2541_vm15, %v6370_v5, -inf  ;;  %vm2551_vm1 = vcmp.eq.s32.totalorder %v2503_v40, 1  ;;  %vm2540_vm2 = vcmp.eq.s32.totalorder %v2470_v38, 1  ;;  %v7001_v38 = vld [vmem:[#allocation46_spill] sm:$0xff] }
 0x299   :  { %656 = vmatpush.msra.mxu1 %v6992_v30  ;;  %723 = vmatpush.msra.mxu2 %v6994_v26  ;;  %vm2657_vm0 = vcmp.eq.s32.totalorder %v3095_v19, 7  ;;  %v2606_v32 = vmax.f32 %v2602_v7, %v2573_v18  ;;  %v7002_v19 = vld [vmem:[#allocation43_spill] sm:$0xff] }
 0x29a   :  { %766 = vmatpush.msra.mxu3 %v5947_v33  ;;  %478 = vmatmul.f32.vlgmr.msrb.gmra.mxu2 %v477_v11  ;;  %v2689_v28 = vsel %vm2657_vm0, 1, %v6777_v2 }
 0x29b   :  { %618 = vmatpush.msra.mxu0 %v6009_v56  ;;  %658 = vmatpush.msra.mxu1 %v5947_v33  ;;  %v6996_v56 = vld [vmem:[#allocation44_spill] sm:$0xff] }
 0x29c   :  { %727 = vmatpush.msra.mxu2 %v6995_v0  ;;  %768 = vmatpush.msra.mxu3 %v5986_v41  ;;  %v2583_v14 = vsel %vm2551_vm1, %v6996_v56, -inf  ;;  %v7003_v0 = vld [vmem:[#allocation16_spill] sm:$0xff] }
 0x29d   :  { %2938 = vmatmul.msk.f32.vlgmr.msrb.gmra.mxu0 %vm6136_vm13, %v3178_v53  ;;  %2940 = vmatmul.msk.f32.vlgmr.msrb.gmra.mxu3 %vm6244_vm11, %v3178_v53  ;;  %v2610_v33 = vmax.f32 %v2606_v32, %v2583_v14 }
 0x29e   :  { %621 = vmatpush.msra.mxu0 %v6027_v52  ;;  %2775 = vperm.xlu1 %2950, %v2690_v59   ;;  %v2482_v20 = vpop.permute.xlu1 %2481  ;;  %v3098_v52 = vld [vmem:[%s6612_s1 + $0xf0] sm:$0xff] }
 0x29f   :  { %2778 = vperm.xlu2 %2951, %v2691_v25   ;;  %2772 = vperm.xlu0 %2949, %v2689_v28   ;;  %vm2662_vm4 = vcmp.eq.s32.totalorder %v3098_v52, 7  ;;  %vm2544_vm5 = vcmp.eq.s32.totalorder %v2482_v20, 1  ;;  %v2479_v35 = vpop.permute.xlu0 %2478  ;;  %v2512_v4 = vpop.permute.xlu2 %2511  ;;  %v7004_v20 = vld [vmem:[#allocation38_spill] sm:$0xff] }
 0x2a0   :  { %660 = vmatpush.msra.mxu1 %v5986_v41  ;;  %731 = vmatpush.msra.mxu2 %v562_v23  ;;  %v3099_v41 = vld [vmem:[%s6612_s1 + $0xe0] sm:$0xff]  ;;  %v6997_v23 = vld [vmem:[#allocation23_spill] sm:$0xff]  ;;  %v2576_v60 = vsel %vm2544_vm5, %v6119_v36, -inf  ;;  %v2694_v42 = vsel %vm2662_vm4, 1, %v6777_v2  ;;  %vm2554_vm13 = vcmp.eq.s32.totalorder %v2512_v4, 1  ;;  %vm2543_vm7 = vcmp.eq.s32.totalorder %v2479_v35, 1 }
 0x2a1   :  { %770 = vmatpush.msra.mxu3 %v6005_v58  ;;  %624 = vmatpush.msra.mxu0 %v6055_v37  ;;  %vm2660_vm6 = vcmp.eq.s32.totalorder %v3099_v41, 7  ;;  %v2572_v51 = vsel %vm2540_vm2, %v6997_v23, -inf  ;;  %v2693_v37 = vsel %vm2661_vm3, 1, %v6777_v2  ;;  %v7005_v23 = vld [vmem:[#allocation20_spill] sm:$0xff] }
 0x2a2   :  { %662 = vmatpush.msra.mxu1 %v6005_v58  ;;  %735 = vmatpush.msra.mxu2 %v568_v12  ;;  %v2605_v15 = vmax.f32 %v2572_v51, %v2610_v33  ;;  %v2692_v58 = vsel %vm2660_vm6, 1, %v6777_v2 }
 0x2a3   :  { %772 = vmatpush.msra.mxu3 %v6018_v22  ;;  %627 = vmatpush.msra.mxu0 %v6090_v47 }
 0x2a4   :  { %664 = vmatpush.msra.mxu1 %v6018_v22  ;;  %739 = vmatpush.msra.mxu2 %v6998_v6  ;;  %v2609_v61 = vmax.f32 %v2605_v15, %v2576_v60  ;;  %v2586_v22 = vsel %vm2554_vm13, %v5763_v10, -inf  ;;  %v6999_v10 = vld [vmem:[#allocation9_spill] sm:$0xff] }
 0x2a5   :  { %774 = vmatpush.msra.mxu3 %v6046_v48  ;;  %2941 = vmatmul.msk.f32.vlgmr.msra.gmra.mxu2 %vm6244_vm11, %v3178_v53 }
 0x2a6   :  { %2784 = vperm.xlu1 %2950, %v2693_v37   ;;  %630 = vmatpush.msra.mxu0 %v6149_v39  ;;  %v2491_v47 = vpop.permute.xlu1 %2490  ;;  %v2613_v12 = vmax.f32 %v2609_v61, %v2586_v22  ;;  %v3100_v39 = vld [vmem:[%s6612_s1 + $0xf8] sm:$0xff] }
 0x2a7   :  { %2787 = vperm.xlu2 %2951, %v2694_v42   ;;  %2781 = vperm.xlu0 %2949, %v2692_v58   ;;  %vm2547_vm8 = vcmp.eq.s32.totalorder %v2491_v47, 1  ;;  %v2488_v3 = vpop.permute.xlu0 %2487  ;;  %vm2663_vm9 = vcmp.eq.s32.totalorder %v3100_v39, 7 }
 0x2a8   :  { %666 = vmatpush.msra.mxu1 %v6046_v48  ;;  %776 = vmatpush.msra.mxu3 %v6122_v8  ;;  %v2575_v48 = vsel %vm2543_vm7, %v6999_v10, -inf  ;;  %v2579_v45 = vsel %vm2547_vm8, %v6445_v1, -inf  ;;  %v2695_v44 = vsel %vm2663_vm9, 1, %v6777_v2  ;;  %vm2546_vm10 = vcmp.eq.s32.totalorder %v2488_v3, 1  ;;  %v2629_v3 = vld [vmem:[#allocation2 + $0x6] sm:$0x1] }
 0x2a9   :  { %633 = vmatmul.f32.vlgmr.msra.gmra.mxu0 %v6288_v16  ;;  %2942 = vmatmul.msk.f32.vlgmr.msra.gmra.mxu3 %vm6244_vm11, %v3178_v53  ;;  %v2521_v53 = vpop.permute.xlu2 %2520  ;;  %v2617_v57 = vmax.f32 %v2613_v12, %v2575_v48  ;;  %v2578_v24 = vsel %vm2546_vm10, %v5844_v9, -inf }
 0x2aa   :  { %668 = vmatpush.msra.mxu1 %v6122_v8  ;;  %vm2557_vm11 = vcmp.eq.s32.totalorder %v2521_v53, 1 }
 0x2ab   :  { %672 = vmatmul.f32.vlgmr.msra.gmra.mxu1 %v475_v50  ;;  %v2608_v11 = vmax.f32 %v2579_v45, %v2617_v57  ;;  %v2589_v16 = vsel %vm2557_vm11, %v5677_v49, -inf }
 0x2ad   :  { %v2612_v50 = vmax.f32 %v2608_v11, %v2589_v16 }
 0x2ae   :  { %v2500_v8 = vpop.permute.xlu1 %2499 }
 0x2af   :  { %2790 = vperm.xlu0 %2949, %v2695_v44   ;;  %v2497_v30 = vpop.permute.xlu0 %2496  ;;  %vm2550_vm12 = vcmp.eq.s32.totalorder %v2500_v8, 1  ;;  %v2616_v40 = vmax.f32 %v2612_v50, %v2578_v24 }
 0x2b0   :  { %v2582_v21 = vsel %vm2550_vm12, %v7000_v63, -inf  ;;  %vm2549_vm14 = vcmp.eq.s32.totalorder %v2497_v30, 1 }
 0x2b1   :  { %v2620_v55 = vmax.f32 %v2616_v40, %v2582_v21  ;;  %v6452_v7 = vpop.permute.xlu2 %2697  ;;  %v2581_v26 = vsel %vm2549_vm14, %v7001_v38, -inf }
 0x2b2   :  { %vm2792_vm13 = vcmp.eq.s32.totalorder %v6452_v7, 1  ;;  %v3103_v7 = vld [vmem:[%s6613_s2] sm:$0xff] }
 0x2b3   :  { %v2611_v49 = vmax.f32 %v2581_v26, %v2620_v55 }
 0x2b6   :  { %v2509_v13 = vpop.permute.xlu1 %2508 }
 0x2b7   :  { %vm2553_vm15 = vcmp.eq.s32.totalorder %v2509_v13, 1  ;;  %v2506_v2 = vpop.permute.xlu0 %2505 }
 0x2b8   :  { %v2585_v18 = vsel %vm2553_vm15, %v7002_v19, -inf  ;;  %vm2552_vm0 = vcmp.eq.s32.totalorder %v2506_v2, 1  ;;  %v3102_v2 = vld [vmem:[%s6613_s2 + $0x28] sm:$0xff] }
 0x2b9   :  { %v2615_v32 = vmax.f32 %v2611_v49, %v2585_v18  ;;  %v2584_v25 = vsel %vm2552_vm0, %v5863_v34, -inf  ;;  %v6458_v56 = vpop.permute.xlu2 %2706 }
 0x2ba   :  { %vm2795_vm9 = vcmp.eq.s32.totalorder %v6458_v56, 1 }
 0x2bb   :  { %v2619_v14 = vmax.f32 %v2615_v32, %v2584_v25  ;;  %v2824_v32 = vsel %vm2792_vm13, %v3103_v7, -inf }
 0x2be   :  { %v2518_v59 = vpop.permute.xlu1 %2517 }
 0x2bf   :  { %vm2556_vm1 = vcmp.eq.s32.totalorder %v2518_v59, 1  ;;  %v2515_v9 = vpop.permute.xlu0 %2514 }
 0x2c0   :  { %v2588_v28 = vsel %vm2556_vm1, %v7003_v0, -inf  ;;  %vm2555_vm2 = vcmp.eq.s32.totalorder %v2515_v9, 1  ;;  %v3105_v9 = vld [vmem:[%s6613_s2 + $0x40] sm:$0xff] }
 0x2c1   :  { %v2614_v33 = vmax.f32 %v2588_v28, %v2619_v14  ;;  %v2587_v46 = vsel %vm2555_vm2, %v7004_v20, -inf  ;;  %v2716_v34 = vpop.permute.xlu2 %2715  ;;  %v3106_v14 = vld [vmem:[%s6613_s2 + $0x18] sm:$0xff] }
 0x2c2   :  { %vm2798_vm11 = vcmp.eq.s32.totalorder %v2716_v34, 1 }
 0x2c3   :  { %v2618_v35 = vmax.f32 %v2614_v33, %v2587_v46  ;;  %v2827_v33 = vsel %vm2795_vm9, %v3106_v14, -inf  ;;  %v2830_v20 = vsel %vm2798_vm11, %v6308_v31, -inf  ;;  %v3107_v46 = vld [vmem:[%s6613_s2 + $0x48] sm:$0xff]  ;;  %v3117_v14 = vld [vmem:[%s6613_s2 + $0xb8] sm:$0xff] }
 0x2c6   :  { %v2527_v52 = vpop.permute.xlu1 %2526 }
 0x2c7   :  { %vm2559_vm3 = vcmp.eq.s32.totalorder %v2527_v52, 1  ;;  %v2524_v41 = vpop.permute.xlu0 %2523 }
 0x2c8   :  { %v2591_v51 = vsel %vm2559_vm3, %v7005_v23, -inf  ;;  %vm2558_vm4 = vcmp.eq.s32.totalorder %v2524_v41, 1 }
 0x2c9   :  { %v2621_v60 = vmax.f32 %v2618_v35, %v2591_v51  ;;  %v2590_v4 = vsel %vm2558_vm4, %v6111_v29, -inf  ;;  %v2725_v47 = vpop.permute.xlu2 %2724  ;;  %v3108_v51 = vld [vmem:[%s6613_s2 + $0x10] sm:$0xff] }
 0x2ca   :  { %vm2801_vm10 = vcmp.eq.s32.totalorder %v2725_v47, 1 }
 0x2cb   :  { %v2622_v15 = vmax.f32 %v2590_v4, %v2621_v60  ;;  %v2833_v52 = vsel %vm2801_vm10, %v3107_v46, -inf }
 0x2cd   :  { %v2623_v37 = vrot.slane %v2622_v15, 4 }
 0x2ce   :  { %v6463_v42 = vpop.permute.xlu1 %2703 }
 0x2cf   :  { %v2624_v6 = vmax.f32 %v2622_v15, %v2623_v37  ;;  %v2701_v58 = vpop.permute.xlu0 %2700  ;;  %vm2794_vm12 = vcmp.eq.s32.totalorder %v6463_v42, 1  ;;  %v3109_v37 = vld [vmem:[%s6613_s2 + $0x60] sm:$0xff] }
 0x2d0   :  { %vm2793_vm7 = vcmp.eq.s32.totalorder %v2701_v58, 1  ;;  %v2826_v56 = vsel %vm2794_vm12, %v3108_v51, -inf }
 0x2d1   :  { %v2625_v61 = vrot.slane %v2624_v6, 2  ;;  %v2734_v44 = vpop.permute.xlu2 %2733 }
 0x2d2   :  { %vm2804_vm0 = vcmp.eq.s32.totalorder %v2734_v44, 1  ;;  %v2858_v44 = vmax.f32 %v2826_v56, %v2830_v20 }
 0x2d3   :  { %v2626_v22 = vmax.f32 %v2624_v6, %v2625_v61  ;;  %v2836_v6 = vsel %vm2804_vm0, %v3109_v37, -inf }
 0x2d5   :  { %v2627_v12 = vrot.slane %v2626_v22, 1 }
 0x2d7   :  { %v2713_v39 = vpop.permute.xlu1 %2712  ;;  %v2628_v10 = vmax.f32 %v2626_v22, %v2627_v12 }
 0x2d8   :  { %v2710_v48 = vpop.permute.xlu0 %2709  ;;  %vm2797_vm5 = vcmp.eq.s32.totalorder %v2713_v39, 1 }
 0x2d9   :  { %v2630_v45 = vmax.f32 %v2629_v3, %v2628_v10  ;;  %v6469_v30 = vpop.permute.xlu2 %2742  ;;  %vm2796_vm6 = vcmp.eq.s32.totalorder %v2710_v48, 1  ;;  %v2829_v38 = vsel %vm2797_vm5, %v3102_v2, -inf }
 0x2da   :  { %v2828_v26 = vsel %vm2796_vm6, %v6221_v54, -inf  ;;  %v3104_v54 = vld [vmem:[%s6613_s2 + $0x8] sm:$0xff]  ;;  %vm2807_vm6 = vcmp.eq.s32.totalorder %v6469_v30, 1 }
 0x2db   :  { %2631 = vst [vmem:[#allocation2 + $0x6] sm:$0x1] %v2630_v45  ;;  %v2825_v59 = vsel %vm2793_vm7, %v3104_v54, -inf  ;;  %v2856_v28 = vmax.f32 %v2824_v32, %v2828_v26  ;;  %v3114_v30 = vld [vmem:[%s6613_s2 + $0xc8] sm:$0xff] }
 0x2dc   :  { %v2857_v0 = vmax.f32 %v2825_v59, %v2829_v38  ;;  %v3115_v38 = vld [vmem:[%s6613_s2 + $0x90] sm:$0xff] }
 0x2de   :  { %v2861_v34 = vmax.f32 %v2857_v0, %v2833_v52 }
 0x2df   :  { %v2722_v53 = vpop.permute.xlu1 %2721 }
 0x2e0   :  { %v2719_v57 = vpop.permute.xlu0 %2718  ;;  %vm2800_vm8 = vcmp.eq.s32.totalorder %v2722_v53, 1 }
 0x2e1   :  { %v6473_v24 = vpop.permute.xlu2 %2751  ;;  %v2832_v25 = vsel %vm2800_vm8, %v3105_v9, -inf  ;;  %vm2799_vm14 = vcmp.eq.s32.totalorder %v2719_v57, 1 }
 0x2e2   :  { %v2860_v41 = vmax.f32 %v2856_v28, %v2832_v25  ;;  %v2831_v31 = vsel %vm2799_vm14, %v6282_v43, -inf  ;;  %v3110_v43 = vld [vmem:[%s6613_s2 + $0x88] sm:$0xff]  ;;  %vm2810_vm9 = vcmp.eq.s32.totalorder %v6473_v24, 1 }
 0x2e3   :  { %v2859_v22 = vmax.f32 %v2827_v33, %v2831_v31  ;;  %v2842_v26 = vsel %vm2810_vm9, %v3115_v38, -inf }
 0x2e4   :  { %v2864_v3 = vmax.f32 %v2860_v41, %v2836_v6 }
 0x2e8   :  { %v6465_v11 = vpop.permute.xlu1 %2730 }
 0x2e9   :  { %v6467_v8 = vpop.permute.xlu0 %2727  ;;  %v6475_v40 = vpop.permute.xlu2 %2760  ;;  %vm2803_vm3 = vcmp.eq.s32.totalorder %v6465_v11, 1 }
 0x2ea   :  { %vm2802_vm4 = vcmp.eq.s32.totalorder %v6467_v8, 1  ;;  %v2835_v47 = vsel %vm2803_vm3, %v6236_v62, -inf  ;;  %vm2813_vm13 = vcmp.eq.s32.totalorder %v6475_v40, 1 }
 0x2eb   :  { %v2834_v10 = vsel %vm2802_vm4, %v6328_v27, -inf  ;;  %v2863_v57 = vmax.f32 %v2859_v22, %v2835_v47  ;;  %v3111_v27 = vld [vmem:[%s6613_s2 + $0x78] sm:$0xff] }
 0x2ec   :  { %v2839_v8 = vsel %vm2807_vm6, %v3111_v27, -inf  ;;  %v3122_v22 = vld [vmem:[%s6613_s2 + $0xd8] sm:$0xff] }
 0x2ed   :  { %v2867_v54 = vmax.f32 %v2863_v57, %v2839_v8 }
 0x2f0   :  { %v6471_v16 = vpop.permute.xlu1 %2739 }
 0x2f1   :  { %v2737_v50 = vpop.permute.xlu0 %2736  ;;  %v6489_v18 = vpop.permute.xlu2 %2769  ;;  %vm2806_vm7 = vcmp.eq.s32.totalorder %v6471_v16, 1 }
 0x2f2   :  { %vm2805_vm15 = vcmp.eq.s32.totalorder %v2737_v50, 1  ;;  %vm2816_vm11 = vcmp.eq.s32.totalorder %v6489_v18, 1 }
 0x2f3   :  { %v2837_v60 = vsel %vm2805_vm15, %v6370_v5, -inf }
 0x2f4   :  { %v2865_v12 = vmax.f32 %v2861_v34, %v2837_v60 }
 0x2f8   :  { %v2749_v63 = vpop.permute.xlu1 %2748 }
 0x2f9   :  { %v2746_v21 = vpop.permute.xlu0 %2745  ;;  %v239_v35 = vpop.f32.mrf.mxu1  ;;  %vm2809_vm1 = vcmp.eq.s32.totalorder %v2749_v63, 1  ;;  %v3113_v63 = vld [vmem:[%s6613_s2 + $0xa8] sm:$0xff] }
 0x2fa   :  { %vm2808_vm2 = vcmp.eq.s32.totalorder %v2746_v21, 1  ;;  %v2841_v5 = vsel %vm2809_vm1, %v3110_v43, -inf  ;;  %v6548_v45 = vpop.permute.xlu2 %2778  ;;  %v2845_v21 = vsel %vm2813_vm13, %v3113_v63, -inf }
 0x2fb   :  { %v2840_v42 = vsel %vm2808_vm2, %v6119_v36, -inf  ;;  %v2869_v48 = vmax.f32 %v2865_v12, %v2841_v5  ;;  %vm2819_vm2 = vcmp.eq.s32.totalorder %v6548_v45, 1 }
 0x2fc   :  { %v2868_v53 = vmax.f32 %v2864_v3, %v2840_v42  ;;  %v2851_v47 = vsel %vm2819_vm2, %v3122_v22, -inf }
 0x2fd   :  { %v138_v4 = vpop.f32.mrf.mxu0  ;;  %v293_v61 = vpop.f32.mrf.mxu2  ;;  %v2873_v40 = vmax.f32 %v2869_v48, %v2845_v21 }
 0x2fe   :  { %v240_v15 = vadd.f32 %v239_v35, %v138_v4  ;;  %v3120_v35 = vld [vmem:[%s6613_s2 + $0xe0] sm:$0xff]  ;;  %v3121_v4 = vld [vmem:[%s6613_s2 + $0xd0] sm:$0xff] }
 0x2ff   :  { %v332_v11 = vpop.f32.mrf.mxu3 }
 0x300   :  { %v6477_v13 = vpop.permute.xlu1 %2757  ;;  %v294_v62 = vadd.f32 %v293_v61, %v240_v15 }
 0x301   :  { %v6479_v55 = vpop.permute.xlu0 %2754  ;;  %vm2812_vm5 = vcmp.eq.s32.totalorder %v6477_v13, 1  ;;  %v2862_v13 = vmax.f32 %v2858_v44, %v2834_v10  ;;  %v438_v43 = vpop.f32.mrf.mxu1 }
 0x302   :  { %v2844_v36 = vsel %vm2812_vm5, %v5983_v17, -inf  ;;  %v3112_v17 = vld [vmem:[%s6613_s2 + $0x70] sm:$0xff]  ;;  %vm2811_vm10 = vcmp.eq.s32.totalorder %v6479_v55, 1  ;;  %v333_v18 = vadd.f32 %v332_v11, %v294_v62  ;;  %v3116_v55 = vld [vmem:[%s6613_s2 + $0xc0] sm:$0xff]  ;;  %v2788_v60 = vpop.permute.xlu2 %2787 }
 0x303   :  { %v2838_v16 = vsel %vm2806_vm7, %v3112_v17, -inf  ;;  %v2872_v50 = vmax.f32 %v2868_v53, %v2844_v36  ;;  %v2848_v32 = vsel %vm2816_vm11, %v3116_v55, -inf  ;;  %v2843_v9 = vsel %vm2811_vm10, %v6445_v1, -inf  ;;  %v3119_v1 = vld [vmem:[%s6613_s2 + $0xb0] sm:$0xff] }
 0x304   :  { %v2866_v7 = vmax.f32 %v2862_v13, %v2838_v16  ;;  %v2871_v51 = vmax.f32 %v2867_v54, %v2843_v9  ;;  %vm2822_vm3 = vcmp.eq.s32.totalorder %v2788_v60, 1 }
 0x305   :  { %v2876_v0 = vmax.f32 %v2872_v50, %v2848_v32  ;;  %v2854_v10 = vsel %vm2822_vm3, %v6111_v29, -inf }
 0x306   :  { %v2870_v56 = vmax.f32 %v2866_v7, %v2842_v26 }
 0x308   :  { %v6486_v19 = vpop.permute.xlu1 %2766 }
 0x309   :  { %v6491_v49 = vpop.permute.xlu0 %2763  ;;  %vm2815_vm12 = vcmp.eq.s32.totalorder %v6486_v19, 1 }
 0x30a   :  { %vm2814_vm14 = vcmp.eq.s32.totalorder %v6491_v49, 1  ;;  %v2847_v33 = vsel %vm2815_vm12, %v3117_v14, -inf  ;;  %v3118_v49 = vld [vmem:[%s6613_s2 + $0xe8] sm:$0xff]  ;;  %s3179_s2 = smov [#allocation4]  }
 0x30b   :  { %v2846_v46 = vsel %vm2814_vm14, %v3119_v1, -inf  ;;  %v2875_v15 = vmax.f32 %v2871_v51, %v2847_v33  ;;  %s2919_s13 = sshll.u32 %s3179_s2, 4  ;;  %s2920_s13 = int_to_ptr.vmem [resolvable:$true] %s2919_s13 }
 0x30c   :  { %v2874_v37 = vmax.f32 %v2870_v56, %v2846_v46 }
 0x310   :  { %v6535_v58 = vpop.permute.xlu1 %2775 }
 0x311   :  { %v2773_v39 = vpop.permute.xlu0 %2772  ;;  %vm2818_vm0 = vcmp.eq.s32.totalorder %v6535_v58, 1 }
 0x312   :  { %vm2817_vm8 = vcmp.eq.s32.totalorder %v2773_v39, 1  ;;  %v2850_v34 = vsel %vm2818_vm0, %v3121_v4, -inf  ;;  %v2879_v39 = vmax.f32 %v2875_v15, %v2851_v47 }
 0x313   :  { %v2849_v2 = vsel %vm2817_vm8, %v3114_v30, -inf  ;;  %v2878_v58 = vmax.f32 %v2874_v37, %v2850_v34 }
 0x314   :  { %v2877_v25 = vmax.f32 %v2873_v40, %v2849_v2  ;;  %v2893_v2 = vld [vmem:[#allocation2 + $0x7] sm:$0x1] }
 0x315   :  { %v2882_v45 = vmax.f32 %v2878_v58, %v2854_v10 }
 0x318   :  { %v2785_v59 = vpop.permute.xlu1 %2784 }
 0x319   :  { %vm2821_vm15 = vcmp.eq.s32.totalorder %v2785_v59, 1  ;;  %v2782_v24 = vpop.permute.xlu0 %2781 }
 0x31a   :  { %v401_v28 = vpop.f32.mrf.mxu0  ;;  %v2853_v20 = vsel %vm2821_vm15, %v3118_v49, -inf  ;;  %vm2820_vm1 = vcmp.eq.s32.totalorder %v2782_v24, 1 }
 0x31b   :  { %v2881_v52 = vmax.f32 %v2877_v25, %v2853_v20  ;;  %v2852_v19 = vsel %vm2820_vm1, %v3120_v35, -inf  ;;  %v402_v41 = vadd.f32 %v401_v28, %v333_v18 }
 0x31c   :  { %v2880_v31 = vmax.f32 %v2876_v0, %v2852_v19 }
 0x31d   :  { %v479_v5 = vpop.f32.mrf.mxu2  ;;  %v439_v42 = vadd.f32 %v438_v43, %v402_v41 }
 0x31e   :  { %v2884_v6 = vmax.f32 %v2880_v31, %v2881_v52 }
 0x31f   :  { %v480_v3 = vadd.f32 %v479_v5, %v439_v42 }
 0x320   :  { %v580_v61 = vpop.f32.mrf.mxu3 }
 0x321   :  { %v2791_v12 = vpop.permute.xlu0 %2790  ;;  %v581_v48 = vadd.f32 %v580_v61, %v480_v3 }
 0x322   :  { %vm2823_vm4 = vcmp.eq.s32.totalorder %v2791_v12, 1 }
 0x323   :  { %v2855_v36 = vsel %vm2823_vm4, %v7005_v23, -inf }
 0x324   :  { %v2883_v53 = vmax.f32 %v2879_v39, %v2855_v36 }
 0x326   :  { %v2885_v62 = vmax.f32 %v2882_v45, %v2883_v53  ;;  %v634_v44 = vpop.f32.mrf.mxu0 }
 0x327   :  { %v635_v57 = vadd.f32 %v634_v44, %v581_v48 }
 0x328   :  { %v2886_v11 = vmax.f32 %v2884_v6, %v2885_v62  ;;  %v673_v27 = vpop.f32.mrf.mxu1  ;;  %v742_v8 = vpop.f32.mrf.mxu2 }
 0x329   :  { %v674_v17 = vadd.f32 %v673_v27, %v635_v57 }
 0x32a   :  { %v2887_v16 = vrot.slane %v2886_v11, 4 }
 0x32b   :  { %v743_v50 = vadd.f32 %v742_v8, %v674_v17 }
 0x32c   :  { %v2888_v63 = vmax.f32 %v2886_v11, %v2887_v16  ;;  %v779_v21 = vpop.f32.mrf.mxu3 }
 0x32d   :  { %v780_v29 = vadd.f32 %v779_v21, %v743_v50 }
 0x32e   :  { %v2889_v23 = vrot.slane %v2888_v63, 2 }
 0x32f   :  { %783 = vst [vmem:[#allocation4] sm:$0xff] %v780_v29 }
 0x330   :  { %v2890_v13 = vmax.f32 %v2888_v63, %v2889_v23  ;;  %2924 = dma.vmem_to_hbm [thread:$0]  %s2920_s13, 128, %s2922_s16, [#allocation5]  }
 0x332   :  { %v2891_v30 = vrot.slane %v2890_v13, 1 }
 0x334   :  { %v2892_v38 = vmax.f32 %v2890_v13, %v2891_v30 }
 0x336   :  { %v2894_v26 = vmax.f32 %v2893_v2, %v2892_v38 }
 0x338   :  { %2895 = vst [vmem:[#allocation2 + $0x7] sm:$0x1] %v2894_v26 }
 0x33f   :  { %v2899_v40 = vld [vmem:[#allocation2] sm:$0xff] }
 0x340   :  { %vm2900_vm5 = vcmp.eq.f32.partialorder %v2899_v40, -inf }
 0x341   :  { %v2901_v18 = vsel %vm2900_vm5, 0.0, %v2899_v40 }
 0x342   :  { %2902 = vst [vmem:[#allocation2] sm:$0xff] %v2901_v18 }
 0x343   :  { %2913 = dma.vmem_to_hbm [thread:$0]  %s2909_s18, 128, %s2911_s21, [#allocation3]  }
 0x344   :  { %3171 = dma.done.wait [#allocation3], 128  }
 0x345   :  { %3172 = vsyncadd [#allocation3], 4294967168 }
 0x346   :  { %3173 = dma.done.wait [#allocation5], 128  }
 0x347   :  { %3174 = vsyncadd [#allocation5], 4294967168 }
 0x348   :  { %2933 = vsyncpa [#allocation3], 1 }
 0x349   :  { %2934 = vsyncpa [#allocation5], 1 }

</bundles_post_ra>
